<compile_context>
chip_gen: v5e
topology: v5e:2x2
jax: 0.10.0
libtpu: 0.0.40
codegen_flags: <defaults>
</compile_context>

<pallas_src>
import functools
import math

import jax
import jax.numpy as jnp
from jax.experimental import pallas as pl
from jax.experimental.pallas import tpu as pltpu


# ----------------------------- BlockSpec helpers ----------------------------

def _full_spec(x):
    """Whole-array block, revisited by every grid step (weights)."""
    nd = x.ndim
    return pl.BlockSpec(tuple(x.shape), lambda b: (0,) * nd)


def _batch_spec(x):
    """Leading-axis (batch) split: one batch element per grid step."""
    nd = x.ndim
    return pl.BlockSpec((1,) + tuple(x.shape[1:]), lambda b: (b,) + (0,) * (nd - 1))


# --------------------- Kernel 1: fused embedding front-end ------------------

def _embed_fuse_kernel(bert_h_ref, bln_g_ref, bln_b_ref, at_w_ref, at_b_ref,
                       at2_wt_ref, at2_b_ref, e_ref, r_ref, pos_ref,
                       v_w_ref, v_b_ref, src_ref, tgt_ref):
    """One batch element per program.  Produces src = E + P + V, tgt = R + P + V."""
    d = pos_ref.shape[1]

    # BERT embedding LayerNorm (eps = 1e-12) over the hidden dim.
    bh = bert_h_ref[0]                                        # [L, Hb]
    mu = jnp.mean(bh, axis=-1, keepdims=True)
    xc = bh - mu
    var = jnp.mean(xc * xc, axis=-1, keepdims=True)
    bhn = xc * jax.lax.rsqrt(var + 1e-12) * bln_g_ref[...] + bln_b_ref[...]

    # at_emb_layer: Linear(768 -> d)
    A = jnp.dot(bhn, at_w_ref[...], preferred_element_type=jnp.float32) + at_b_ref[...]   # [L, d]

    # at2_emb_layer applied over the L axis (Linear(L -> n) on A.permute(0,2,1)),
    # contracted directly from the [L, d] layout (weight passed pre-transposed
    # [n, L]); this removes the two wrapper-side transposes of the original.
    A2t = jnp.dot(at2_wt_ref[...], A, preferred_element_type=jnp.float32) + at2_b_ref[...]  # [n, d]

    # v_emb_layer on concat([E, A2t], -1), fused as two matmuls + relu.
    E_b = e_ref[0]                                            # [n, d]
    v_w = v_w_ref[...]                                        # [2d, d]
    V = (jnp.dot(E_b, v_w[:d], preferred_element_type=jnp.float32)
         + jnp.dot(A2t, v_w[d:], preferred_element_type=jnp.float32)
         + v_b_ref[...])
    V = jnp.maximum(V, 0.0)

    P = pos_ref[...]                                          # [n, d]
    src_ref[0] = E_b + P + V
    tgt_ref[0] = r_ref[0] + P + V


def fused_embed(bert_h, E_bnd, R_bnd, params):
    B, _, _ = bert_h.shape
    n, d = params["P"].shape
    args = [bert_h, params["bert_ln_g"], params["bert_ln_b"],
            params["at_emb_w"], params["at_emb_b"],
            params["at2_wt"], params["at2_b"],
            E_bnd, R_bnd, params["P"], params["v_w"], params["v_b"]]
    batched = [True, False, False, False, False, False, False,
               True, True, False, False, False]
    in_specs = [_batch_spec(a) if f else _full_spec(a) for a, f in zip(args, batched)]
    out_shape = (jax.ShapeDtypeStruct((B, n, d), jnp.float32),
                 jax.ShapeDtypeStruct((B, n, d), jnp.float32))
    out_specs = (pl.BlockSpec((1, n, d), lambda b: (b, 0, 0)),
                 pl.BlockSpec((1, n, d), lambda b: (b, 0, 0)))
    return pl.pallas_call(
        _embed_fuse_kernel,
        out_shape=out_shape,
        grid=(B,),
        in_specs=in_specs,
        out_specs=out_specs,
        compiler_params=pltpu.CompilerParams(dimension_semantics=("parallel",)),
    )(*args)


# ------------- Kernel 2: full transformer stack + prediction head -----------

_TR_WEIGHT_NAMES = (
    "e_q_w", "e_q_b", "e_k_w", "e_k_b", "e_v_w", "e_v_b", "e_o_w", "e_o_b",
    "e_ln1_g", "e_ln1_b", "e_l1_w", "e_l1_b", "e_l2_w", "e_l2_b", "e_ln2_g", "e_ln2_b",
    "d_sq_w", "d_sq_b", "d_sk_w", "d_sk_b", "d_sv_w", "d_sv_b", "d_so_w", "d_so_b",
    "d_ln1_g", "d_ln1_b",
    "d_cq_w", "d_cq_b", "d_ck_w", "d_ck_b", "d_cv_w", "d_cv_b", "d_co_w", "d_co_b",
    "d_ln2_g", "d_ln2_b", "d_l1_w", "d_l1_b", "d_l2_w", "d_l2_b", "d_ln3_g", "d_ln3_b",
    "enc_n_g", "enc_n_b", "dec_n_g", "dec_n_b", "pred_w", "pred_b",
)


def _transformer_kernel(
        src_ref, tgt_ref,
        e_q_w, e_q_b, e_k_w, e_k_b, e_v_w, e_v_b, e_o_w, e_o_b,
        e_ln1_g, e_ln1_b, e_l1_w, e_l1_b, e_l2_w, e_l2_b, e_ln2_g, e_ln2_b,
        d_sq_w, d_sq_b, d_sk_w, d_sk_b, d_sv_w, d_sv_b, d_so_w, d_so_b,
        d_ln1_g, d_ln1_b,
        d_cq_w, d_cq_b, d_ck_w, d_ck_b, d_cv_w, d_cv_b, d_co_w, d_co_b,
        d_ln2_g, d_ln2_b, d_l1_w, d_l1_b, d_l2_w, d_l2_b, d_ln3_g, d_ln3_b,
        enc_n_g, enc_n_b, dec_n_g, dec_n_b, pred_w, pred_b,
        out_ref, *, num_heads, num_layers):
    """One batch element per program: full encoder+decoder stack, post-norm,
    relu FFN, final enc/dec LayerNorms, pred head + sigmoid.
    `num_heads` / `num_layers` are static Python ints (kernel is unrolled)."""
    n, d = src_ref.shape[1], src_ref.shape[2]
    dh = d // num_heads
    scale = 1.0 / math.sqrt(dh)

    # generate_square_subsequent_mask built in-kernel (static), no HBM input.
    row = jax.lax.broadcasted_iota(jnp.int32, (n, n), 0)
    col = jax.lax.broadcasted_iota(jnp.int32, (n, n), 1)
    mask = jnp.where(row >= col, 0.0, -1e9).astype(jnp.float32)

    def layer_norm(x, g, b, eps=1e-5):
        mu = jnp.mean(x, axis=-1, keepdims=True)
        xc = x - mu
        var = jnp.mean(xc * xc, axis=-1, keepdims=True)
        return xc * jax.lax.rsqrt(var + eps) * g + b

    def mha(x_q, x_kv, q_w, q_b, k_w, k_b, v_w, v_b, o_w, o_b_row, layer):
        """Multi-head attention; output projection folded into the head loop:
        concat(heads) @ Wo == sum_h head_h @ Wo[h]."""
        out = None
        for h in range(num_heads):
            idx = layer * num_heads + h          # static
            qh = jnp.dot(x_q, q_w[idx], preferred_element_type=jnp.float32) + q_b[idx]
            kh = jnp.dot(x_kv, k_w[idx], preferred_element_type=jnp.float32) + k_b[idx]
            vh = jnp.dot(x_kv, v_w[idx], preferred_element_type=jnp.float32) + v_b[idx]
            s = jax.lax.dot_general(qh, kh, (((1,), (1,)), ((), ())),
                                    preferred_element_type=jnp.float32) * scale
            s = s + mask
            s = s - jnp.max(s, axis=-1, keepdims=True)
            p = jnp.exp(s)
            # softmax divide on the EUP slot
            p = p * pl.reciprocal(jnp.sum(p, axis=-1, keepdims=True), approx=True)
            head = jnp.dot(p, vh, preferred_element_type=jnp.float32)        # [Lq, dh]
            contrib = jnp.dot(head, o_w[idx], preferred_element_type=jnp.float32)  # [Lq, d]
            out = contrib if out is None else out + contrib
        return out + o_b_row

    def ffn(x, w1, b1, w2, b2):
        h1 = jnp.maximum(jnp.dot(x, w1, preferred_element_type=jnp.float32) + b1, 0.0)
        return jnp.dot(h1, w2, preferred_element_type=jnp.float32) + b2

    # --- encoder stack (post-norm, residual fused into LayerNorm) ---
    x = src_ref[0]                                            # [n, d]
    for layer in range(num_layers):
        sa = mha(x, x, e_q_w, e_q_b, e_k_w, e_k_b, e_v_w, e_v_b,
                 e_o_w, e_o_b[layer], layer)
        x = layer_norm(x + sa, e_ln1_g[layer], e_ln1_b[layer])
        ff = ffn(x, e_l1_w[layer], e_l1_b[layer], e_l2_w[layer], e_l2_b[layer])
        x = layer_norm(x + ff, e_ln2_g[layer], e_ln2_b[layer])
    mem = layer_norm(x, enc_n_g[...], enc_n_b[...])

    # --- decoder stack ---
    y = tgt_ref[0]
    for layer in range(num_layers):
        sa = mha(y, y, d_sq_w, d_sq_b, d_sk_w, d_sk_b, d_sv_w, d_sv_b,
                 d_so_w, d_so_b[layer], layer)
        y = layer_norm(y + sa, d_ln1_g[layer], d_ln1_b[layer])
        ca = mha(y, mem, d_cq_w, d_cq_b, d_ck_w, d_ck_b, d_cv_w, d_cv_b,
                 d_co_w, d_co_b[layer], layer)
        y = layer_norm(y + ca, d_ln2_g[layer], d_ln2_b[layer])
        ff = ffn(y, d_l1_w[layer], d_l1_b[layer], d_l2_w[layer], d_l2_b[layer])
        y = layer_norm(y + ff, d_ln3_g[layer], d_ln3_b[layer])
    y = layer_norm(y, dec_n_g[...], dec_n_b[...])

    # prediction head + sigmoid, fused into the same kernel.
    logits = jnp.dot(y, pred_w[...], preferred_element_type=jnp.float32) + pred_b[...]  # [n, 1]
    out_ref[0] = jax.nn.sigmoid(logits)


def fused_transformer(src, tgt, tp, *, num_heads, num_layers):
    B, n, _ = src.shape
    weights = [tp[k] for k in _TR_WEIGHT_NAMES]
    args = [src, tgt] + weights
    in_specs = ([_batch_spec(src), _batch_spec(tgt)]
                + [_full_spec(w) for w in weights])
    kern = functools.partial(_transformer_kernel, num_heads=num_heads,
                             num_layers=num_layers)
    return pl.pallas_call(
        kern,
        out_shape=jax.ShapeDtypeStruct((B, n, 1), jnp.float32),
        grid=(B,),
        in_specs=in_specs,
        out_specs=pl.BlockSpec((1, n, 1), lambda b: (b, 0, 0)),
        compiler_params=pltpu.CompilerParams(dimension_semantics=("parallel",)),
    )(*args)


# --------------------------------- SAINT ------------------------------------

def init_params(key, *, num_q, n, d, num_heads, num_tr_layers, bert_vocab,
                bert_hidden, bert_type_vocab, bert_max_pos, at_seq_len,
                dim_feedforward):
    keys = iter(jax.random.split(key, 256))
    nxt = lambda: next(keys)

    def nrm(shape, scale=0.02):
        return scale * jax.random.normal(nxt(), shape, dtype=jnp.float32)

    NL, H, ff = num_tr_layers, num_heads, dim_feedforward
    dh = d // H

    def attn_set(prefix):
        return {
            prefix + "q_w": nrm((NL * H, d, dh)), prefix + "q_b": nrm((NL * H, 1, dh)),
            prefix + "k_w": nrm((NL * H, d, dh)), prefix + "k_b": nrm((NL * H, 1, dh)),
            prefix + "v_w": nrm((NL * H, d, dh)), prefix + "v_b": nrm((NL * H, 1, dh)),
            prefix + "o_w": nrm((NL * H, dh, d)), prefix + "o_b": nrm((NL, 1, d)),
        }

    transformer = {}
    # encoder
    transformer.update(attn_set("e_"))
    transformer.update(
        e_ln1_g=jnp.ones((NL, 1, d)), e_ln1_b=jnp.zeros((NL, 1, d)),
        e_l1_w=nrm((NL, d, ff)), e_l1_b=nrm((NL, 1, ff)),
        e_l2_w=nrm((NL, ff, d)), e_l2_b=nrm((NL, 1, d)),
        e_ln2_g=jnp.ones((NL, 1, d)), e_ln2_b=jnp.zeros((NL, 1, d)),
    )
    # decoder (self- and cross-attention)
    transformer.update(attn_set("d_s"))
    transformer.update(attn_set("d_c"))
    transformer.update(
        d_ln1_g=jnp.ones((NL, 1, d)), d_ln1_b=jnp.zeros((NL, 1, d)),
        d_ln2_g=jnp.ones((NL, 1, d)), d_ln2_b=jnp.zeros((NL, 1, d)),
        d_l1_w=nrm((NL, d, ff)), d_l1_b=nrm((NL, 1, ff)),
        d_l2_w=nrm((NL, ff, d)), d_l2_b=nrm((NL, 1, d)),
        d_ln3_g=jnp.ones((NL, 1, d)), d_ln3_b=jnp.zeros((NL, 1, d)),
        enc_n_g=jnp.ones((1, d)), enc_n_b=jnp.zeros((1, d)),
        dec_n_g=jnp.ones((1, d)), dec_n_b=jnp.zeros((1, d)),
        pred_w=nrm((d, 1)), pred_b=nrm((1, 1)),
    )

    # NOTE: no Python ints in this dict — layer / head counts stay static and
    # are passed via functools.partial so jit never turns them into tracers.
    return dict(
        E=nrm((num_q, d), 1.0),
        R_emb=nrm((2, d), 1.0),
        P=nrm((n, d), 1.0),                 # normal_ init in the module
        S=nrm((1, d), 1.0),
        bert_word_emb=nrm((bert_vocab, bert_hidden)),
        bert_pos_emb=nrm((bert_max_pos, bert_hidden)),
        bert_type_emb=nrm((bert_type_vocab, bert_hidden)),
        bert_ln_g=jnp.ones((1, bert_hidden)), bert_ln_b=jnp.zeros((1, bert_hidden)),
        at_emb_w=nrm((bert_hidden, d)), at_emb_b=nrm((1, d)),
        at2_wt=nrm((n, at_seq_len)),        # Linear(at_seq_len, n) weight, pre-transposed
        at2_b=nrm((n, 1)),
        v_w=nrm((2 * d, d)), v_b=nrm((1, d)),
        e_w=nrm((d, d)), e_b=nrm((1, d)),   # defined in the module, unused in forward
        a_w=nrm((d, d)), a_b=nrm((1, d)),   # defined in the module, unused in forward
        transformer=transformer,
    )


def saint_forward(params, q, r, at_s, at_t, at_m, *, num_heads, num_tr_layers):
    B, n = q.shape
    d = params["P"].shape[1]

    # embedding-table gathers stay in XLA (data-dependent; tiny)
    E_bnd = params["E"][q]                                    # [B, n, d]
    R_prev = params["R_emb"][r[:, :-1]]                       # [B, n-1, d]
    S_b = jnp.broadcast_to(params["S"][None, :, :], (B, 1, d))
    R_bnd = jnp.concatenate([S_b, R_prev], axis=1)            # [B, n, d]

    # TODO(synk): the pretrained 12-layer bert-base-uncased encoder (which would
    # consume the attention mask at_t) is not reproduced; BERT embedding stage
    # (word + position + token-type) + LayerNorm only.
    L = at_s.shape[1]
    bert_h = (params["bert_word_emb"][at_s]
              + params["bert_pos_emb"][jnp.arange(L)][None, :, :]
              + params["bert_type_emb"][at_m])                # [B, L, Hb]

    src, tgt = fused_embed(bert_h, E_bnd, R_bnd, params)      # [B, n, d] each
    out = fused_transformer(src, tgt, params["transformer"],
                            num_heads=num_heads,
                            num_layers=num_tr_layers)         # [B, n, 1]
    return out.reshape(B, n)


if __name__ == "__main__":
    # Small shapes consistent with the module's forward:
    #   B=2, n=8 (sequence length / P rows), d=32, heads=4,
    #   BERT seq L=16 (orig 512), BERT hidden 768 (as in at_emb_layer),
    #   dim_feedforward=64 (nn.Transformer default 2048, scaled down).
    B, n, d, H = 2, 8, 32, 4
    NUM_TR_LAYERS = 1
    num_q = 10
    L_bert, H_bert = 16, 768
    bert_vocab, bert_type_vocab, bert_max_pos = 30, 2, 64
    dim_ff = 64

    key = jax.random.PRNGKey(0)
    pkey, dkey = jax.random.split(key)
    params = init_params(pkey, num_q=num_q, n=n, d=d, num_heads=H,
                         num_tr_layers=NUM_TR_LAYERS,
                         bert_vocab=bert_vocab, bert_hidden=H_bert,
                         bert_type_vocab=bert_type_vocab, bert_max_pos=bert_max_pos,
                         at_seq_len=L_bert, dim_feedforward=dim_ff)

    k1, k2, k3 = jax.random.split(dkey, 3)
    q = jax.random.randint(k1, (B, n), 0, num_q)
    r = jax.random.randint(k2, (B, n), 0, 2)
    at_s = jax.random.randint(k3, (B, L_bert), 0, bert_vocab)
    at_t = jnp.ones((B, L_bert), dtype=jnp.int32)
    at_m = jnp.zeros((B, L_bert), dtype=jnp.int32)

    fwd = jax.jit(functools.partial(saint_forward, num_heads=H,
                                    num_tr_layers=NUM_TR_LAYERS))
    out = fwd(params, q, r, at_s, at_t, at_m)
    out = jax.block_until_ready(out)
    assert out.shape == (B, n)
    assert bool(jnp.all(jnp.isfinite(out)))
    assert bool(jnp.all((out >= 0.0) & (out <= 1.0)))
    print("KERNEL_OK")
</pallas_src>

<mosaic_0001>
module attributes {stable_mosaic.version = 11 : i64} {
  func.func @_embed_fuse_kernel(%arg0: i32, %arg1: memref<1x16x768xf32, #tpu.memory_space<vmem>>, %arg2: memref<1x768xf32, #tpu.memory_space<vmem>>, %arg3: memref<1x768xf32, #tpu.memory_space<vmem>>, %arg4: memref<768x32xf32, #tpu.memory_space<vmem>>, %arg5: memref<1x32xf32, #tpu.memory_space<vmem>>, %arg6: memref<8x16xf32, #tpu.memory_space<vmem>>, %arg7: memref<8x1xf32, #tpu.memory_space<vmem>>, %arg8: memref<1x8x32xf32, #tpu.memory_space<vmem>>, %arg9: memref<1x8x32xf32, #tpu.memory_space<vmem>>, %arg10: memref<8x32xf32, #tpu.memory_space<vmem>>, %arg11: memref<64x32xf32, #tpu.memory_space<vmem>>, %arg12: memref<1x32xf32, #tpu.memory_space<vmem>>, %arg13: memref<1x8x32xf32, #tpu.memory_space<vmem>>, %arg14: memref<1x8x32xf32, #tpu.memory_space<vmem>>) attributes {dimension_semantics = [#tpu.dimension_semantics<parallel>], iteration_bounds = array<i64: 2>, scalar_prefetch = 0 : i64, scratch_operands = 0 : i64, tpu.core_type = #tpu.core_type<tc>, window_params = [{transform_indices = @transform_0, window_bounds = array<i64: 1, 16, 768>}, {pipeline_mode = #tpu.pipeline_mode<synchronous>, transform_indices = @transform_1, window_bounds = array<i64: 1, 768>}, {pipeline_mode = #tpu.pipeline_mode<synchronous>, transform_indices = @transform_2, window_bounds = array<i64: 1, 768>}, {pipeline_mode = #tpu.pipeline_mode<synchronous>, transform_indices = @transform_3, window_bounds = array<i64: 768, 32>}, {pipeline_mode = #tpu.pipeline_mode<synchronous>, transform_indices = @transform_4, window_bounds = array<i64: 1, 32>}, {pipeline_mode = #tpu.pipeline_mode<synchronous>, transform_indices = @transform_5, window_bounds = array<i64: 8, 16>}, {pipeline_mode = #tpu.pipeline_mode<synchronous>, transform_indices = @transform_6, window_bounds = array<i64: 8, 1>}, {transform_indices = @transform_7, window_bounds = array<i64: 1, 8, 32>}, {transform_indices = @transform_8, window_bounds = array<i64: 1, 8, 32>}, {pipeline_mode = #tpu.pipeline_mode<synchronous>, transform_indices = @transform_9, window_bounds = array<i64: 8, 32>}, {pipeline_mode = #tpu.pipeline_mode<synchronous>, transform_indices = @transform_10, window_bounds = array<i64: 64, 32>}, {pipeline_mode = #tpu.pipeline_mode<synchronous>, transform_indices = @transform_11, window_bounds = array<i64: 1, 32>}, {transform_indices = @transform_12, window_bounds = array<i64: 1, 8, 32>}, {transform_indices = @transform_13, window_bounds = array<i64: 1, 8, 32>}]} {
    %c0 = arith.constant 0 : index
    %c0_0 = arith.constant 0 : index
    %c0_1 = arith.constant 0 : index
    %0 = vector.load %arg1[%c0, %c0_0, %c0_1] : memref<1x16x768xf32, #tpu.memory_space<vmem>>, vector<1x16x768xf32>
    %1 = vector.shape_cast %0 : vector<1x16x768xf32> to vector<16x768xf32>
    %cst = arith.constant dense<0.000000e+00> : vector<16xf32>
    %2 = vector.multi_reduction <add>, %1, %cst [1] : vector<16x768xf32> to vector<16xf32>
    %3 = vector.shape_cast %2 : vector<16xf32> to vector<16x1xf32>
    %cst_2 = arith.constant 7.680000e+02 : f32
    %4 = vector.broadcast %cst_2 : f32 to vector<16x1xf32>
    %5 = arith.divf %3, %4 : vector<16x1xf32>
    %6 = vector.broadcast %5 : vector<16x1xf32> to vector<16x768xf32>
    %7 = arith.subf %1, %6 : vector<16x768xf32>
    %8 = arith.mulf %7, %7 : vector<16x768xf32>
    %cst_3 = arith.constant dense<0.000000e+00> : vector<16xf32>
    %9 = vector.multi_reduction <add>, %8, %cst_3 [1] : vector<16x768xf32> to vector<16xf32>
    %10 = vector.shape_cast %9 : vector<16xf32> to vector<16x1xf32>
    %cst_4 = arith.constant 7.680000e+02 : f32
    %11 = vector.broadcast %cst_4 : f32 to vector<16x1xf32>
    %12 = arith.divf %10, %11 : vector<16x1xf32>
    %cst_5 = arith.constant 9.99999996E-13 : f32
    %13 = vector.broadcast %cst_5 : f32 to vector<16x1xf32>
    %14 = arith.addf %12, %13 : vector<16x1xf32>
    %15 = math.rsqrt %14 : vector<16x1xf32>
    %16 = vector.broadcast %15 : vector<16x1xf32> to vector<16x768xf32>
    %17 = arith.mulf %7, %16 : vector<16x768xf32>
    %c0_6 = arith.constant 0 : index
    %c0_7 = arith.constant 0 : index
    %18 = vector.load %arg2[%c0_6, %c0_7] : memref<1x768xf32, #tpu.memory_space<vmem>>, vector<1x768xf32>
    %19 = vector.broadcast %18 : vector<1x768xf32> to vector<16x768xf32>
    %20 = arith.mulf %17, %19 : vector<16x768xf32>
    %c0_8 = arith.constant 0 : index
    %c0_9 = arith.constant 0 : index
    %21 = vector.load %arg3[%c0_8, %c0_9] : memref<1x768xf32, #tpu.memory_space<vmem>>, vector<1x768xf32>
    %22 = vector.broadcast %21 : vector<1x768xf32> to vector<16x768xf32>
    %23 = arith.addf %20, %22 : vector<16x768xf32>
    %c0_10 = arith.constant 0 : index
    %c0_11 = arith.constant 0 : index
    %24 = vector.load %arg4[%c0_10, %c0_11] : memref<768x32xf32, #tpu.memory_space<vmem>>, vector<768x32xf32>
    %cst_12 = arith.constant dense<0.000000e+00> : vector<16x32xf32>
    %25 = tpu.matmul %23, %24, %cst_12 {dimension_numbers = #tpu.dot_dimension_numbers<[1], [0], [0], [1], [0, 0, 1, 1], [], []>} : vector<16x768xf32>, vector<768x32xf32>, vector<16x32xf32> -> vector<16x32xf32>
    %c0_13 = arith.constant 0 : index
    %c0_14 = arith.constant 0 : index
    %26 = vector.load %arg5[%c0_13, %c0_14] : memref<1x32xf32, #tpu.memory_space<vmem>>, vector<1x32xf32>
    %27 = vector.broadcast %26 : vector<1x32xf32> to vector<16x32xf32>
    %28 = arith.addf %25, %27 : vector<16x32xf32>
    %c0_15 = arith.constant 0 : index
    %c0_16 = arith.constant 0 : index
    %29 = vector.load %arg6[%c0_15, %c0_16] : memref<8x16xf32, #tpu.memory_space<vmem>>, vector<8x16xf32>
    %cst_17 = arith.constant dense<0.000000e+00> : vector<8x32xf32>
    %30 = tpu.matmul %29, %28, %cst_17 {dimension_numbers = #tpu.dot_dimension_numbers<[1], [0], [0], [1], [0, 0, 1, 1], [], []>} : vector<8x16xf32>, vector<16x32xf32>, vector<8x32xf32> -> vector<8x32xf32>
    %c0_18 = arith.constant 0 : index
    %c0_19 = arith.constant 0 : index
    %31 = vector.load %arg7[%c0_18, %c0_19] : memref<8x1xf32, #tpu.memory_space<vmem>>, vector<8x1xf32>
    %32 = vector.broadcast %31 : vector<8x1xf32> to vector<8x32xf32>
    %33 = arith.addf %30, %32 : vector<8x32xf32>
    %c0_20 = arith.constant 0 : index
    %c0_21 = arith.constant 0 : index
    %c0_22 = arith.constant 0 : index
    %34 = vector.load %arg8[%c0_20, %c0_21, %c0_22] : memref<1x8x32xf32, #tpu.memory_space<vmem>>, vector<1x8x32xf32>
    %35 = vector.shape_cast %34 : vector<1x8x32xf32> to vector<8x32xf32>
    %c0_23 = arith.constant 0 : index
    %c0_24 = arith.constant 0 : index
    %36 = vector.load %arg11[%c0_23, %c0_24] : memref<64x32xf32, #tpu.memory_space<vmem>>, vector<64x32xf32>
    %37 = vector.extract_strided_slice %36 {offsets = [0, 0], sizes = [32, 32], strides = [1, 1]} : vector<64x32xf32> to vector<32x32xf32>
    %cst_25 = arith.constant dense<0.000000e+00> : vector<8x32xf32>
    %38 = tpu.matmul %35, %37, %cst_25 {dimension_numbers = #tpu.dot_dimension_numbers<[1], [0], [0], [1], [0, 0, 1, 1], [], []>} : vector<8x32xf32>, vector<32x32xf32>, vector<8x32xf32> -> vector<8x32xf32>
    %39 = vector.extract_strided_slice %36 {offsets = [32, 0], sizes = [32, 32], strides = [1, 1]} : vector<64x32xf32> to vector<32x32xf32>
    %cst_26 = arith.constant dense<0.000000e+00> : vector<8x32xf32>
    %40 = tpu.matmul %33, %39, %cst_26 {dimension_numbers = #tpu.dot_dimension_numbers<[1], [0], [0], [1], [0, 0, 1, 1], [], []>} : vector<8x32xf32>, vector<32x32xf32>, vector<8x32xf32> -> vector<8x32xf32>
    %41 = arith.addf %38, %40 : vector<8x32xf32>
    %c0_27 = arith.constant 0 : index
    %c0_28 = arith.constant 0 : index
    %42 = vector.load %arg12[%c0_27, %c0_28] : memref<1x32xf32, #tpu.memory_space<vmem>>, vector<1x32xf32>
    %43 = vector.broadcast %42 : vector<1x32xf32> to vector<8x32xf32>
    %44 = arith.addf %41, %43 : vector<8x32xf32>
    %cst_29 = arith.constant 0.000000e+00 : f32
    %45 = vector.broadcast %cst_29 : f32 to vector<8x32xf32>
    %46 = arith.maximumf %44, %45 : vector<8x32xf32>
    %c0_30 = arith.constant 0 : index
    %c0_31 = arith.constant 0 : index
    %47 = vector.load %arg10[%c0_30, %c0_31] : memref<8x32xf32, #tpu.memory_space<vmem>>, vector<8x32xf32>
    %48 = arith.addf %35, %47 : vector<8x32xf32>
    %49 = arith.addf %48, %46 : vector<8x32xf32>
    %c0_32 = arith.constant 0 : index
    %c0_33 = arith.constant 0 : index
    %c0_34 = arith.constant 0 : index
    %50 = vector.load %arg13[%c0_32, %c0_33, %c0_34] : memref<1x8x32xf32, #tpu.memory_space<vmem>>, vector<1x8x32xf32>
    %51 = vector.shape_cast %50 : vector<1x8x32xf32> to vector<8x32xf32>
    %52 = vector.shape_cast %49 : vector<8x32xf32> to vector<1x8x32xf32>
    tpu.vector_store %arg13[%c0_32, %c0_33, %c0_34], %52 {strides = array<i32>} : memref<1x8x32xf32, #tpu.memory_space<vmem>>, vector<1x8x32xf32>,
    %c0_35 = arith.constant 0 : index
    %c0_36 = arith.constant 0 : index
    %c0_37 = arith.constant 0 : index
    %53 = vector.load %arg9[%c0_35, %c0_36, %c0_37] : memref<1x8x32xf32, #tpu.memory_space<vmem>>, vector<1x8x32xf32>
    %54 = vector.shape_cast %53 : vector<1x8x32xf32> to vector<8x32xf32>
    %55 = arith.addf %54, %47 : vector<8x32xf32>
    %56 = arith.addf %55, %46 : vector<8x32xf32>
    %c0_38 = arith.constant 0 : index
    %c0_39 = arith.constant 0 : index
    %c0_40 = arith.constant 0 : index
    %57 = vector.load %arg14[%c0_38, %c0_39, %c0_40] : memref<1x8x32xf32, #tpu.memory_space<vmem>>, vector<1x8x32xf32>
    %58 = vector.shape_cast %57 : vector<1x8x32xf32> to vector<8x32xf32>
    %59 = vector.shape_cast %56 : vector<8x32xf32> to vector<1x8x32xf32>
    tpu.vector_store %arg14[%c0_38, %c0_39, %c0_40], %59 {strides = array<i32>} : memref<1x8x32xf32, #tpu.memory_space<vmem>>, vector<1x8x32xf32>,
    return
  }
  func.func @transform_0(%arg0: i32) -> (i32, i32, i32) {
    %c0_i32 = arith.constant 0 : i32
    %c0_i32_0 = arith.constant 0 : i32
    %c0_i32_1 = arith.constant 0 : i32
    return %arg0, %c0_i32, %c0_i32_0 : i32, i32, i32
  }
  func.func @transform_1(%arg0: i32) -> (i32, i32) {
    %c0_i32 = arith.constant 0 : i32
    %c0_i32_0 = arith.constant 0 : i32
    %c0_i32_1 = arith.constant 0 : i32
    return %c0_i32, %c0_i32_0 : i32, i32
  }
  func.func @transform_2(%arg0: i32) -> (i32, i32) {
    %c0_i32 = arith.constant 0 : i32
    %c0_i32_0 = arith.constant 0 : i32
    %c0_i32_1 = arith.constant 0 : i32
    return %c0_i32, %c0_i32_0 : i32, i32
  }
  func.func @transform_3(%arg0: i32) -> (i32, i32) {
    %c0_i32 = arith.constant 0 : i32
    %c0_i32_0 = arith.constant 0 : i32
    %c0_i32_1 = arith.constant 0 : i32
    return %c0_i32, %c0_i32_0 : i32, i32
  }
  func.func @transform_4(%arg0: i32) -> (i32, i32) {
    %c0_i32 = arith.constant 0 : i32
    %c0_i32_0 = arith.constant 0 : i32
    %c0_i32_1 = arith.constant 0 : i32
    return %c0_i32, %c0_i32_0 : i32, i32
  }
  func.func @transform_5(%arg0: i32) -> (i32, i32) {
    %c0_i32 = arith.constant 0 : i32
    %c0_i32_0 = arith.constant 0 : i32
    %c0_i32_1 = arith.constant 0 : i32
    return %c0_i32, %c0_i32_0 : i32, i32
  }
  func.func @transform_6(%arg0: i32) -> (i32, i32) {
    %c0_i32 = arith.constant 0 : i32
    %c0_i32_0 = arith.constant 0 : i32
    %c0_i32_1 = arith.constant 0 : i32
    return %c0_i32, %c0_i32_0 : i32, i32
  }
  func.func @transform_7(%arg0: i32) -> (i32, i32, i32) {
    %c0_i32 = arith.constant 0 : i32
    %c0_i32_0 = arith.constant 0 : i32
    %c0_i32_1 = arith.constant 0 : i32
    return %arg0, %c0_i32, %c0_i32_0 : i32, i32, i32
  }
  func.func @transform_8(%arg0: i32) -> (i32, i32, i32) {
    %c0_i32 = arith.constant 0 : i32
    %c0_i32_0 = arith.constant 0 : i32
    %c0_i32_1 = arith.constant 0 : i32
    return %arg0, %c0_i32, %c0_i32_0 : i32, i32, i32
  }
  func.func @transform_9(%arg0: i32) -> (i32, i32) {
    %c0_i32 = arith.constant 0 : i32
    %c0_i32_0 = arith.constant 0 : i32
    %c0_i32_1 = arith.constant 0 : i32
    return %c0_i32, %c0_i32_0 : i32, i32
  }
  func.func @transform_10(%arg0: i32) -> (i32, i32) {
    %c0_i32 = arith.constant 0 : i32
    %c0_i32_0 = arith.constant 0 : i32
    %c0_i32_1 = arith.constant 0 : i32
    return %c0_i32, %c0_i32_0 : i32, i32
  }
  func.func @transform_11(%arg0: i32) -> (i32, i32) {
    %c0_i32 = arith.constant 0 : i32
    %c0_i32_0 = arith.constant 0 : i32
    %c0_i32_1 = arith.constant 0 : i32
    return %c0_i32, %c0_i32_0 : i32, i32
  }
  func.func @transform_12(%arg0: i32) -> (i32, i32, i32) {
    %c0_i32 = arith.constant 0 : i32
    %c0_i32_0 = arith.constant 0 : i32
    %c0_i32_1 = arith.constant 0 : i32
    return %arg0, %c0_i32, %c0_i32_0 : i32, i32, i32
  }
  func.func @transform_13(%arg0: i32) -> (i32, i32, i32) {
    %c0_i32 = arith.constant 0 : i32
    %c0_i32_0 = arith.constant 0 : i32
    %c0_i32_1 = arith.constant 0 : i32
    return %arg0, %c0_i32, %c0_i32_0 : i32, i32, i32
  }
}

module attributes {stable_mosaic.version = 11 : i64} {
  func.func @_transformer_kernel(%arg0: i32, %arg1: memref<1x8x32xf32, #tpu.memory_space<vmem>>, %arg2: memref<1x8x32xf32, #tpu.memory_space<vmem>>, %arg3: memref<4x32x8xf32, #tpu.memory_space<vmem>>, %arg4: memref<4x1x8xf32, #tpu.memory_space<vmem>>, %arg5: memref<4x32x8xf32, #tpu.memory_space<vmem>>, %arg6: memref<4x1x8xf32, #tpu.memory_space<vmem>>, %arg7: memref<4x32x8xf32, #tpu.memory_space<vmem>>, %arg8: memref<4x1x8xf32, #tpu.memory_space<vmem>>, %arg9: memref<4x8x32xf32, #tpu.memory_space<vmem>>, %arg10: memref<1x1x32xf32, #tpu.memory_space<vmem>>, %arg11: memref<1x1x32xf32, #tpu.memory_space<vmem>>, %arg12: memref<1x1x32xf32, #tpu.memory_space<vmem>>, %arg13: memref<1x32x64xf32, #tpu.memory_space<vmem>>, %arg14: memref<1x1x64xf32, #tpu.memory_space<vmem>>, %arg15: memref<1x64x32xf32, #tpu.memory_space<vmem>>, %arg16: memref<1x1x32xf32, #tpu.memory_space<vmem>>, %arg17: memref<1x1x32xf32, #tpu.memory_space<vmem>>, %arg18: memref<1x1x32xf32, #tpu.memory_space<vmem>>, %arg19: memref<4x32x8xf32, #tpu.memory_space<vmem>>, %arg20: memref<4x1x8xf32, #tpu.memory_space<vmem>>, %arg21: memref<4x32x8xf32, #tpu.memory_space<vmem>>, %arg22: memref<4x1x8xf32, #tpu.memory_space<vmem>>, %arg23: memref<4x32x8xf32, #tpu.memory_space<vmem>>, %arg24: memref<4x1x8xf32, #tpu.memory_space<vmem>>, %arg25: memref<4x8x32xf32, #tpu.memory_space<vmem>>, %arg26: memref<1x1x32xf32, #tpu.memory_space<vmem>>, %arg27: memref<1x1x32xf32, #tpu.memory_space<vmem>>, %arg28: memref<1x1x32xf32, #tpu.memory_space<vmem>>, %arg29: memref<4x32x8xf32, #tpu.memory_space<vmem>>, %arg30: memref<4x1x8xf32, #tpu.memory_space<vmem>>, %arg31: memref<4x32x8xf32, #tpu.memory_space<vmem>>, %arg32: memref<4x1x8xf32, #tpu.memory_space<vmem>>, %arg33: memref<4x32x8xf32, #tpu.memory_space<vmem>>, %arg34: memref<4x1x8xf32, #tpu.memory_space<vmem>>, %arg35: memref<4x8x32xf32, #tpu.memory_space<vmem>>, %arg36: memref<1x1x32xf32, #tpu.memory_space<vmem>>, %arg37: memref<1x1x32xf32, #tpu.memory_space<vmem>>, %arg38: memref<1x1x32xf32, #tpu.memory_space<vmem>>, %arg39: memref<1x32x64xf32, #tpu.memory_space<vmem>>, %arg40: memref<1x1x64xf32, #tpu.memory_space<vmem>>, %arg41: memref<1x64x32xf32, #tpu.memory_space<vmem>>, %arg42: memref<1x1x32xf32, #tpu.memory_space<vmem>>, %arg43: memref<1x1x32xf32, #tpu.memory_space<vmem>>, %arg44: memref<1x1x32xf32, #tpu.memory_space<vmem>>, %arg45: memref<1x32xf32, #tpu.memory_space<vmem>>, %arg46: memref<1x32xf32, #tpu.memory_space<vmem>>, %arg47: memref<1x32xf32, #tpu.memory_space<vmem>>, %arg48: memref<1x32xf32, #tpu.memory_space<vmem>>, %arg49: memref<32x1xf32, #tpu.memory_space<vmem>>, %arg50: memref<1x1xf32, #tpu.memory_space<vmem>>, %arg51: memref<1x8x1xf32, #tpu.memory_space<vmem>>) attributes {dimension_semantics = [#tpu.dimension_semantics<parallel>], iteration_bounds = array<i64: 2>, scalar_prefetch = 0 : i64, scratch_operands = 0 : i64, tpu.core_type = #tpu.core_type<tc>, window_params = [{transform_indices = @transform_0, window_bounds = array<i64: 1, 8, 32>}, {transform_indices = @transform_1, window_bounds = array<i64: 1, 8, 32>}, {pipeline_mode = #tpu.pipeline_mode<synchronous>, transform_indices = @transform_2, window_bounds = array<i64: 4, 32, 8>}, {pipeline_mode = #tpu.pipeline_mode<synchronous>, transform_indices = @transform_3, window_bounds = array<i64: 4, 1, 8>}, {pipeline_mode = #tpu.pipeline_mode<synchronous>, transform_indices = @transform_4, window_bounds = array<i64: 4, 32, 8>}, {pipeline_mode = #tpu.pipeline_mode<synchronous>, transform_indices = @transform_5, window_bounds = array<i64: 4, 1, 8>}, {pipeline_mode = #tpu.pipeline_mode<synchronous>, transform_indices = @transform_6, window_bounds = array<i64: 4, 32, 8>}, {pipeline_mode = #tpu.pipeline_mode<synchronous>, transform_indices = @transform_7, window_bounds = array<i64: 4, 1, 8>}, {pipeline_mode = #tpu.pipeline_mode<synchronous>, transform_indices = @transform_8, window_bounds = array<i64: 4, 8, 32>}, {pipeline_mode = #tpu.pipeline_mode<synchronous>, transform_indices = @transform_9, window_bounds = array<i64: 1, 1, 32>}, {pipeline_mode = #tpu.pipeline_mode<synchronous>, transform_indices = @transform_10, window_bounds = array<i64: 1, 1, 32>}, {pipeline_mode = #tpu.pipeline_mode<synchronous>, transform_indices = @transform_11, window_bounds = array<i64: 1, 1, 32>}, {pipeline_mode = #tpu.pipeline_mode<synchronous>, transform_indices = @transform_12, window_bounds = array<i64: 1, 32, 64>}, {pipeline_mode = #tpu.pipeline_mode<synchronous>, transform_indices = @transform_13, window_bounds = array<i64: 1, 1, 64>}, {pipeline_mode = #tpu.pipeline_mode<synchronous>, transform_indices = @transform_14, window_bounds = array<i64: 1, 64, 32>}, {pipeline_mode = #tpu.pipeline_mode<synchronous>, transform_indices = @transform_15, window_bounds = array<i64: 1, 1, 32>}, {pipeline_mode = #tpu.pipeline_mode<synchronous>, transform_indices = @transform_16, window_bounds = array<i64: 1, 1, 32>}, {pipeline_mode = #tpu.pipeline_mode<synchronous>, transform_indices = @transform_17, window_bounds = array<i64: 1, 1, 32>}, {pipeline_mode = #tpu.pipeline_mode<synchronous>, transform_indices = @transform_18, window_bounds = array<i64: 4, 32, 8>}, {pipeline_mode = #tpu.pipeline_mode<synchronous>, transform_indices = @transform_19, window_bounds = array<i64: 4, 1, 8>}, {pipeline_mode = #tpu.pipeline_mode<synchronous>, transform_indices = @transform_20, window_bounds = array<i64: 4, 32, 8>}, {pipeline_mode = #tpu.pipeline_mode<synchronous>, transform_indices = @transform_21, window_bounds = array<i64: 4, 1, 8>}, {pipeline_mode = #tpu.pipeline_mode<synchronous>, transform_indices = @transform_22, window_bounds = array<i64: 4, 32, 8>}, {pipeline_mode = #tpu.pipeline_mode<synchronous>, transform_indices = @transform_23, window_bounds = array<i64: 4, 1, 8>}, {pipeline_mode = #tpu.pipeline_mode<synchronous>, transform_indices = @transform_24, window_bounds = array<i64: 4, 8, 32>}, {pipeline_mode = #tpu.pipeline_mode<synchronous>, transform_indices = @transform_25, window_bounds = array<i64: 1, 1, 32>}, {pipeline_mode = #tpu.pipeline_mode<synchronous>, transform_indices = @transform_26, window_bounds = array<i64: 1, 1, 32>}, {pipeline_mode = #tpu.pipeline_mode<synchronous>, transform_indices = @transform_27, window_bounds = array<i64: 1, 1, 32>}, {pipeline_mode = #tpu.pipeline_mode<synchronous>, transform_indices = @transform_28, window_bounds = array<i64: 4, 32, 8>}, {pipeline_mode = #tpu.pipeline_mode<synchronous>, transform_indices = @transform_29, window_bounds = array<i64: 4, 1, 8>}, {pipeline_mode = #tpu.pipeline_mode<synchronous>, transform_indices = @transform_30, window_bounds = array<i64: 4, 32, 8>}, {pipeline_mode = #tpu.pipeline_mode<synchronous>, transform_indices = @transform_31, window_bounds = array<i64: 4, 1, 8>}, {pipeline_mode = #tpu.pipeline_mode<synchronous>, transform_indices = @transform_32, window_bounds = array<i64: 4, 32, 8>}, {pipeline_mode = #tpu.pipeline_mode<synchronous>, transform_indices = @transform_33, window_bounds = array<i64: 4, 1, 8>}, {pipeline_mode = #tpu.pipeline_mode<synchronous>, transform_indices = @transform_34, window_bounds = array<i64: 4, 8, 32>}, {pipeline_mode = #tpu.pipeline_mode<synchronous>, transform_indices = @transform_35, window_bounds = array<i64: 1, 1, 32>}, {pipeline_mode = #tpu.pipeline_mode<synchronous>, transform_indices = @transform_36, window_bounds = array<i64: 1, 1, 32>}, {pipeline_mode = #tpu.pipeline_mode<synchronous>, transform_indices = @transform_37, window_bounds = array<i64: 1, 1, 32>}, {pipeline_mode = #tpu.pipeline_mode<synchronous>, transform_indices = @transform_38, window_bounds = array<i64: 1, 32, 64>}, {pipeline_mode = #tpu.pipeline_mode<synchronous>, transform_indices = @transform_39, window_bounds = array<i64: 1, 1, 64>}, {pipeline_mode = #tpu.pipeline_mode<synchronous>, transform_indices = @transform_40, window_bounds = array<i64: 1, 64, 32>}, {pipeline_mode = #tpu.pipeline_mode<synchronous>, transform_indices = @transform_41, window_bounds = array<i64: 1, 1, 32>}, {pipeline_mode = #tpu.pipeline_mode<synchronous>, transform_indices = @transform_42, window_bounds = array<i64: 1, 1, 32>}, {pipeline_mode = #tpu.pipeline_mode<synchronous>, transform_indices = @transform_43, window_bounds = array<i64: 1, 1, 32>}, {pipeline_mode = #tpu.pipeline_mode<synchronous>, transform_indices = @transform_44, window_bounds = array<i64: 1, 32>}, {pipeline_mode = #tpu.pipeline_mode<synchronous>, transform_indices = @transform_45, window_bounds = array<i64: 1, 32>}, {pipeline_mode = #tpu.pipeline_mode<synchronous>, transform_indices = @transform_46, window_bounds = array<i64: 1, 32>}, {pipeline_mode = #tpu.pipeline_mode<synchronous>, transform_indices = @transform_47, window_bounds = array<i64: 1, 32>}, {pipeline_mode = #tpu.pipeline_mode<synchronous>, transform_indices = @transform_48, window_bounds = array<i64: 32, 1>}, {pipeline_mode = #tpu.pipeline_mode<synchronous>, transform_indices = @transform_49, window_bounds = array<i64: 1, 1>}, {transform_indices = @transform_50, window_bounds = array<i64: 1, 8, 1>}]} {
    %0 = tpu.iota {dimensions = array<i32: 0>} : vector<8x8xi32>
    %1 = tpu.iota {dimensions = array<i32: 1>} : vector<8x8xi32>
    %2 = arith.cmpi sge, %0, %1 : vector<8x8xi32>
    %cst = arith.constant 0.000000e+00 : f32
    %cst_0 = arith.constant -1.000000e+09 : f32
    %3 = vector.broadcast %cst : f32 to vector<8x8xf32>
    %4 = vector.broadcast %cst_0 : f32 to vector<8x8xf32>
    %5 = arith.select %2, %3, %4 : vector<8x8xi1>, vector<8x8xf32>
    %c0 = arith.constant 0 : index
    %c0_1 = arith.constant 0 : index
    %c0_2 = arith.constant 0 : index
    %6 = vector.load %arg1[%c0, %c0_1, %c0_2] : memref<1x8x32xf32, #tpu.memory_space<vmem>>, vector<1x8x32xf32>
    %7 = vector.shape_cast %6 : vector<1x8x32xf32> to vector<8x32xf32>
    %c0_3 = arith.constant 0 : index
    %c0_4 = arith.constant 0 : index
    %c0_5 = arith.constant 0 : index
    %8 = vector.load %arg10[%c0_3, %c0_4, %c0_5] : memref<1x1x32xf32, #tpu.memory_space<vmem>>, vector<1x1x32xf32>
    %9 = vector.shape_cast %8 : vector<1x1x32xf32> to vector<1x32xf32>
    %c0_6 = arith.constant 0 : index
    %c0_7 = arith.constant 0 : index
    %c0_8 = arith.constant 0 : index
    %10 = vector.load %arg3[%c0_6, %c0_7, %c0_8] : memref<4x32x8xf32, #tpu.memory_space<vmem>>, vector<1x32x8xf32>
    %11 = vector.shape_cast %10 : vector<1x32x8xf32> to vector<32x8xf32>
    %cst_9 = arith.constant dense<0.000000e+00> : vector<8x8xf32>
    %12 = tpu.matmul %7, %11, %cst_9 {dimension_numbers = #tpu.dot_dimension_numbers<[1], [0], [0], [1], [0, 0, 1, 1], [], []>} : vector<8x32xf32>, vector<32x8xf32>, vector<8x8xf32> -> vector<8x8xf32>
    %c0_10 = arith.constant 0 : index
    %c0_11 = arith.constant 0 : index
    %c0_12 = arith.constant 0 : index
    %13 = vector.load %arg4[%c0_10, %c0_11, %c0_12] : memref<4x1x8xf32, #tpu.memory_space<vmem>>, vector<1x1x8xf32>
    %14 = vector.shape_cast %13 : vector<1x1x8xf32> to vector<1x8xf32>
    %15 = vector.broadcast %14 : vector<1x8xf32> to vector<8x8xf32>
    %16 = arith.addf %12, %15 : vector<8x8xf32>
    %c0_13 = arith.constant 0 : index
    %c0_14 = arith.constant 0 : index
    %c0_15 = arith.constant 0 : index
    %17 = vector.load %arg5[%c0_13, %c0_14, %c0_15] : memref<4x32x8xf32, #tpu.memory_space<vmem>>, vector<1x32x8xf32>
    %18 = vector.shape_cast %17 : vector<1x32x8xf32> to vector<32x8xf32>
    %cst_16 = arith.constant dense<0.000000e+00> : vector<8x8xf32>
    %19 = tpu.matmul %7, %18, %cst_16 {dimension_numbers = #tpu.dot_dimension_numbers<[1], [0], [0], [1], [0, 0, 1, 1], [], []>} : vector<8x32xf32>, vector<32x8xf32>, vector<8x8xf32> -> vector<8x8xf32>
    %c0_17 = arith.constant 0 : index
    %c0_18 = arith.constant 0 : index
    %c0_19 = arith.constant 0 : index
    %20 = vector.load %arg6[%c0_17, %c0_18, %c0_19] : memref<4x1x8xf32, #tpu.memory_space<vmem>>, vector<1x1x8xf32>
    %21 = vector.shape_cast %20 : vector<1x1x8xf32> to vector<1x8xf32>
    %22 = vector.broadcast %21 : vector<1x8xf32> to vector<8x8xf32>
    %23 = arith.addf %19, %22 : vector<8x8xf32>
    %c0_20 = arith.constant 0 : index
    %c0_21 = arith.constant 0 : index
    %c0_22 = arith.constant 0 : index
    %24 = vector.load %arg7[%c0_20, %c0_21, %c0_22] : memref<4x32x8xf32, #tpu.memory_space<vmem>>, vector<1x32x8xf32>
    %25 = vector.shape_cast %24 : vector<1x32x8xf32> to vector<32x8xf32>
    %cst_23 = arith.constant dense<0.000000e+00> : vector<8x8xf32>
    %26 = tpu.matmul %7, %25, %cst_23 {dimension_numbers = #tpu.dot_dimension_numbers<[1], [0], [0], [1], [0, 0, 1, 1], [], []>} : vector<8x32xf32>, vector<32x8xf32>, vector<8x8xf32> -> vector<8x8xf32>
    %c0_24 = arith.constant 0 : index
    %c0_25 = arith.constant 0 : index
    %c0_26 = arith.constant 0 : index
    %27 = vector.load %arg8[%c0_24, %c0_25, %c0_26] : memref<4x1x8xf32, #tpu.memory_space<vmem>>, vector<1x1x8xf32>
    %28 = vector.shape_cast %27 : vector<1x1x8xf32> to vector<1x8xf32>
    %29 = vector.broadcast %28 : vector<1x8xf32> to vector<8x8xf32>
    %30 = arith.addf %26, %29 : vector<8x8xf32>
    %cst_27 = arith.constant dense<0.000000e+00> : vector<8x8xf32>
    %31 = tpu.matmul %16, %23, %cst_27 {dimension_numbers = #tpu.dot_dimension_numbers<[1], [1], [0], [0], [0, 0, 1, 0], [], []>} : vector<8x8xf32>, vector<8x8xf32>, vector<8x8xf32> -> vector<8x8xf32>
    %cst_28 = arith.constant 0.353553385 : f32
    %32 = vector.broadcast %cst_28 : f32 to vector<8x8xf32>
    %33 = arith.mulf %31, %32 : vector<8x8xf32>
    %34 = arith.addf %33, %5 : vector<8x8xf32>
    %cst_29 = arith.constant dense<0xFF800000> : vector<8xf32>
    %35 = vector.multi_reduction <maximumf>, %34, %cst_29 [1] : vector<8x8xf32> to vector<8xf32>
    %36 = vector.shape_cast %35 : vector<8xf32> to vector<8x1xf32>
    %37 = vector.broadcast %36 : vector<8x1xf32> to vector<8x8xf32>
    %38 = arith.subf %34, %37 : vector<8x8xf32>
    %39 = math.exp %38 : vector<8x8xf32>
    %cst_30 = arith.constant dense<0.000000e+00> : vector<8xf32>
    %40 = vector.multi_reduction <add>, %39, %cst_30 [1] : vector<8x8xf32> to vector<8xf32>
    %41 = vector.shape_cast %40 : vector<8xf32> to vector<8x1xf32>
    %42 = tpu.reciprocal %41 {approx = true} : vector<8x1xf32> -> vector<8x1xf32>
    %43 = vector.broadcast %42 : vector<8x1xf32> to vector<8x8xf32>
    %44 = arith.mulf %39, %43 : vector<8x8xf32>
    %cst_31 = arith.constant dense<0.000000e+00> : vector<8x8xf32>
    %45 = tpu.matmul %44, %30, %cst_31 {dimension_numbers = #tpu.dot_dimension_numbers<[1], [0], [0], [1], [0, 0, 1, 1], [], []>} : vector<8x8xf32>, vector<8x8xf32>, vector<8x8xf32> -> vector<8x8xf32>
    %c0_32 = arith.constant 0 : index
    %c0_33 = arith.constant 0 : index
    %c0_34 = arith.constant 0 : index
    %46 = vector.load %arg9[%c0_32, %c0_33, %c0_34] : memref<4x8x32xf32, #tpu.memory_space<vmem>>, vector<1x8x32xf32>
    %47 = vector.shape_cast %46 : vector<1x8x32xf32> to vector<8x32xf32>
    %cst_35 = arith.constant dense<0.000000e+00> : vector<8x32xf32>
    %48 = tpu.matmul %45, %47, %cst_35 {dimension_numbers = #tpu.dot_dimension_numbers<[1], [0], [0], [1], [0, 0, 1, 1], [], []>} : vector<8x8xf32>, vector<8x32xf32>, vector<8x32xf32> -> vector<8x32xf32>
    %c1 = arith.constant 1 : index
    %c0_36 = arith.constant 0 : index
    %c0_37 = arith.constant 0 : index
    %49 = vector.load %arg3[%c1, %c0_36, %c0_37] : memref<4x32x8xf32, #tpu.memory_space<vmem>>, vector<1x32x8xf32>
    %50 = vector.shape_cast %49 : vector<1x32x8xf32> to vector<32x8xf32>
    %cst_38 = arith.constant dense<0.000000e+00> : vector<8x8xf32>
    %51 = tpu.matmul %7, %50, %cst_38 {dimension_numbers = #tpu.dot_dimension_numbers<[1], [0], [0], [1], [0, 0, 1, 1], [], []>} : vector<8x32xf32>, vector<32x8xf32>, vector<8x8xf32> -> vector<8x8xf32>
    %c1_39 = arith.constant 1 : index
    %c0_40 = arith.constant 0 : index
    %c0_41 = arith.constant 0 : index
    %52 = vector.load %arg4[%c1_39, %c0_40, %c0_41] : memref<4x1x8xf32, #tpu.memory_space<vmem>>, vector<1x1x8xf32>
    %53 = vector.shape_cast %52 : vector<1x1x8xf32> to vector<1x8xf32>
    %54 = vector.broadcast %53 : vector<1x8xf32> to vector<8x8xf32>
    %55 = arith.addf %51, %54 : vector<8x8xf32>
    %c1_42 = arith.constant 1 : index
    %c0_43 = arith.constant 0 : index
    %c0_44 = arith.constant 0 : index
    %56 = vector.load %arg5[%c1_42, %c0_43, %c0_44] : memref<4x32x8xf32, #tpu.memory_space<vmem>>, vector<1x32x8xf32>
    %57 = vector.shape_cast %56 : vector<1x32x8xf32> to vector<32x8xf32>
    %cst_45 = arith.constant dense<0.000000e+00> : vector<8x8xf32>
    %58 = tpu.matmul %7, %57, %cst_45 {dimension_numbers = #tpu.dot_dimension_numbers<[1], [0], [0], [1], [0, 0, 1, 1], [], []>} : vector<8x32xf32>, vector<32x8xf32>, vector<8x8xf32> -> vector<8x8xf32>
    %c1_46 = arith.constant 1 : index
    %c0_47 = arith.constant 0 : index
    %c0_48 = arith.constant 0 : index
    %59 = vector.load %arg6[%c1_46, %c0_47, %c0_48] : memref<4x1x8xf32, #tpu.memory_space<vmem>>, vector<1x1x8xf32>
    %60 = vector.shape_cast %59 : vector<1x1x8xf32> to vector<1x8xf32>
    %61 = vector.broadcast %60 : vector<1x8xf32> to vector<8x8xf32>
    %62 = arith.addf %58, %61 : vector<8x8xf32>
    %c1_49 = arith.constant 1 : index
    %c0_50 = arith.constant 0 : index
    %c0_51 = arith.constant 0 : index
    %63 = vector.load %arg7[%c1_49, %c0_50, %c0_51] : memref<4x32x8xf32, #tpu.memory_space<vmem>>, vector<1x32x8xf32>
    %64 = vector.shape_cast %63 : vector<1x32x8xf32> to vector<32x8xf32>
    %cst_52 = arith.constant dense<0.000000e+00> : vector<8x8xf32>
    %65 = tpu.matmul %7, %64, %cst_52 {dimension_numbers = #tpu.dot_dimension_numbers<[1], [0], [0], [1], [0, 0, 1, 1], [], []>} : vector<8x32xf32>, vector<32x8xf32>, vector<8x8xf32> -> vector<8x8xf32>
    %c1_53 = arith.constant 1 : index
    %c0_54 = arith.constant 0 : index
    %c0_55 = arith.constant 0 : index
    %66 = vector.load %arg8[%c1_53, %c0_54, %c0_55] : memref<4x1x8xf32, #tpu.memory_space<vmem>>, vector<1x1x8xf32>
    %67 = vector.shape_cast %66 : vector<1x1x8xf32> to vector<1x8xf32>
    %68 = vector.broadcast %67 : vector<1x8xf32> to vector<8x8xf32>
    %69 = arith.addf %65, %68 : vector<8x8xf32>
    %cst_56 = arith.constant dense<0.000000e+00> : vector<8x8xf32>
    %70 = tpu.matmul %55, %62, %cst_56 {dimension_numbers = #tpu.dot_dimension_numbers<[1], [1], [0], [0], [0, 0, 1, 0], [], []>} : vector<8x8xf32>, vector<8x8xf32>, vector<8x8xf32> -> vector<8x8xf32>
    %cst_57 = arith.constant 0.353553385 : f32
    %71 = vector.broadcast %cst_57 : f32 to vector<8x8xf32>
    %72 = arith.mulf %70, %71 : vector<8x8xf32>
    %73 = arith.addf %72, %5 : vector<8x8xf32>
    %cst_58 = arith.constant dense<0xFF800000> : vector<8xf32>
    %74 = vector.multi_reduction <maximumf>, %73, %cst_58 [1] : vector<8x8xf32> to vector<8xf32>
    %75 = vector.shape_cast %74 : vector<8xf32> to vector<8x1xf32>
    %76 = vector.broadcast %75 : vector<8x1xf32> to vector<8x8xf32>
    %77 = arith.subf %73, %76 : vector<8x8xf32>
    %78 = math.exp %77 : vector<8x8xf32>
    %cst_59 = arith.constant dense<0.000000e+00> : vector<8xf32>
    %79 = vector.multi_reduction <add>, %78, %cst_59 [1] : vector<8x8xf32> to vector<8xf32>
    %80 = vector.shape_cast %79 : vector<8xf32> to vector<8x1xf32>
    %81 = tpu.reciprocal %80 {approx = true} : vector<8x1xf32> -> vector<8x1xf32>
    %82 = vector.broadcast %81 : vector<8x1xf32> to vector<8x8xf32>
    %83 = arith.mulf %78, %82 : vector<8x8xf32>
    %cst_60 = arith.constant dense<0.000000e+00> : vector<8x8xf32>
    %84 = tpu.matmul %83, %69, %cst_60 {dimension_numbers = #tpu.dot_dimension_numbers<[1], [0], [0], [1], [0, 0, 1, 1], [], []>} : vector<8x8xf32>, vector<8x8xf32>, vector<8x8xf32> -> vector<8x8xf32>
    %c1_61 = arith.constant 1 : index
    %c0_62 = arith.constant 0 : index
    %c0_63 = arith.constant 0 : index
    %85 = vector.load %arg9[%c1_61, %c0_62, %c0_63] : memref<4x8x32xf32, #tpu.memory_space<vmem>>, vector<1x8x32xf32>
    %86 = vector.shape_cast %85 : vector<1x8x32xf32> to vector<8x32xf32>
    %cst_64 = arith.constant dense<0.000000e+00> : vector<8x32xf32>
    %87 = tpu.matmul %84, %86, %cst_64 {dimension_numbers = #tpu.dot_dimension_numbers<[1], [0], [0], [1], [0, 0, 1, 1], [], []>} : vector<8x8xf32>, vector<8x32xf32>, vector<8x32xf32> -> vector<8x32xf32>
    %88 = arith.addf %48, %87 : vector<8x32xf32>
    %c2 = arith.constant 2 : index
    %c0_65 = arith.constant 0 : index
    %c0_66 = arith.constant 0 : index
    %89 = vector.load %arg3[%c2, %c0_65, %c0_66] : memref<4x32x8xf32, #tpu.memory_space<vmem>>, vector<1x32x8xf32>
    %90 = vector.shape_cast %89 : vector<1x32x8xf32> to vector<32x8xf32>
    %cst_67 = arith.constant dense<0.000000e+00> : vector<8x8xf32>
    %91 = tpu.matmul %7, %90, %cst_67 {dimension_numbers = #tpu.dot_dimension_numbers<[1], [0], [0], [1], [0, 0, 1, 1], [], []>} : vector<8x32xf32>, vector<32x8xf32>, vector<8x8xf32> -> vector<8x8xf32>
    %c2_68 = arith.constant 2 : index
    %c0_69 = arith.constant 0 : index
    %c0_70 = arith.constant 0 : index
    %92 = vector.load %arg4[%c2_68, %c0_69, %c0_70] : memref<4x1x8xf32, #tpu.memory_space<vmem>>, vector<1x1x8xf32>
    %93 = vector.shape_cast %92 : vector<1x1x8xf32> to vector<1x8xf32>
    %94 = vector.broadcast %93 : vector<1x8xf32> to vector<8x8xf32>
    %95 = arith.addf %91, %94 : vector<8x8xf32>
    %c2_71 = arith.constant 2 : index
    %c0_72 = arith.constant 0 : index
    %c0_73 = arith.constant 0 : index
    %96 = vector.load %arg5[%c2_71, %c0_72, %c0_73] : memref<4x32x8xf32, #tpu.memory_space<vmem>>, vector<1x32x8xf32>
    %97 = vector.shape_cast %96 : vector<1x32x8xf32> to vector<32x8xf32>
    %cst_74 = arith.constant dense<0.000000e+00> : vector<8x8xf32>
    %98 = tpu.matmul %7, %97, %cst_74 {dimension_numbers = #tpu.dot_dimension_numbers<[1], [0], [0], [1], [0, 0, 1, 1], [], []>} : vector<8x32xf32>, vector<32x8xf32>, vector<8x8xf32> -> vector<8x8xf32>
    %c2_75 = arith.constant 2 : index
    %c0_76 = arith.constant 0 : index
    %c0_77 = arith.constant 0 : index
    %99 = vector.load %arg6[%c2_75, %c0_76, %c0_77] : memref<4x1x8xf32, #tpu.memory_space<vmem>>, vector<1x1x8xf32>
    %100 = vector.shape_cast %99 : vector<1x1x8xf32> to vector<1x8xf32>
    %101 = vector.broadcast %100 : vector<1x8xf32> to vector<8x8xf32>
    %102 = arith.addf %98, %101 : vector<8x8xf32>
    %c2_78 = arith.constant 2 : index
    %c0_79 = arith.constant 0 : index
    %c0_80 = arith.constant 0 : index
    %103 = vector.load %arg7[%c2_78, %c0_79, %c0_80] : memref<4x32x8xf32, #tpu.memory_space<vmem>>, vector<1x32x8xf32>
    %104 = vector.shape_cast %103 : vector<1x32x8xf32> to vector<32x8xf32>
    %cst_81 = arith.constant dense<0.000000e+00> : vector<8x8xf32>
    %105 = tpu.matmul %7, %104, %cst_81 {dimension_numbers = #tpu.dot_dimension_numbers<[1], [0], [0], [1], [0, 0, 1, 1], [], []>} : vector<8x32xf32>, vector<32x8xf32>, vector<8x8xf32> -> vector<8x8xf32>
    %c2_82 = arith.constant 2 : index
    %c0_83 = arith.constant 0 : index
    %c0_84 = arith.constant 0 : index
    %106 = vector.load %arg8[%c2_82, %c0_83, %c0_84] : memref<4x1x8xf32, #tpu.memory_space<vmem>>, vector<1x1x8xf32>
    %107 = vector.shape_cast %106 : vector<1x1x8xf32> to vector<1x8xf32>
    %108 = vector.broadcast %107 : vector<1x8xf32> to vector<8x8xf32>
    %109 = arith.addf %105, %108 : vector<8x8xf32>
    %cst_85 = arith.constant dense<0.000000e+00> : vector<8x8xf32>
    %110 = tpu.matmul %95, %102, %cst_85 {dimension_numbers = #tpu.dot_dimension_numbers<[1], [1], [0], [0], [0, 0, 1, 0], [], []>} : vector<8x8xf32>, vector<8x8xf32>, vector<8x8xf32> -> vector<8x8xf32>
    %cst_86 = arith.constant 0.353553385 : f32
    %111 = vector.broadcast %cst_86 : f32 to vector<8x8xf32>
    %112 = arith.mulf %110, %111 : vector<8x8xf32>
    %113 = arith.addf %112, %5 : vector<8x8xf32>
    %cst_87 = arith.constant dense<0xFF800000> : vector<8xf32>
    %114 = vector.multi_reduction <maximumf>, %113, %cst_87 [1] : vector<8x8xf32> to vector<8xf32>
    %115 = vector.shape_cast %114 : vector<8xf32> to vector<8x1xf32>
    %116 = vector.broadcast %115 : vector<8x1xf32> to vector<8x8xf32>
    %117 = arith.subf %113, %116 : vector<8x8xf32>
    %118 = math.exp %117 : vector<8x8xf32>
    %cst_88 = arith.constant dense<0.000000e+00> : vector<8xf32>
    %119 = vector.multi_reduction <add>, %118, %cst_88 [1] : vector<8x8xf32> to vector<8xf32>
    %120 = vector.shape_cast %119 : vector<8xf32> to vector<8x1xf32>
    %121 = tpu.reciprocal %120 {approx = true} : vector<8x1xf32> -> vector<8x1xf32>
    %122 = vector.broadcast %121 : vector<8x1xf32> to vector<8x8xf32>
    %123 = arith.mulf %118, %122 : vector<8x8xf32>
    %cst_89 = arith.constant dense<0.000000e+00> : vector<8x8xf32>
    %124 = tpu.matmul %123, %109, %cst_89 {dimension_numbers = #tpu.dot_dimension_numbers<[1], [0], [0], [1], [0, 0, 1, 1], [], []>} : vector<8x8xf32>, vector<8x8xf32>, vector<8x8xf32> -> vector<8x8xf32>
    %c2_90 = arith.constant 2 : index
    %c0_91 = arith.constant 0 : index
    %c0_92 = arith.constant 0 : index
    %125 = vector.load %arg9[%c2_90, %c0_91, %c0_92] : memref<4x8x32xf32, #tpu.memory_space<vmem>>, vector<1x8x32xf32>
    %126 = vector.shape_cast %125 : vector<1x8x32xf32> to vector<8x32xf32>
    %cst_93 = arith.constant dense<0.000000e+00> : vector<8x32xf32>
    %127 = tpu.matmul %124, %126, %cst_93 {dimension_numbers = #tpu.dot_dimension_numbers<[1], [0], [0], [1], [0, 0, 1, 1], [], []>} : vector<8x8xf32>, vector<8x32xf32>, vector<8x32xf32> -> vector<8x32xf32>
    %128 = arith.addf %88, %127 : vector<8x32xf32>
    %c3 = arith.constant 3 : index
    %c0_94 = arith.constant 0 : index
    %c0_95 = arith.constant 0 : index
    %129 = vector.load %arg3[%c3, %c0_94, %c0_95] : memref<4x32x8xf32, #tpu.memory_space<vmem>>, vector<1x32x8xf32>
    %130 = vector.shape_cast %129 : vector<1x32x8xf32> to vector<32x8xf32>
    %cst_96 = arith.constant dense<0.000000e+00> : vector<8x8xf32>
    %131 = tpu.matmul %7, %130, %cst_96 {dimension_numbers = #tpu.dot_dimension_numbers<[1], [0], [0], [1], [0, 0, 1, 1], [], []>} : vector<8x32xf32>, vector<32x8xf32>, vector<8x8xf32> -> vector<8x8xf32>
    %c3_97 = arith.constant 3 : index
    %c0_98 = arith.constant 0 : index
    %c0_99 = arith.constant 0 : index
    %132 = vector.load %arg4[%c3_97, %c0_98, %c0_99] : memref<4x1x8xf32, #tpu.memory_space<vmem>>, vector<1x1x8xf32>
    %133 = vector.shape_cast %132 : vector<1x1x8xf32> to vector<1x8xf32>
    %134 = vector.broadcast %133 : vector<1x8xf32> to vector<8x8xf32>
    %135 = arith.addf %131, %134 : vector<8x8xf32>
    %c3_100 = arith.constant 3 : index
    %c0_101 = arith.constant 0 : index
    %c0_102 = arith.constant 0 : index
    %136 = vector.load %arg5[%c3_100, %c0_101, %c0_102] : memref<4x32x8xf32, #tpu.memory_space<vmem>>, vector<1x32x8xf32>
    %137 = vector.shape_cast %136 : vector<1x32x8xf32> to vector<32x8xf32>
    %cst_103 = arith.constant dense<0.000000e+00> : vector<8x8xf32>
    %138 = tpu.matmul %7, %137, %cst_103 {dimension_numbers = #tpu.dot_dimension_numbers<[1], [0], [0], [1], [0, 0, 1, 1], [], []>} : vector<8x32xf32>, vector<32x8xf32>, vector<8x8xf32> -> vector<8x8xf32>
    %c3_104 = arith.constant 3 : index
    %c0_105 = arith.constant 0 : index
    %c0_106 = arith.constant 0 : index
    %139 = vector.load %arg6[%c3_104, %c0_105, %c0_106] : memref<4x1x8xf32, #tpu.memory_space<vmem>>, vector<1x1x8xf32>
    %140 = vector.shape_cast %139 : vector<1x1x8xf32> to vector<1x8xf32>
    %141 = vector.broadcast %140 : vector<1x8xf32> to vector<8x8xf32>
    %142 = arith.addf %138, %141 : vector<8x8xf32>
    %c3_107 = arith.constant 3 : index
    %c0_108 = arith.constant 0 : index
    %c0_109 = arith.constant 0 : index
    %143 = vector.load %arg7[%c3_107, %c0_108, %c0_109] : memref<4x32x8xf32, #tpu.memory_space<vmem>>, vector<1x32x8xf32>
    %144 = vector.shape_cast %143 : vector<1x32x8xf32> to vector<32x8xf32>
    %cst_110 = arith.constant dense<0.000000e+00> : vector<8x8xf32>
    %145 = tpu.matmul %7, %144, %cst_110 {dimension_numbers = #tpu.dot_dimension_numbers<[1], [0], [0], [1], [0, 0, 1, 1], [], []>} : vector<8x32xf32>, vector<32x8xf32>, vector<8x8xf32> -> vector<8x8xf32>
    %c3_111 = arith.constant 3 : index
    %c0_112 = arith.constant 0 : index
    %c0_113 = arith.constant 0 : index
    %146 = vector.load %arg8[%c3_111, %c0_112, %c0_113] : memref<4x1x8xf32, #tpu.memory_space<vmem>>, vector<1x1x8xf32>
    %147 = vector.shape_cast %146 : vector<1x1x8xf32> to vector<1x8xf32>
    %148 = vector.broadcast %147 : vector<1x8xf32> to vector<8x8xf32>
    %149 = arith.addf %145, %148 : vector<8x8xf32>
    %cst_114 = arith.constant dense<0.000000e+00> : vector<8x8xf32>
    %150 = tpu.matmul %135, %142, %cst_114 {dimension_numbers = #tpu.dot_dimension_numbers<[1], [1], [0], [0], [0, 0, 1, 0], [], []>} : vector<8x8xf32>, vector<8x8xf32>, vector<8x8xf32> -> vector<8x8xf32>
    %cst_115 = arith.constant 0.353553385 : f32
    %151 = vector.broadcast %cst_115 : f32 to vector<8x8xf32>
    %152 = arith.mulf %150, %151 : vector<8x8xf32>
    %153 = arith.addf %152, %5 : vector<8x8xf32>
    %cst_116 = arith.constant dense<0xFF800000> : vector<8xf32>
    %154 = vector.multi_reduction <maximumf>, %153, %cst_116 [1] : vector<8x8xf32> to vector<8xf32>
    %155 = vector.shape_cast %154 : vector<8xf32> to vector<8x1xf32>
    %156 = vector.broadcast %155 : vector<8x1xf32> to vector<8x8xf32>
    %157 = arith.subf %153, %156 : vector<8x8xf32>
    %158 = math.exp %157 : vector<8x8xf32>
    %cst_117 = arith.constant dense<0.000000e+00> : vector<8xf32>
    %159 = vector.multi_reduction <add>, %158, %cst_117 [1] : vector<8x8xf32> to vector<8xf32>
    %160 = vector.shape_cast %159 : vector<8xf32> to vector<8x1xf32>
    %161 = tpu.reciprocal %160 {approx = true} : vector<8x1xf32> -> vector<8x1xf32>
    %162 = vector.broadcast %161 : vector<8x1xf32> to vector<8x8xf32>
    %163 = arith.mulf %158, %162 : vector<8x8xf32>
    %cst_118 = arith.constant dense<0.000000e+00> : vector<8x8xf32>
    %164 = tpu.matmul %163, %149, %cst_118 {dimension_numbers = #tpu.dot_dimension_numbers<[1], [0], [0], [1], [0, 0, 1, 1], [], []>} : vector<8x8xf32>, vector<8x8xf32>, vector<8x8xf32> -> vector<8x8xf32>
    %c3_119 = arith.constant 3 : index
    %c0_120 = arith.constant 0 : index
    %c0_121 = arith.constant 0 : index
    %165 = vector.load %arg9[%c3_119, %c0_120, %c0_121] : memref<4x8x32xf32, #tpu.memory_space<vmem>>, vector<1x8x32xf32>
    %166 = vector.shape_cast %165 : vector<1x8x32xf32> to vector<8x32xf32>
    %cst_122 = arith.constant dense<0.000000e+00> : vector<8x32xf32>
    %167 = tpu.matmul %164, %166, %cst_122 {dimension_numbers = #tpu.dot_dimension_numbers<[1], [0], [0], [1], [0, 0, 1, 1], [], []>} : vector<8x8xf32>, vector<8x32xf32>, vector<8x32xf32> -> vector<8x32xf32>
    %168 = arith.addf %128, %167 : vector<8x32xf32>
    %169 = vector.broadcast %9 : vector<1x32xf32> to vector<8x32xf32>
    %170 = arith.addf %168, %169 : vector<8x32xf32>
    %171 = arith.addf %7, %170 : vector<8x32xf32>
    %c0_123 = arith.constant 0 : index
    %c0_124 = arith.constant 0 : index
    %c0_125 = arith.constant 0 : index
    %172 = vector.load %arg11[%c0_123, %c0_124, %c0_125] : memref<1x1x32xf32, #tpu.memory_space<vmem>>, vector<1x1x32xf32>
    %173 = vector.shape_cast %172 : vector<1x1x32xf32> to vector<1x32xf32>
    %c0_126 = arith.constant 0 : index
    %c0_127 = arith.constant 0 : index
    %c0_128 = arith.constant 0 : index
    %174 = vector.load %arg12[%c0_126, %c0_127, %c0_128] : memref<1x1x32xf32, #tpu.memory_space<vmem>>, vector<1x1x32xf32>
    %175 = vector.shape_cast %174 : vector<1x1x32xf32> to vector<1x32xf32>
    %cst_129 = arith.constant dense<0.000000e+00> : vector<8xf32>
    %176 = vector.multi_reduction <add>, %171, %cst_129 [1] : vector<8x32xf32> to vector<8xf32>
    %177 = vector.shape_cast %176 : vector<8xf32> to vector<8x1xf32>
    %cst_130 = arith.constant 3.200000e+01 : f32
    %178 = vector.broadcast %cst_130 : f32 to vector<8x1xf32>
    %179 = arith.divf %177, %178 : vector<8x1xf32>
    %180 = vector.broadcast %179 : vector<8x1xf32> to vector<8x32xf32>
    %181 = arith.subf %171, %180 : vector<8x32xf32>
    %182 = arith.mulf %181, %181 : vector<8x32xf32>
    %cst_131 = arith.constant dense<0.000000e+00> : vector<8xf32>
    %183 = vector.multi_reduction <add>, %182, %cst_131 [1] : vector<8x32xf32> to vector<8xf32>
    %184 = vector.shape_cast %183 : vector<8xf32> to vector<8x1xf32>
    %cst_132 = arith.constant 3.200000e+01 : f32
    %185 = vector.broadcast %cst_132 : f32 to vector<8x1xf32>
    %186 = arith.divf %184, %185 : vector<8x1xf32>
    %cst_133 = arith.constant 9.99999974E-6 : f32
    %187 = vector.broadcast %cst_133 : f32 to vector<8x1xf32>
    %188 = arith.addf %186, %187 : vector<8x1xf32>
    %189 = math.rsqrt %188 : vector<8x1xf32>
    %190 = vector.broadcast %189 : vector<8x1xf32> to vector<8x32xf32>
    %191 = arith.mulf %181, %190 : vector<8x32xf32>
    %192 = vector.broadcast %173 : vector<1x32xf32> to vector<8x32xf32>
    %193 = arith.mulf %191, %192 : vector<8x32xf32>
    %194 = vector.broadcast %175 : vector<1x32xf32> to vector<8x32xf32>
    %195 = arith.addf %193, %194 : vector<8x32xf32>
    %c0_134 = arith.constant 0 : index
    %c0_135 = arith.constant 0 : index
    %c0_136 = arith.constant 0 : index
    %196 = vector.load %arg13[%c0_134, %c0_135, %c0_136] : memref<1x32x64xf32, #tpu.memory_space<vmem>>, vector<1x32x64xf32>
    %197 = vector.shape_cast %196 : vector<1x32x64xf32> to vector<32x64xf32>
    %c0_137 = arith.constant 0 : index
    %c0_138 = arith.constant 0 : index
    %c0_139 = arith.constant 0 : index
    %198 = vector.load %arg14[%c0_137, %c0_138, %c0_139] : memref<1x1x64xf32, #tpu.memory_space<vmem>>, vector<1x1x64xf32>
    %199 = vector.shape_cast %198 : vector<1x1x64xf32> to vector<1x64xf32>
    %c0_140 = arith.constant 0 : index
    %c0_141 = arith.constant 0 : index
    %c0_142 = arith.constant 0 : index
    %200 = vector.load %arg15[%c0_140, %c0_141, %c0_142] : memref<1x64x32xf32, #tpu.memory_space<vmem>>, vector<1x64x32xf32>
    %201 = vector.shape_cast %200 : vector<1x64x32xf32> to vector<64x32xf32>
    %c0_143 = arith.constant 0 : index
    %c0_144 = arith.constant 0 : index
    %c0_145 = arith.constant 0 : index
    %202 = vector.load %arg16[%c0_143, %c0_144, %c0_145] : memref<1x1x32xf32, #tpu.memory_space<vmem>>, vector<1x1x32xf32>
    %203 = vector.shape_cast %202 : vector<1x1x32xf32> to vector<1x32xf32>
    %cst_146 = arith.constant dense<0.000000e+00> : vector<8x64xf32>
    %204 = tpu.matmul %195, %197, %cst_146 {dimension_numbers = #tpu.dot_dimension_numbers<[1], [0], [0], [1], [0, 0, 1, 1], [], []>} : vector<8x32xf32>, vector<32x64xf32>, vector<8x64xf32> -> vector<8x64xf32>
    %205 = vector.broadcast %199 : vector<1x64xf32> to vector<8x64xf32>
    %206 = arith.addf %204, %205 : vector<8x64xf32>
    %cst_147 = arith.constant 0.000000e+00 : f32
    %207 = vector.broadcast %cst_147 : f32 to vector<8x64xf32>
    %208 = arith.maximumf %206, %207 : vector<8x64xf32>
    %cst_148 = arith.constant dense<0.000000e+00> : vector<8x32xf32>
    %209 = tpu.matmul %208, %201, %cst_148 {dimension_numbers = #tpu.dot_dimension_numbers<[1], [0], [0], [1], [0, 0, 1, 1], [], []>} : vector<8x64xf32>, vector<64x32xf32>, vector<8x32xf32> -> vector<8x32xf32>
    %210 = vector.broadcast %203 : vector<1x32xf32> to vector<8x32xf32>
    %211 = arith.addf %209, %210 : vector<8x32xf32>
    %212 = arith.addf %195, %211 : vector<8x32xf32>
    %c0_149 = arith.constant 0 : index
    %c0_150 = arith.constant 0 : index
    %c0_151 = arith.constant 0 : index
    %213 = vector.load %arg17[%c0_149, %c0_150, %c0_151] : memref<1x1x32xf32, #tpu.memory_space<vmem>>, vector<1x1x32xf32>
    %214 = vector.shape_cast %213 : vector<1x1x32xf32> to vector<1x32xf32>
    %c0_152 = arith.constant 0 : index
    %c0_153 = arith.constant 0 : index
    %c0_154 = arith.constant 0 : index
    %215 = vector.load %arg18[%c0_152, %c0_153, %c0_154] : memref<1x1x32xf32, #tpu.memory_space<vmem>>, vector<1x1x32xf32>
    %216 = vector.shape_cast %215 : vector<1x1x32xf32> to vector<1x32xf32>
    %cst_155 = arith.constant dense<0.000000e+00> : vector<8xf32>
    %217 = vector.multi_reduction <add>, %212, %cst_155 [1] : vector<8x32xf32> to vector<8xf32>
    %218 = vector.shape_cast %217 : vector<8xf32> to vector<8x1xf32>
    %cst_156 = arith.constant 3.200000e+01 : f32
    %219 = vector.broadcast %cst_156 : f32 to vector<8x1xf32>
    %220 = arith.divf %218, %219 : vector<8x1xf32>
    %221 = vector.broadcast %220 : vector<8x1xf32> to vector<8x32xf32>
    %222 = arith.subf %212, %221 : vector<8x32xf32>
    %223 = arith.mulf %222, %222 : vector<8x32xf32>
    %cst_157 = arith.constant dense<0.000000e+00> : vector<8xf32>
    %224 = vector.multi_reduction <add>, %223, %cst_157 [1] : vector<8x32xf32> to vector<8xf32>
    %225 = vector.shape_cast %224 : vector<8xf32> to vector<8x1xf32>
    %cst_158 = arith.constant 3.200000e+01 : f32
    %226 = vector.broadcast %cst_158 : f32 to vector<8x1xf32>
    %227 = arith.divf %225, %226 : vector<8x1xf32>
    %cst_159 = arith.constant 9.99999974E-6 : f32
    %228 = vector.broadcast %cst_159 : f32 to vector<8x1xf32>
    %229 = arith.addf %227, %228 : vector<8x1xf32>
    %230 = math.rsqrt %229 : vector<8x1xf32>
    %231 = vector.broadcast %230 : vector<8x1xf32> to vector<8x32xf32>
    %232 = arith.mulf %222, %231 : vector<8x32xf32>
    %233 = vector.broadcast %214 : vector<1x32xf32> to vector<8x32xf32>
    %234 = arith.mulf %232, %233 : vector<8x32xf32>
    %235 = vector.broadcast %216 : vector<1x32xf32> to vector<8x32xf32>
    %236 = arith.addf %234, %235 : vector<8x32xf32>
    %c0_160 = arith.constant 0 : index
    %c0_161 = arith.constant 0 : index
    %237 = vector.load %arg45[%c0_160, %c0_161] : memref<1x32xf32, #tpu.memory_space<vmem>>, vector<1x32xf32>
    %c0_162 = arith.constant 0 : index
    %c0_163 = arith.constant 0 : index
    %238 = vector.load %arg46[%c0_162, %c0_163] : memref<1x32xf32, #tpu.memory_space<vmem>>, vector<1x32xf32>
    %cst_164 = arith.constant dense<0.000000e+00> : vector<8xf32>
    %239 = vector.multi_reduction <add>, %236, %cst_164 [1] : vector<8x32xf32> to vector<8xf32>
    %240 = vector.shape_cast %239 : vector<8xf32> to vector<8x1xf32>
    %cst_165 = arith.constant 3.200000e+01 : f32
    %241 = vector.broadcast %cst_165 : f32 to vector<8x1xf32>
    %242 = arith.divf %240, %241 : vector<8x1xf32>
    %243 = vector.broadcast %242 : vector<8x1xf32> to vector<8x32xf32>
    %244 = arith.subf %236, %243 : vector<8x32xf32>
    %245 = arith.mulf %244, %244 : vector<8x32xf32>
    %cst_166 = arith.constant dense<0.000000e+00> : vector<8xf32>
    %246 = vector.multi_reduction <add>, %245, %cst_166 [1] : vector<8x32xf32> to vector<8xf32>
    %247 = vector.shape_cast %246 : vector<8xf32> to vector<8x1xf32>
    %cst_167 = arith.constant 3.200000e+01 : f32
    %248 = vector.broadcast %cst_167 : f32 to vector<8x1xf32>
    %249 = arith.divf %247, %248 : vector<8x1xf32>
    %cst_168 = arith.constant 9.99999974E-6 : f32
    %250 = vector.broadcast %cst_168 : f32 to vector<8x1xf32>
    %251 = arith.addf %249, %250 : vector<8x1xf32>
    %252 = math.rsqrt %251 : vector<8x1xf32>
    %253 = vector.broadcast %252 : vector<8x1xf32> to vector<8x32xf32>
    %254 = arith.mulf %244, %253 : vector<8x32xf32>
    %255 = vector.broadcast %237 : vector<1x32xf32> to vector<8x32xf32>
    %256 = arith.mulf %254, %255 : vector<8x32xf32>
    %257 = vector.broadcast %238 : vector<1x32xf32> to vector<8x32xf32>
    %258 = arith.addf %256, %257 : vector<8x32xf32>
    %c0_169 = arith.constant 0 : index
    %c0_170 = arith.constant 0 : index
    %c0_171 = arith.constant 0 : index
    %259 = vector.load %arg2[%c0_169, %c0_170, %c0_171] : memref<1x8x32xf32, #tpu.memory_space<vmem>>, vector<1x8x32xf32>
    %260 = vector.shape_cast %259 : vector<1x8x32xf32> to vector<8x32xf32>
    %c0_172 = arith.constant 0 : index
    %c0_173 = arith.constant 0 : index
    %c0_174 = arith.constant 0 : index
    %261 = vector.load %arg26[%c0_172, %c0_173, %c0_174] : memref<1x1x32xf32, #tpu.memory_space<vmem>>, vector<1x1x32xf32>
    %262 = vector.shape_cast %261 : vector<1x1x32xf32> to vector<1x32xf32>
    %c0_175 = arith.constant 0 : index
    %c0_176 = arith.constant 0 : index
    %c0_177 = arith.constant 0 : index
    %263 = vector.load %arg19[%c0_175, %c0_176, %c0_177] : memref<4x32x8xf32, #tpu.memory_space<vmem>>, vector<1x32x8xf32>
    %264 = vector.shape_cast %263 : vector<1x32x8xf32> to vector<32x8xf32>
    %cst_178 = arith.constant dense<0.000000e+00> : vector<8x8xf32>
    %265 = tpu.matmul %260, %264, %cst_178 {dimension_numbers = #tpu.dot_dimension_numbers<[1], [0], [0], [1], [0, 0, 1, 1], [], []>} : vector<8x32xf32>, vector<32x8xf32>, vector<8x8xf32> -> vector<8x8xf32>
    %c0_179 = arith.constant 0 : index
    %c0_180 = arith.constant 0 : index
    %c0_181 = arith.constant 0 : index
    %266 = vector.load %arg20[%c0_179, %c0_180, %c0_181] : memref<4x1x8xf32, #tpu.memory_space<vmem>>, vector<1x1x8xf32>
    %267 = vector.shape_cast %266 : vector<1x1x8xf32> to vector<1x8xf32>
    %268 = vector.broadcast %267 : vector<1x8xf32> to vector<8x8xf32>
    %269 = arith.addf %265, %268 : vector<8x8xf32>
    %c0_182 = arith.constant 0 : index
    %c0_183 = arith.constant 0 : index
    %c0_184 = arith.constant 0 : index
    %270 = vector.load %arg21[%c0_182, %c0_183, %c0_184] : memref<4x32x8xf32, #tpu.memory_space<vmem>>, vector<1x32x8xf32>
    %271 = vector.shape_cast %270 : vector<1x32x8xf32> to vector<32x8xf32>
    %cst_185 = arith.constant dense<0.000000e+00> : vector<8x8xf32>
    %272 = tpu.matmul %260, %271, %cst_185 {dimension_numbers = #tpu.dot_dimension_numbers<[1], [0], [0], [1], [0, 0, 1, 1], [], []>} : vector<8x32xf32>, vector<32x8xf32>, vector<8x8xf32> -> vector<8x8xf32>
    %c0_186 = arith.constant 0 : index
    %c0_187 = arith.constant 0 : index
    %c0_188 = arith.constant 0 : index
    %273 = vector.load %arg22[%c0_186, %c0_187, %c0_188] : memref<4x1x8xf32, #tpu.memory_space<vmem>>, vector<1x1x8xf32>
    %274 = vector.shape_cast %273 : vector<1x1x8xf32> to vector<1x8xf32>
    %275 = vector.broadcast %274 : vector<1x8xf32> to vector<8x8xf32>
    %276 = arith.addf %272, %275 : vector<8x8xf32>
    %c0_189 = arith.constant 0 : index
    %c0_190 = arith.constant 0 : index
    %c0_191 = arith.constant 0 : index
    %277 = vector.load %arg23[%c0_189, %c0_190, %c0_191] : memref<4x32x8xf32, #tpu.memory_space<vmem>>, vector<1x32x8xf32>
    %278 = vector.shape_cast %277 : vector<1x32x8xf32> to vector<32x8xf32>
    %cst_192 = arith.constant dense<0.000000e+00> : vector<8x8xf32>
    %279 = tpu.matmul %260, %278, %cst_192 {dimension_numbers = #tpu.dot_dimension_numbers<[1], [0], [0], [1], [0, 0, 1, 1], [], []>} : vector<8x32xf32>, vector<32x8xf32>, vector<8x8xf32> -> vector<8x8xf32>
    %c0_193 = arith.constant 0 : index
    %c0_194 = arith.constant 0 : index
    %c0_195 = arith.constant 0 : index
    %280 = vector.load %arg24[%c0_193, %c0_194, %c0_195] : memref<4x1x8xf32, #tpu.memory_space<vmem>>, vector<1x1x8xf32>
    %281 = vector.shape_cast %280 : vector<1x1x8xf32> to vector<1x8xf32>
    %282 = vector.broadcast %281 : vector<1x8xf32> to vector<8x8xf32>
    %283 = arith.addf %279, %282 : vector<8x8xf32>
    %cst_196 = arith.constant dense<0.000000e+00> : vector<8x8xf32>
    %284 = tpu.matmul %269, %276, %cst_196 {dimension_numbers = #tpu.dot_dimension_numbers<[1], [1], [0], [0], [0, 0, 1, 0], [], []>} : vector<8x8xf32>, vector<8x8xf32>, vector<8x8xf32> -> vector<8x8xf32>
    %cst_197 = arith.constant 0.353553385 : f32
    %285 = vector.broadcast %cst_197 : f32 to vector<8x8xf32>
    %286 = arith.mulf %284, %285 : vector<8x8xf32>
    %287 = arith.addf %286, %5 : vector<8x8xf32>
    %cst_198 = arith.constant dense<0xFF800000> : vector<8xf32>
    %288 = vector.multi_reduction <maximumf>, %287, %cst_198 [1] : vector<8x8xf32> to vector<8xf32>
    %289 = vector.shape_cast %288 : vector<8xf32> to vector<8x1xf32>
    %290 = vector.broadcast %289 : vector<8x1xf32> to vector<8x8xf32>
    %291 = arith.subf %287, %290 : vector<8x8xf32>
    %292 = math.exp %291 : vector<8x8xf32>
    %cst_199 = arith.constant dense<0.000000e+00> : vector<8xf32>
    %293 = vector.multi_reduction <add>, %292, %cst_199 [1] : vector<8x8xf32> to vector<8xf32>
    %294 = vector.shape_cast %293 : vector<8xf32> to vector<8x1xf32>
    %295 = tpu.reciprocal %294 {approx = true} : vector<8x1xf32> -> vector<8x1xf32>
    %296 = vector.broadcast %295 : vector<8x1xf32> to vector<8x8xf32>
    %297 = arith.mulf %292, %296 : vector<8x8xf32>
    %cst_200 = arith.constant dense<0.000000e+00> : vector<8x8xf32>
    %298 = tpu.matmul %297, %283, %cst_200 {dimension_numbers = #tpu.dot_dimension_numbers<[1], [0], [0], [1], [0, 0, 1, 1], [], []>} : vector<8x8xf32>, vector<8x8xf32>, vector<8x8xf32> -> vector<8x8xf32>
    %c0_201 = arith.constant 0 : index
    %c0_202 = arith.constant 0 : index
    %c0_203 = arith.constant 0 : index
    %299 = vector.load %arg25[%c0_201, %c0_202, %c0_203] : memref<4x8x32xf32, #tpu.memory_space<vmem>>, vector<1x8x32xf32>
    %300 = vector.shape_cast %299 : vector<1x8x32xf32> to vector<8x32xf32>
    %cst_204 = arith.constant dense<0.000000e+00> : vector<8x32xf32>
    %301 = tpu.matmul %298, %300, %cst_204 {dimension_numbers = #tpu.dot_dimension_numbers<[1], [0], [0], [1], [0, 0, 1, 1], [], []>} : vector<8x8xf32>, vector<8x32xf32>, vector<8x32xf32> -> vector<8x32xf32>
    %c1_205 = arith.constant 1 : index
    %c0_206 = arith.constant 0 : index
    %c0_207 = arith.constant 0 : index
    %302 = vector.load %arg19[%c1_205, %c0_206, %c0_207] : memref<4x32x8xf32, #tpu.memory_space<vmem>>, vector<1x32x8xf32>
    %303 = vector.shape_cast %302 : vector<1x32x8xf32> to vector<32x8xf32>
    %cst_208 = arith.constant dense<0.000000e+00> : vector<8x8xf32>
    %304 = tpu.matmul %260, %303, %cst_208 {dimension_numbers = #tpu.dot_dimension_numbers<[1], [0], [0], [1], [0, 0, 1, 1], [], []>} : vector<8x32xf32>, vector<32x8xf32>, vector<8x8xf32> -> vector<8x8xf32>
    %c1_209 = arith.constant 1 : index
    %c0_210 = arith.constant 0 : index
    %c0_211 = arith.constant 0 : index
    %305 = vector.load %arg20[%c1_209, %c0_210, %c0_211] : memref<4x1x8xf32, #tpu.memory_space<vmem>>, vector<1x1x8xf32>
    %306 = vector.shape_cast %305 : vector<1x1x8xf32> to vector<1x8xf32>
    %307 = vector.broadcast %306 : vector<1x8xf32> to vector<8x8xf32>
    %308 = arith.addf %304, %307 : vector<8x8xf32>
    %c1_212 = arith.constant 1 : index
    %c0_213 = arith.constant 0 : index
    %c0_214 = arith.constant 0 : index
    %309 = vector.load %arg21[%c1_212, %c0_213, %c0_214] : memref<4x32x8xf32, #tpu.memory_space<vmem>>, vector<1x32x8xf32>
    %310 = vector.shape_cast %309 : vector<1x32x8xf32> to vector<32x8xf32>
    %cst_215 = arith.constant dense<0.000000e+00> : vector<8x8xf32>
    %311 = tpu.matmul %260, %310, %cst_215 {dimension_numbers = #tpu.dot_dimension_numbers<[1], [0], [0], [1], [0, 0, 1, 1], [], []>} : vector<8x32xf32>, vector<32x8xf32>, vector<8x8xf32> -> vector<8x8xf32>
    %c1_216 = arith.constant 1 : index
    %c0_217 = arith.constant 0 : index
    %c0_218 = arith.constant 0 : index
    %312 = vector.load %arg22[%c1_216, %c0_217, %c0_218] : memref<4x1x8xf32, #tpu.memory_space<vmem>>, vector<1x1x8xf32>
    %313 = vector.shape_cast %312 : vector<1x1x8xf32> to vector<1x8xf32>
    %314 = vector.broadcast %313 : vector<1x8xf32> to vector<8x8xf32>
    %315 = arith.addf %311, %314 : vector<8x8xf32>
    %c1_219 = arith.constant 1 : index
    %c0_220 = arith.constant 0 : index
    %c0_221 = arith.constant 0 : index
    %316 = vector.load %arg23[%c1_219, %c0_220, %c0_221] : memref<4x32x8xf32, #tpu.memory_space<vmem>>, vector<1x32x8xf32>
    %317 = vector.shape_cast %316 : vector<1x32x8xf32> to vector<32x8xf32>
    %cst_222 = arith.constant dense<0.000000e+00> : vector<8x8xf32>
    %318 = tpu.matmul %260, %317, %cst_222 {dimension_numbers = #tpu.dot_dimension_numbers<[1], [0], [0], [1], [0, 0, 1, 1], [], []>} : vector<8x32xf32>, vector<32x8xf32>, vector<8x8xf32> -> vector<8x8xf32>
    %c1_223 = arith.constant 1 : index
    %c0_224 = arith.constant 0 : index
    %c0_225 = arith.constant 0 : index
    %319 = vector.load %arg24[%c1_223, %c0_224, %c0_225] : memref<4x1x8xf32, #tpu.memory_space<vmem>>, vector<1x1x8xf32>
    %320 = vector.shape_cast %319 : vector<1x1x8xf32> to vector<1x8xf32>
    %321 = vector.broadcast %320 : vector<1x8xf32> to vector<8x8xf32>
    %322 = arith.addf %318, %321 : vector<8x8xf32>
    %cst_226 = arith.constant dense<0.000000e+00> : vector<8x8xf32>
    %323 = tpu.matmul %308, %315, %cst_226 {dimension_numbers = #tpu.dot_dimension_numbers<[1], [1], [0], [0], [0, 0, 1, 0], [], []>} : vector<8x8xf32>, vector<8x8xf32>, vector<8x8xf32> -> vector<8x8xf32>
    %cst_227 = arith.constant 0.353553385 : f32
    %324 = vector.broadcast %cst_227 : f32 to vector<8x8xf32>
    %325 = arith.mulf %323, %324 : vector<8x8xf32>
    %326 = arith.addf %325, %5 : vector<8x8xf32>
    %cst_228 = arith.constant dense<0xFF800000> : vector<8xf32>
    %327 = vector.multi_reduction <maximumf>, %326, %cst_228 [1] : vector<8x8xf32> to vector<8xf32>
    %328 = vector.shape_cast %327 : vector<8xf32> to vector<8x1xf32>
    %329 = vector.broadcast %328 : vector<8x1xf32> to vector<8x8xf32>
    %330 = arith.subf %326, %329 : vector<8x8xf32>
    %331 = math.exp %330 : vector<8x8xf32>
    %cst_229 = arith.constant dense<0.000000e+00> : vector<8xf32>
    %332 = vector.multi_reduction <add>, %331, %cst_229 [1] : vector<8x8xf32> to vector<8xf32>
    %333 = vector.shape_cast %332 : vector<8xf32> to vector<8x1xf32>
    %334 = tpu.reciprocal %333 {approx = true} : vector<8x1xf32> -> vector<8x1xf32>
    %335 = vector.broadcast %334 : vector<8x1xf32> to vector<8x8xf32>
    %336 = arith.mulf %331, %335 : vector<8x8xf32>
    %cst_230 = arith.constant dense<0.000000e+00> : vector<8x8xf32>
    %337 = tpu.matmul %336, %322, %cst_230 {dimension_numbers = #tpu.dot_dimension_numbers<[1], [0], [0], [1], [0, 0, 1, 1], [], []>} : vector<8x8xf32>, vector<8x8xf32>, vector<8x8xf32> -> vector<8x8xf32>
    %c1_231 = arith.constant 1 : index
    %c0_232 = arith.constant 0 : index
    %c0_233 = arith.constant 0 : index
    %338 = vector.load %arg25[%c1_231, %c0_232, %c0_233] : memref<4x8x32xf32, #tpu.memory_space<vmem>>, vector<1x8x32xf32>
    %339 = vector.shape_cast %338 : vector<1x8x32xf32> to vector<8x32xf32>
    %cst_234 = arith.constant dense<0.000000e+00> : vector<8x32xf32>
    %340 = tpu.matmul %337, %339, %cst_234 {dimension_numbers = #tpu.dot_dimension_numbers<[1], [0], [0], [1], [0, 0, 1, 1], [], []>} : vector<8x8xf32>, vector<8x32xf32>, vector<8x32xf32> -> vector<8x32xf32>
    %341 = arith.addf %301, %340 : vector<8x32xf32>
    %c2_235 = arith.constant 2 : index
    %c0_236 = arith.constant 0 : index
    %c0_237 = arith.constant 0 : index
    %342 = vector.load %arg19[%c2_235, %c0_236, %c0_237] : memref<4x32x8xf32, #tpu.memory_space<vmem>>, vector<1x32x8xf32>
    %343 = vector.shape_cast %342 : vector<1x32x8xf32> to vector<32x8xf32>
    %cst_238 = arith.constant dense<0.000000e+00> : vector<8x8xf32>
    %344 = tpu.matmul %260, %343, %cst_238 {dimension_numbers = #tpu.dot_dimension_numbers<[1], [0], [0], [1], [0, 0, 1, 1], [], []>} : vector<8x32xf32>, vector<32x8xf32>, vector<8x8xf32> -> vector<8x8xf32>
    %c2_239 = arith.constant 2 : index
    %c0_240 = arith.constant 0 : index
    %c0_241 = arith.constant 0 : index
    %345 = vector.load %arg20[%c2_239, %c0_240, %c0_241] : memref<4x1x8xf32, #tpu.memory_space<vmem>>, vector<1x1x8xf32>
    %346 = vector.shape_cast %345 : vector<1x1x8xf32> to vector<1x8xf32>
    %347 = vector.broadcast %346 : vector<1x8xf32> to vector<8x8xf32>
    %348 = arith.addf %344, %347 : vector<8x8xf32>
    %c2_242 = arith.constant 2 : index
    %c0_243 = arith.constant 0 : index
    %c0_244 = arith.constant 0 : index
    %349 = vector.load %arg21[%c2_242, %c0_243, %c0_244] : memref<4x32x8xf32, #tpu.memory_space<vmem>>, vector<1x32x8xf32>
    %350 = vector.shape_cast %349 : vector<1x32x8xf32> to vector<32x8xf32>
    %cst_245 = arith.constant dense<0.000000e+00> : vector<8x8xf32>
    %351 = tpu.matmul %260, %350, %cst_245 {dimension_numbers = #tpu.dot_dimension_numbers<[1], [0], [0], [1], [0, 0, 1, 1], [], []>} : vector<8x32xf32>, vector<32x8xf32>, vector<8x8xf32> -> vector<8x8xf32>
    %c2_246 = arith.constant 2 : index
    %c0_247 = arith.constant 0 : index
    %c0_248 = arith.constant 0 : index
    %352 = vector.load %arg22[%c2_246, %c0_247, %c0_248] : memref<4x1x8xf32, #tpu.memory_space<vmem>>, vector<1x1x8xf32>
    %353 = vector.shape_cast %352 : vector<1x1x8xf32> to vector<1x8xf32>
    %354 = vector.broadcast %353 : vector<1x8xf32> to vector<8x8xf32>
    %355 = arith.addf %351, %354 : vector<8x8xf32>
    %c2_249 = arith.constant 2 : index
    %c0_250 = arith.constant 0 : index
    %c0_251 = arith.constant 0 : index
    %356 = vector.load %arg23[%c2_249, %c0_250, %c0_251] : memref<4x32x8xf32, #tpu.memory_space<vmem>>, vector<1x32x8xf32>
    %357 = vector.shape_cast %356 : vector<1x32x8xf32> to vector<32x8xf32>
    %cst_252 = arith.constant dense<0.000000e+00> : vector<8x8xf32>
    %358 = tpu.matmul %260, %357, %cst_252 {dimension_numbers = #tpu.dot_dimension_numbers<[1], [0], [0], [1], [0, 0, 1, 1], [], []>} : vector<8x32xf32>, vector<32x8xf32>, vector<8x8xf32> -> vector<8x8xf32>
    %c2_253 = arith.constant 2 : index
    %c0_254 = arith.constant 0 : index
    %c0_255 = arith.constant 0 : index
    %359 = vector.load %arg24[%c2_253, %c0_254, %c0_255] : memref<4x1x8xf32, #tpu.memory_space<vmem>>, vector<1x1x8xf32>
    %360 = vector.shape_cast %359 : vector<1x1x8xf32> to vector<1x8xf32>
    %361 = vector.broadcast %360 : vector<1x8xf32> to vector<8x8xf32>
    %362 = arith.addf %358, %361 : vector<8x8xf32>
    %cst_256 = arith.constant dense<0.000000e+00> : vector<8x8xf32>
    %363 = tpu.matmul %348, %355, %cst_256 {dimension_numbers = #tpu.dot_dimension_numbers<[1], [1], [0], [0], [0, 0, 1, 0], [], []>} : vector<8x8xf32>, vector<8x8xf32>, vector<8x8xf32> -> vector<8x8xf32>
    %cst_257 = arith.constant 0.353553385 : f32
    %364 = vector.broadcast %cst_257 : f32 to vector<8x8xf32>
    %365 = arith.mulf %363, %364 : vector<8x8xf32>
    %366 = arith.addf %365, %5 : vector<8x8xf32>
    %cst_258 = arith.constant dense<0xFF800000> : vector<8xf32>
    %367 = vector.multi_reduction <maximumf>, %366, %cst_258 [1] : vector<8x8xf32> to vector<8xf32>
    %368 = vector.shape_cast %367 : vector<8xf32> to vector<8x1xf32>
    %369 = vector.broadcast %368 : vector<8x1xf32> to vector<8x8xf32>
    %370 = arith.subf %366, %369 : vector<8x8xf32>
    %371 = math.exp %370 : vector<8x8xf32>
    %cst_259 = arith.constant dense<0.000000e+00> : vector<8xf32>
    %372 = vector.multi_reduction <add>, %371, %cst_259 [1] : vector<8x8xf32> to vector<8xf32>
    %373 = vector.shape_cast %372 : vector<8xf32> to vector<8x1xf32>
    %374 = tpu.reciprocal %373 {approx = true} : vector<8x1xf32> -> vector<8x1xf32>
    %375 = vector.broadcast %374 : vector<8x1xf32> to vector<8x8xf32>
    %376 = arith.mulf %371, %375 : vector<8x8xf32>
    %cst_260 = arith.constant dense<0.000000e+00> : vector<8x8xf32>
    %377 = tpu.matmul %376, %362, %cst_260 {dimension_numbers = #tpu.dot_dimension_numbers<[1], [0], [0], [1], [0, 0, 1, 1], [], []>} : vector<8x8xf32>, vector<8x8xf32>, vector<8x8xf32> -> vector<8x8xf32>
    %c2_261 = arith.constant 2 : index
    %c0_262 = arith.constant 0 : index
    %c0_263 = arith.constant 0 : index
    %378 = vector.load %arg25[%c2_261, %c0_262, %c0_263] : memref<4x8x32xf32, #tpu.memory_space<vmem>>, vector<1x8x32xf32>
    %379 = vector.shape_cast %378 : vector<1x8x32xf32> to vector<8x32xf32>
    %cst_264 = arith.constant dense<0.000000e+00> : vector<8x32xf32>
    %380 = tpu.matmul %377, %379, %cst_264 {dimension_numbers = #tpu.dot_dimension_numbers<[1], [0], [0], [1], [0, 0, 1, 1], [], []>} : vector<8x8xf32>, vector<8x32xf32>, vector<8x32xf32> -> vector<8x32xf32>
    %381 = arith.addf %341, %380 : vector<8x32xf32>
    %c3_265 = arith.constant 3 : index
    %c0_266 = arith.constant 0 : index
    %c0_267 = arith.constant 0 : index
    %382 = vector.load %arg19[%c3_265, %c0_266, %c0_267] : memref<4x32x8xf32, #tpu.memory_space<vmem>>, vector<1x32x8xf32>
    %383 = vector.shape_cast %382 : vector<1x32x8xf32> to vector<32x8xf32>
    %cst_268 = arith.constant dense<0.000000e+00> : vector<8x8xf32>
    %384 = tpu.matmul %260, %383, %cst_268 {dimension_numbers = #tpu.dot_dimension_numbers<[1], [0], [0], [1], [0, 0, 1, 1], [], []>} : vector<8x32xf32>, vector<32x8xf32>, vector<8x8xf32> -> vector<8x8xf32>
    %c3_269 = arith.constant 3 : index
    %c0_270 = arith.constant 0 : index
    %c0_271 = arith.constant 0 : index
    %385 = vector.load %arg20[%c3_269, %c0_270, %c0_271] : memref<4x1x8xf32, #tpu.memory_space<vmem>>, vector<1x1x8xf32>
    %386 = vector.shape_cast %385 : vector<1x1x8xf32> to vector<1x8xf32>
    %387 = vector.broadcast %386 : vector<1x8xf32> to vector<8x8xf32>
    %388 = arith.addf %384, %387 : vector<8x8xf32>
    %c3_272 = arith.constant 3 : index
    %c0_273 = arith.constant 0 : index
    %c0_274 = arith.constant 0 : index
    %389 = vector.load %arg21[%c3_272, %c0_273, %c0_274] : memref<4x32x8xf32, #tpu.memory_space<vmem>>, vector<1x32x8xf32>
    %390 = vector.shape_cast %389 : vector<1x32x8xf32> to vector<32x8xf32>
    %cst_275 = arith.constant dense<0.000000e+00> : vector<8x8xf32>
    %391 = tpu.matmul %260, %390, %cst_275 {dimension_numbers = #tpu.dot_dimension_numbers<[1], [0], [0], [1], [0, 0, 1, 1], [], []>} : vector<8x32xf32>, vector<32x8xf32>, vector<8x8xf32> -> vector<8x8xf32>
    %c3_276 = arith.constant 3 : index
    %c0_277 = arith.constant 0 : index
    %c0_278 = arith.constant 0 : index
    %392 = vector.load %arg22[%c3_276, %c0_277, %c0_278] : memref<4x1x8xf32, #tpu.memory_space<vmem>>, vector<1x1x8xf32>
    %393 = vector.shape_cast %392 : vector<1x1x8xf32> to vector<1x8xf32>
    %394 = vector.broadcast %393 : vector<1x8xf32> to vector<8x8xf32>
    %395 = arith.addf %391, %394 : vector<8x8xf32>
    %c3_279 = arith.constant 3 : index
    %c0_280 = arith.constant 0 : index
    %c0_281 = arith.constant 0 : index
    %396 = vector.load %arg23[%c3_279, %c0_280, %c0_281] : memref<4x32x8xf32, #tpu.memory_space<vmem>>, vector<1x32x8xf32>
    %397 = vector.shape_cast %396 : vector<1x32x8xf32> to vector<32x8xf32>
    %cst_282 = arith.constant dense<0.000000e+00> : vector<8x8xf32>
    %398 = tpu.matmul %260, %397, %cst_282 {dimension_numbers = #tpu.dot_dimension_numbers<[1], [0], [0], [1], [0, 0, 1, 1], [], []>} : vector<8x32xf32>, vector<32x8xf32>, vector<8x8xf32> -> vector<8x8xf32>
    %c3_283 = arith.constant 3 : index
    %c0_284 = arith.constant 0 : index
    %c0_285 = arith.constant 0 : index
    %399 = vector.load %arg24[%c3_283, %c0_284, %c0_285] : memref<4x1x8xf32, #tpu.memory_space<vmem>>, vector<1x1x8xf32>
    %400 = vector.shape_cast %399 : vector<1x1x8xf32> to vector<1x8xf32>
    %401 = vector.broadcast %400 : vector<1x8xf32> to vector<8x8xf32>
    %402 = arith.addf %398, %401 : vector<8x8xf32>
    %cst_286 = arith.constant dense<0.000000e+00> : vector<8x8xf32>
    %403 = tpu.matmul %388, %395, %cst_286 {dimension_numbers = #tpu.dot_dimension_numbers<[1], [1], [0], [0], [0, 0, 1, 0], [], []>} : vector<8x8xf32>, vector<8x8xf32>, vector<8x8xf32> -> vector<8x8xf32>
    %cst_287 = arith.constant 0.353553385 : f32
    %404 = vector.broadcast %cst_287 : f32 to vector<8x8xf32>
    %405 = arith.mulf %403, %404 : vector<8x8xf32>
    %406 = arith.addf %405, %5 : vector<8x8xf32>
    %cst_288 = arith.constant dense<0xFF800000> : vector<8xf32>
    %407 = vector.multi_reduction <maximumf>, %406, %cst_288 [1] : vector<8x8xf32> to vector<8xf32>
    %408 = vector.shape_cast %407 : vector<8xf32> to vector<8x1xf32>
    %409 = vector.broadcast %408 : vector<8x1xf32> to vector<8x8xf32>
    %410 = arith.subf %406, %409 : vector<8x8xf32>
    %411 = math.exp %410 : vector<8x8xf32>
    %cst_289 = arith.constant dense<0.000000e+00> : vector<8xf32>
    %412 = vector.multi_reduction <add>, %411, %cst_289 [1] : vector<8x8xf32> to vector<8xf32>
    %413 = vector.shape_cast %412 : vector<8xf32> to vector<8x1xf32>
    %414 = tpu.reciprocal %413 {approx = true} : vector<8x1xf32> -> vector<8x1xf32>
    %415 = vector.broadcast %414 : vector<8x1xf32> to vector<8x8xf32>
    %416 = arith.mulf %411, %415 : vector<8x8xf32>
    %cst_290 = arith.constant dense<0.000000e+00> : vector<8x8xf32>
    %417 = tpu.matmul %416, %402, %cst_290 {dimension_numbers = #tpu.dot_dimension_numbers<[1], [0], [0], [1], [0, 0, 1, 1], [], []>} : vector<8x8xf32>, vector<8x8xf32>, vector<8x8xf32> -> vector<8x8xf32>
    %c3_291 = arith.constant 3 : index
    %c0_292 = arith.constant 0 : index
    %c0_293 = arith.constant 0 : index
    %418 = vector.load %arg25[%c3_291, %c0_292, %c0_293] : memref<4x8x32xf32, #tpu.memory_space<vmem>>, vector<1x8x32xf32>
    %419 = vector.shape_cast %418 : vector<1x8x32xf32> to vector<8x32xf32>
    %cst_294 = arith.constant dense<0.000000e+00> : vector<8x32xf32>
    %420 = tpu.matmul %417, %419, %cst_294 {dimension_numbers = #tpu.dot_dimension_numbers<[1], [0], [0], [1], [0, 0, 1, 1], [], []>} : vector<8x8xf32>, vector<8x32xf32>, vector<8x32xf32> -> vector<8x32xf32>
    %421 = arith.addf %381, %420 : vector<8x32xf32>
    %422 = vector.broadcast %262 : vector<1x32xf32> to vector<8x32xf32>
    %423 = arith.addf %421, %422 : vector<8x32xf32>
    %424 = arith.addf %260, %423 : vector<8x32xf32>
    %c0_295 = arith.constant 0 : index
    %c0_296 = arith.constant 0 : index
    %c0_297 = arith.constant 0 : index
    %425 = vector.load %arg27[%c0_295, %c0_296, %c0_297] : memref<1x1x32xf32, #tpu.memory_space<vmem>>, vector<1x1x32xf32>
    %426 = vector.shape_cast %425 : vector<1x1x32xf32> to vector<1x32xf32>
    %c0_298 = arith.constant 0 : index
    %c0_299 = arith.constant 0 : index
    %c0_300 = arith.constant 0 : index
    %427 = vector.load %arg28[%c0_298, %c0_299, %c0_300] : memref<1x1x32xf32, #tpu.memory_space<vmem>>, vector<1x1x32xf32>
    %428 = vector.shape_cast %427 : vector<1x1x32xf32> to vector<1x32xf32>
    %cst_301 = arith.constant dense<0.000000e+00> : vector<8xf32>
    %429 = vector.multi_reduction <add>, %424, %cst_301 [1] : vector<8x32xf32> to vector<8xf32>
    %430 = vector.shape_cast %429 : vector<8xf32> to vector<8x1xf32>
    %cst_302 = arith.constant 3.200000e+01 : f32
    %431 = vector.broadcast %cst_302 : f32 to vector<8x1xf32>
    %432 = arith.divf %430, %431 : vector<8x1xf32>
    %433 = vector.broadcast %432 : vector<8x1xf32> to vector<8x32xf32>
    %434 = arith.subf %424, %433 : vector<8x32xf32>
    %435 = arith.mulf %434, %434 : vector<8x32xf32>
    %cst_303 = arith.constant dense<0.000000e+00> : vector<8xf32>
    %436 = vector.multi_reduction <add>, %435, %cst_303 [1] : vector<8x32xf32> to vector<8xf32>
    %437 = vector.shape_cast %436 : vector<8xf32> to vector<8x1xf32>
    %cst_304 = arith.constant 3.200000e+01 : f32
    %438 = vector.broadcast %cst_304 : f32 to vector<8x1xf32>
    %439 = arith.divf %437, %438 : vector<8x1xf32>
    %cst_305 = arith.constant 9.99999974E-6 : f32
    %440 = vector.broadcast %cst_305 : f32 to vector<8x1xf32>
    %441 = arith.addf %439, %440 : vector<8x1xf32>
    %442 = math.rsqrt %441 : vector<8x1xf32>
    %443 = vector.broadcast %442 : vector<8x1xf32> to vector<8x32xf32>
    %444 = arith.mulf %434, %443 : vector<8x32xf32>
    %445 = vector.broadcast %426 : vector<1x32xf32> to vector<8x32xf32>
    %446 = arith.mulf %444, %445 : vector<8x32xf32>
    %447 = vector.broadcast %428 : vector<1x32xf32> to vector<8x32xf32>
    %448 = arith.addf %446, %447 : vector<8x32xf32>
    %c0_306 = arith.constant 0 : index
    %c0_307 = arith.constant 0 : index
    %c0_308 = arith.constant 0 : index
    %449 = vector.load %arg36[%c0_306, %c0_307, %c0_308] : memref<1x1x32xf32, #tpu.memory_space<vmem>>, vector<1x1x32xf32>
    %450 = vector.shape_cast %449 : vector<1x1x32xf32> to vector<1x32xf32>
    %c0_309 = arith.constant 0 : index
    %c0_310 = arith.constant 0 : index
    %c0_311 = arith.constant 0 : index
    %451 = vector.load %arg29[%c0_309, %c0_310, %c0_311] : memref<4x32x8xf32, #tpu.memory_space<vmem>>, vector<1x32x8xf32>
    %452 = vector.shape_cast %451 : vector<1x32x8xf32> to vector<32x8xf32>
    %cst_312 = arith.constant dense<0.000000e+00> : vector<8x8xf32>
    %453 = tpu.matmul %448, %452, %cst_312 {dimension_numbers = #tpu.dot_dimension_numbers<[1], [0], [0], [1], [0, 0, 1, 1], [], []>} : vector<8x32xf32>, vector<32x8xf32>, vector<8x8xf32> -> vector<8x8xf32>
    %c0_313 = arith.constant 0 : index
    %c0_314 = arith.constant 0 : index
    %c0_315 = arith.constant 0 : index
    %454 = vector.load %arg30[%c0_313, %c0_314, %c0_315] : memref<4x1x8xf32, #tpu.memory_space<vmem>>, vector<1x1x8xf32>
    %455 = vector.shape_cast %454 : vector<1x1x8xf32> to vector<1x8xf32>
    %456 = vector.broadcast %455 : vector<1x8xf32> to vector<8x8xf32>
    %457 = arith.addf %453, %456 : vector<8x8xf32>
    %c0_316 = arith.constant 0 : index
    %c0_317 = arith.constant 0 : index
    %c0_318 = arith.constant 0 : index
    %458 = vector.load %arg31[%c0_316, %c0_317, %c0_318] : memref<4x32x8xf32, #tpu.memory_space<vmem>>, vector<1x32x8xf32>
    %459 = vector.shape_cast %458 : vector<1x32x8xf32> to vector<32x8xf32>
    %cst_319 = arith.constant dense<0.000000e+00> : vector<8x8xf32>
    %460 = tpu.matmul %258, %459, %cst_319 {dimension_numbers = #tpu.dot_dimension_numbers<[1], [0], [0], [1], [0, 0, 1, 1], [], []>} : vector<8x32xf32>, vector<32x8xf32>, vector<8x8xf32> -> vector<8x8xf32>
    %c0_320 = arith.constant 0 : index
    %c0_321 = arith.constant 0 : index
    %c0_322 = arith.constant 0 : index
    %461 = vector.load %arg32[%c0_320, %c0_321, %c0_322] : memref<4x1x8xf32, #tpu.memory_space<vmem>>, vector<1x1x8xf32>
    %462 = vector.shape_cast %461 : vector<1x1x8xf32> to vector<1x8xf32>
    %463 = vector.broadcast %462 : vector<1x8xf32> to vector<8x8xf32>
    %464 = arith.addf %460, %463 : vector<8x8xf32>
    %c0_323 = arith.constant 0 : index
    %c0_324 = arith.constant 0 : index
    %c0_325 = arith.constant 0 : index
    %465 = vector.load %arg33[%c0_323, %c0_324, %c0_325] : memref<4x32x8xf32, #tpu.memory_space<vmem>>, vector<1x32x8xf32>
    %466 = vector.shape_cast %465 : vector<1x32x8xf32> to vector<32x8xf32>
    %cst_326 = arith.constant dense<0.000000e+00> : vector<8x8xf32>
    %467 = tpu.matmul %258, %466, %cst_326 {dimension_numbers = #tpu.dot_dimension_numbers<[1], [0], [0], [1], [0, 0, 1, 1], [], []>} : vector<8x32xf32>, vector<32x8xf32>, vector<8x8xf32> -> vector<8x8xf32>
    %c0_327 = arith.constant 0 : index
    %c0_328 = arith.constant 0 : index
    %c0_329 = arith.constant 0 : index
    %468 = vector.load %arg34[%c0_327, %c0_328, %c0_329] : memref<4x1x8xf32, #tpu.memory_space<vmem>>, vector<1x1x8xf32>
    %469 = vector.shape_cast %468 : vector<1x1x8xf32> to vector<1x8xf32>
    %470 = vector.broadcast %469 : vector<1x8xf32> to vector<8x8xf32>
    %471 = arith.addf %467, %470 : vector<8x8xf32>
    %cst_330 = arith.constant dense<0.000000e+00> : vector<8x8xf32>
    %472 = tpu.matmul %457, %464, %cst_330 {dimension_numbers = #tpu.dot_dimension_numbers<[1], [1], [0], [0], [0, 0, 1, 0], [], []>} : vector<8x8xf32>, vector<8x8xf32>, vector<8x8xf32> -> vector<8x8xf32>
    %cst_331 = arith.constant 0.353553385 : f32
    %473 = vector.broadcast %cst_331 : f32 to vector<8x8xf32>
    %474 = arith.mulf %472, %473 : vector<8x8xf32>
    %475 = arith.addf %474, %5 : vector<8x8xf32>
    %cst_332 = arith.constant dense<0xFF800000> : vector<8xf32>
    %476 = vector.multi_reduction <maximumf>, %475, %cst_332 [1] : vector<8x8xf32> to vector<8xf32>
    %477 = vector.shape_cast %476 : vector<8xf32> to vector<8x1xf32>
    %478 = vector.broadcast %477 : vector<8x1xf32> to vector<8x8xf32>
    %479 = arith.subf %475, %478 : vector<8x8xf32>
    %480 = math.exp %479 : vector<8x8xf32>
    %cst_333 = arith.constant dense<0.000000e+00> : vector<8xf32>
    %481 = vector.multi_reduction <add>, %480, %cst_333 [1] : vector<8x8xf32> to vector<8xf32>
    %482 = vector.shape_cast %481 : vector<8xf32> to vector<8x1xf32>
    %483 = tpu.reciprocal %482 {approx = true} : vector<8x1xf32> -> vector<8x1xf32>
    %484 = vector.broadcast %483 : vector<8x1xf32> to vector<8x8xf32>
    %485 = arith.mulf %480, %484 : vector<8x8xf32>
    %cst_334 = arith.constant dense<0.000000e+00> : vector<8x8xf32>
    %486 = tpu.matmul %485, %471, %cst_334 {dimension_numbers = #tpu.dot_dimension_numbers<[1], [0], [0], [1], [0, 0, 1, 1], [], []>} : vector<8x8xf32>, vector<8x8xf32>, vector<8x8xf32> -> vector<8x8xf32>
    %c0_335 = arith.constant 0 : index
    %c0_336 = arith.constant 0 : index
    %c0_337 = arith.constant 0 : index
    %487 = vector.load %arg35[%c0_335, %c0_336, %c0_337] : memref<4x8x32xf32, #tpu.memory_space<vmem>>, vector<1x8x32xf32>
    %488 = vector.shape_cast %487 : vector<1x8x32xf32> to vector<8x32xf32>
    %cst_338 = arith.constant dense<0.000000e+00> : vector<8x32xf32>
    %489 = tpu.matmul %486, %488, %cst_338 {dimension_numbers = #tpu.dot_dimension_numbers<[1], [0], [0], [1], [0, 0, 1, 1], [], []>} : vector<8x8xf32>, vector<8x32xf32>, vector<8x32xf32> -> vector<8x32xf32>
    %c1_339 = arith.constant 1 : index
    %c0_340 = arith.constant 0 : index
    %c0_341 = arith.constant 0 : index
    %490 = vector.load %arg29[%c1_339, %c0_340, %c0_341] : memref<4x32x8xf32, #tpu.memory_space<vmem>>, vector<1x32x8xf32>
    %491 = vector.shape_cast %490 : vector<1x32x8xf32> to vector<32x8xf32>
    %cst_342 = arith.constant dense<0.000000e+00> : vector<8x8xf32>
    %492 = tpu.matmul %448, %491, %cst_342 {dimension_numbers = #tpu.dot_dimension_numbers<[1], [0], [0], [1], [0, 0, 1, 1], [], []>} : vector<8x32xf32>, vector<32x8xf32>, vector<8x8xf32> -> vector<8x8xf32>
    %c1_343 = arith.constant 1 : index
    %c0_344 = arith.constant 0 : index
    %c0_345 = arith.constant 0 : index
    %493 = vector.load %arg30[%c1_343, %c0_344, %c0_345] : memref<4x1x8xf32, #tpu.memory_space<vmem>>, vector<1x1x8xf32>
    %494 = vector.shape_cast %493 : vector<1x1x8xf32> to vector<1x8xf32>
    %495 = vector.broadcast %494 : vector<1x8xf32> to vector<8x8xf32>
    %496 = arith.addf %492, %495 : vector<8x8xf32>
    %c1_346 = arith.constant 1 : index
    %c0_347 = arith.constant 0 : index
    %c0_348 = arith.constant 0 : index
    %497 = vector.load %arg31[%c1_346, %c0_347, %c0_348] : memref<4x32x8xf32, #tpu.memory_space<vmem>>, vector<1x32x8xf32>
    %498 = vector.shape_cast %497 : vector<1x32x8xf32> to vector<32x8xf32>
    %cst_349 = arith.constant dense<0.000000e+00> : vector<8x8xf32>
    %499 = tpu.matmul %258, %498, %cst_349 {dimension_numbers = #tpu.dot_dimension_numbers<[1], [0], [0], [1], [0, 0, 1, 1], [], []>} : vector<8x32xf32>, vector<32x8xf32>, vector<8x8xf32> -> vector<8x8xf32>
    %c1_350 = arith.constant 1 : index
    %c0_351 = arith.constant 0 : index
    %c0_352 = arith.constant 0 : index
    %500 = vector.load %arg32[%c1_350, %c0_351, %c0_352] : memref<4x1x8xf32, #tpu.memory_space<vmem>>, vector<1x1x8xf32>
    %501 = vector.shape_cast %500 : vector<1x1x8xf32> to vector<1x8xf32>
    %502 = vector.broadcast %501 : vector<1x8xf32> to vector<8x8xf32>
    %503 = arith.addf %499, %502 : vector<8x8xf32>
    %c1_353 = arith.constant 1 : index
    %c0_354 = arith.constant 0 : index
    %c0_355 = arith.constant 0 : index
    %504 = vector.load %arg33[%c1_353, %c0_354, %c0_355] : memref<4x32x8xf32, #tpu.memory_space<vmem>>, vector<1x32x8xf32>
    %505 = vector.shape_cast %504 : vector<1x32x8xf32> to vector<32x8xf32>
    %cst_356 = arith.constant dense<0.000000e+00> : vector<8x8xf32>
    %506 = tpu.matmul %258, %505, %cst_356 {dimension_numbers = #tpu.dot_dimension_numbers<[1], [0], [0], [1], [0, 0, 1, 1], [], []>} : vector<8x32xf32>, vector<32x8xf32>, vector<8x8xf32> -> vector<8x8xf32>
    %c1_357 = arith.constant 1 : index
    %c0_358 = arith.constant 0 : index
    %c0_359 = arith.constant 0 : index
    %507 = vector.load %arg34[%c1_357, %c0_358, %c0_359] : memref<4x1x8xf32, #tpu.memory_space<vmem>>, vector<1x1x8xf32>
    %508 = vector.shape_cast %507 : vector<1x1x8xf32> to vector<1x8xf32>
    %509 = vector.broadcast %508 : vector<1x8xf32> to vector<8x8xf32>
    %510 = arith.addf %506, %509 : vector<8x8xf32>
    %cst_360 = arith.constant dense<0.000000e+00> : vector<8x8xf32>
    %511 = tpu.matmul %496, %503, %cst_360 {dimension_numbers = #tpu.dot_dimension_numbers<[1], [1], [0], [0], [0, 0, 1, 0], [], []>} : vector<8x8xf32>, vector<8x8xf32>, vector<8x8xf32> -> vector<8x8xf32>
    %cst_361 = arith.constant 0.353553385 : f32
    %512 = vector.broadcast %cst_361 : f32 to vector<8x8xf32>
    %513 = arith.mulf %511, %512 : vector<8x8xf32>
    %514 = arith.addf %513, %5 : vector<8x8xf32>
    %cst_362 = arith.constant dense<0xFF800000> : vector<8xf32>
    %515 = vector.multi_reduction <maximumf>, %514, %cst_362 [1] : vector<8x8xf32> to vector<8xf32>
    %516 = vector.shape_cast %515 : vector<8xf32> to vector<8x1xf32>
    %517 = vector.broadcast %516 : vector<8x1xf32> to vector<8x8xf32>
    %518 = arith.subf %514, %517 : vector<8x8xf32>
    %519 = math.exp %518 : vector<8x8xf32>
    %cst_363 = arith.constant dense<0.000000e+00> : vector<8xf32>
    %520 = vector.multi_reduction <add>, %519, %cst_363 [1] : vector<8x8xf32> to vector<8xf32>
    %521 = vector.shape_cast %520 : vector<8xf32> to vector<8x1xf32>
    %522 = tpu.reciprocal %521 {approx = true} : vector<8x1xf32> -> vector<8x1xf32>
    %523 = vector.broadcast %522 : vector<8x1xf32> to vector<8x8xf32>
    %524 = arith.mulf %519, %523 : vector<8x8xf32>
    %cst_364 = arith.constant dense<0.000000e+00> : vector<8x8xf32>
    %525 = tpu.matmul %524, %510, %cst_364 {dimension_numbers = #tpu.dot_dimension_numbers<[1], [0], [0], [1], [0, 0, 1, 1], [], []>} : vector<8x8xf32>, vector<8x8xf32>, vector<8x8xf32> -> vector<8x8xf32>
    %c1_365 = arith.constant 1 : index
    %c0_366 = arith.constant 0 : index
    %c0_367 = arith.constant 0 : index
    %526 = vector.load %arg35[%c1_365, %c0_366, %c0_367] : memref<4x8x32xf32, #tpu.memory_space<vmem>>, vector<1x8x32xf32>
    %527 = vector.shape_cast %526 : vector<1x8x32xf32> to vector<8x32xf32>
    %cst_368 = arith.constant dense<0.000000e+00> : vector<8x32xf32>
    %528 = tpu.matmul %525, %527, %cst_368 {dimension_numbers = #tpu.dot_dimension_numbers<[1], [0], [0], [1], [0, 0, 1, 1], [], []>} : vector<8x8xf32>, vector<8x32xf32>, vector<8x32xf32> -> vector<8x32xf32>
    %529 = arith.addf %489, %528 : vector<8x32xf32>
    %c2_369 = arith.constant 2 : index
    %c0_370 = arith.constant 0 : index
    %c0_371 = arith.constant 0 : index
    %530 = vector.load %arg29[%c2_369, %c0_370, %c0_371] : memref<4x32x8xf32, #tpu.memory_space<vmem>>, vector<1x32x8xf32>
    %531 = vector.shape_cast %530 : vector<1x32x8xf32> to vector<32x8xf32>
    %cst_372 = arith.constant dense<0.000000e+00> : vector<8x8xf32>
    %532 = tpu.matmul %448, %531, %cst_372 {dimension_numbers = #tpu.dot_dimension_numbers<[1], [0], [0], [1], [0, 0, 1, 1], [], []>} : vector<8x32xf32>, vector<32x8xf32>, vector<8x8xf32> -> vector<8x8xf32>
    %c2_373 = arith.constant 2 : index
    %c0_374 = arith.constant 0 : index
    %c0_375 = arith.constant 0 : index
    %533 = vector.load %arg30[%c2_373, %c0_374, %c0_375] : memref<4x1x8xf32, #tpu.memory_space<vmem>>, vector<1x1x8xf32>
    %534 = vector.shape_cast %533 : vector<1x1x8xf32> to vector<1x8xf32>
    %535 = vector.broadcast %534 : vector<1x8xf32> to vector<8x8xf32>
    %536 = arith.addf %532, %535 : vector<8x8xf32>
    %c2_376 = arith.constant 2 : index
    %c0_377 = arith.constant 0 : index
    %c0_378 = arith.constant 0 : index
    %537 = vector.load %arg31[%c2_376, %c0_377, %c0_378] : memref<4x32x8xf32, #tpu.memory_space<vmem>>, vector<1x32x8xf32>
    %538 = vector.shape_cast %537 : vector<1x32x8xf32> to vector<32x8xf32>
    %cst_379 = arith.constant dense<0.000000e+00> : vector<8x8xf32>
    %539 = tpu.matmul %258, %538, %cst_379 {dimension_numbers = #tpu.dot_dimension_numbers<[1], [0], [0], [1], [0, 0, 1, 1], [], []>} : vector<8x32xf32>, vector<32x8xf32>, vector<8x8xf32> -> vector<8x8xf32>
    %c2_380 = arith.constant 2 : index
    %c0_381 = arith.constant 0 : index
    %c0_382 = arith.constant 0 : index
    %540 = vector.load %arg32[%c2_380, %c0_381, %c0_382] : memref<4x1x8xf32, #tpu.memory_space<vmem>>, vector<1x1x8xf32>
    %541 = vector.shape_cast %540 : vector<1x1x8xf32> to vector<1x8xf32>
    %542 = vector.broadcast %541 : vector<1x8xf32> to vector<8x8xf32>
    %543 = arith.addf %539, %542 : vector<8x8xf32>
    %c2_383 = arith.constant 2 : index
    %c0_384 = arith.constant 0 : index
    %c0_385 = arith.constant 0 : index
    %544 = vector.load %arg33[%c2_383, %c0_384, %c0_385] : memref<4x32x8xf32, #tpu.memory_space<vmem>>, vector<1x32x8xf32>
    %545 = vector.shape_cast %544 : vector<1x32x8xf32> to vector<32x8xf32>
    %cst_386 = arith.constant dense<0.000000e+00> : vector<8x8xf32>
    %546 = tpu.matmul %258, %545, %cst_386 {dimension_numbers = #tpu.dot_dimension_numbers<[1], [0], [0], [1], [0, 0, 1, 1], [], []>} : vector<8x32xf32>, vector<32x8xf32>, vector<8x8xf32> -> vector<8x8xf32>
    %c2_387 = arith.constant 2 : index
    %c0_388 = arith.constant 0 : index
    %c0_389 = arith.constant 0 : index
    %547 = vector.load %arg34[%c2_387, %c0_388, %c0_389] : memref<4x1x8xf32, #tpu.memory_space<vmem>>, vector<1x1x8xf32>
    %548 = vector.shape_cast %547 : vector<1x1x8xf32> to vector<1x8xf32>
    %549 = vector.broadcast %548 : vector<1x8xf32> to vector<8x8xf32>
    %550 = arith.addf %546, %549 : vector<8x8xf32>
    %cst_390 = arith.constant dense<0.000000e+00> : vector<8x8xf32>
    %551 = tpu.matmul %536, %543, %cst_390 {dimension_numbers = #tpu.dot_dimension_numbers<[1], [1], [0], [0], [0, 0, 1, 0], [], []>} : vector<8x8xf32>, vector<8x8xf32>, vector<8x8xf32> -> vector<8x8xf32>
    %cst_391 = arith.constant 0.353553385 : f32
    %552 = vector.broadcast %cst_391 : f32 to vector<8x8xf32>
    %553 = arith.mulf %551, %552 : vector<8x8xf32>
    %554 = arith.addf %553, %5 : vector<8x8xf32>
    %cst_392 = arith.constant dense<0xFF800000> : vector<8xf32>
    %555 = vector.multi_reduction <maximumf>, %554, %cst_392 [1] : vector<8x8xf32> to vector<8xf32>
    %556 = vector.shape_cast %555 : vector<8xf32> to vector<8x1xf32>
    %557 = vector.broadcast %556 : vector<8x1xf32> to vector<8x8xf32>
    %558 = arith.subf %554, %557 : vector<8x8xf32>
    %559 = math.exp %558 : vector<8x8xf32>
    %cst_393 = arith.constant dense<0.000000e+00> : vector<8xf32>
    %560 = vector.multi_reduction <add>, %559, %cst_393 [1] : vector<8x8xf32> to vector<8xf32>
    %561 = vector.shape_cast %560 : vector<8xf32> to vector<8x1xf32>
    %562 = tpu.reciprocal %561 {approx = true} : vector<8x1xf32> -> vector<8x1xf32>
    %563 = vector.broadcast %562 : vector<8x1xf32> to vector<8x8xf32>
    %564 = arith.mulf %559, %563 : vector<8x8xf32>
    %cst_394 = arith.constant dense<0.000000e+00> : vector<8x8xf32>
    %565 = tpu.matmul %564, %550, %cst_394 {dimension_numbers = #tpu.dot_dimension_numbers<[1], [0], [0], [1], [0, 0, 1, 1], [], []>} : vector<8x8xf32>, vector<8x8xf32>, vector<8x8xf32> -> vector<8x8xf32>
    %c2_395 = arith.constant 2 : index
    %c0_396 = arith.constant 0 : index
    %c0_397 = arith.constant 0 : index
    %566 = vector.load %arg35[%c2_395, %c0_396, %c0_397] : memref<4x8x32xf32, #tpu.memory_space<vmem>>, vector<1x8x32xf32>
    %567 = vector.shape_cast %566 : vector<1x8x32xf32> to vector<8x32xf32>
    %cst_398 = arith.constant dense<0.000000e+00> : vector<8x32xf32>
    %568 = tpu.matmul %565, %567, %cst_398 {dimension_numbers = #tpu.dot_dimension_numbers<[1], [0], [0], [1], [0, 0, 1, 1], [], []>} : vector<8x8xf32>, vector<8x32xf32>, vector<8x32xf32> -> vector<8x32xf32>
    %569 = arith.addf %529, %568 : vector<8x32xf32>
    %c3_399 = arith.constant 3 : index
    %c0_400 = arith.constant 0 : index
    %c0_401 = arith.constant 0 : index
    %570 = vector.load %arg29[%c3_399, %c0_400, %c0_401] : memref<4x32x8xf32, #tpu.memory_space<vmem>>, vector<1x32x8xf32>
    %571 = vector.shape_cast %570 : vector<1x32x8xf32> to vector<32x8xf32>
    %cst_402 = arith.constant dense<0.000000e+00> : vector<8x8xf32>
    %572 = tpu.matmul %448, %571, %cst_402 {dimension_numbers = #tpu.dot_dimension_numbers<[1], [0], [0], [1], [0, 0, 1, 1], [], []>} : vector<8x32xf32>, vector<32x8xf32>, vector<8x8xf32> -> vector<8x8xf32>
    %c3_403 = arith.constant 3 : index
    %c0_404 = arith.constant 0 : index
    %c0_405 = arith.constant 0 : index
    %573 = vector.load %arg30[%c3_403, %c0_404, %c0_405] : memref<4x1x8xf32, #tpu.memory_space<vmem>>, vector<1x1x8xf32>
    %574 = vector.shape_cast %573 : vector<1x1x8xf32> to vector<1x8xf32>
    %575 = vector.broadcast %574 : vector<1x8xf32> to vector<8x8xf32>
    %576 = arith.addf %572, %575 : vector<8x8xf32>
    %c3_406 = arith.constant 3 : index
    %c0_407 = arith.constant 0 : index
    %c0_408 = arith.constant 0 : index
    %577 = vector.load %arg31[%c3_406, %c0_407, %c0_408] : memref<4x32x8xf32, #tpu.memory_space<vmem>>, vector<1x32x8xf32>
    %578 = vector.shape_cast %577 : vector<1x32x8xf32> to vector<32x8xf32>
    %cst_409 = arith.constant dense<0.000000e+00> : vector<8x8xf32>
    %579 = tpu.matmul %258, %578, %cst_409 {dimension_numbers = #tpu.dot_dimension_numbers<[1], [0], [0], [1], [0, 0, 1, 1], [], []>} : vector<8x32xf32>, vector<32x8xf32>, vector<8x8xf32> -> vector<8x8xf32>
    %c3_410 = arith.constant 3 : index
    %c0_411 = arith.constant 0 : index
    %c0_412 = arith.constant 0 : index
    %580 = vector.load %arg32[%c3_410, %c0_411, %c0_412] : memref<4x1x8xf32, #tpu.memory_space<vmem>>, vector<1x1x8xf32>
    %581 = vector.shape_cast %580 : vector<1x1x8xf32> to vector<1x8xf32>
    %582 = vector.broadcast %581 : vector<1x8xf32> to vector<8x8xf32>
    %583 = arith.addf %579, %582 : vector<8x8xf32>
    %c3_413 = arith.constant 3 : index
    %c0_414 = arith.constant 0 : index
    %c0_415 = arith.constant 0 : index
    %584 = vector.load %arg33[%c3_413, %c0_414, %c0_415] : memref<4x32x8xf32, #tpu.memory_space<vmem>>, vector<1x32x8xf32>
    %585 = vector.shape_cast %584 : vector<1x32x8xf32> to vector<32x8xf32>
    %cst_416 = arith.constant dense<0.000000e+00> : vector<8x8xf32>
    %586 = tpu.matmul %258, %585, %cst_416 {dimension_numbers = #tpu.dot_dimension_numbers<[1], [0], [0], [1], [0, 0, 1, 1], [], []>} : vector<8x32xf32>, vector<32x8xf32>, vector<8x8xf32> -> vector<8x8xf32>
    %c3_417 = arith.constant 3 : index
    %c0_418 = arith.constant 0 : index
    %c0_419 = arith.constant 0 : index
    %587 = vector.load %arg34[%c3_417, %c0_418, %c0_419] : memref<4x1x8xf32, #tpu.memory_space<vmem>>, vector<1x1x8xf32>
    %588 = vector.shape_cast %587 : vector<1x1x8xf32> to vector<1x8xf32>
    %589 = vector.broadcast %588 : vector<1x8xf32> to vector<8x8xf32>
    %590 = arith.addf %586, %589 : vector<8x8xf32>
    %cst_420 = arith.constant dense<0.000000e+00> : vector<8x8xf32>
    %591 = tpu.matmul %576, %583, %cst_420 {dimension_numbers = #tpu.dot_dimension_numbers<[1], [1], [0], [0], [0, 0, 1, 0], [], []>} : vector<8x8xf32>, vector<8x8xf32>, vector<8x8xf32> -> vector<8x8xf32>
    %cst_421 = arith.constant 0.353553385 : f32
    %592 = vector.broadcast %cst_421 : f32 to vector<8x8xf32>
    %593 = arith.mulf %591, %592 : vector<8x8xf32>
    %594 = arith.addf %593, %5 : vector<8x8xf32>
    %cst_422 = arith.constant dense<0xFF800000> : vector<8xf32>
    %595 = vector.multi_reduction <maximumf>, %594, %cst_422 [1] : vector<8x8xf32> to vector<8xf32>
    %596 = vector.shape_cast %595 : vector<8xf32> to vector<8x1xf32>
    %597 = vector.broadcast %596 : vector<8x1xf32> to vector<8x8xf32>
    %598 = arith.subf %594, %597 : vector<8x8xf32>
    %599 = math.exp %598 : vector<8x8xf32>
    %cst_423 = arith.constant dense<0.000000e+00> : vector<8xf32>
    %600 = vector.multi_reduction <add>, %599, %cst_423 [1] : vector<8x8xf32> to vector<8xf32>
    %601 = vector.shape_cast %600 : vector<8xf32> to vector<8x1xf32>
    %602 = tpu.reciprocal %601 {approx = true} : vector<8x1xf32> -> vector<8x1xf32>
    %603 = vector.broadcast %602 : vector<8x1xf32> to vector<8x8xf32>
    %604 = arith.mulf %599, %603 : vector<8x8xf32>
    %cst_424 = arith.constant dense<0.000000e+00> : vector<8x8xf32>
    %605 = tpu.matmul %604, %590, %cst_424 {dimension_numbers = #tpu.dot_dimension_numbers<[1], [0], [0], [1], [0, 0, 1, 1], [], []>} : vector<8x8xf32>, vector<8x8xf32>, vector<8x8xf32> -> vector<8x8xf32>
    %c3_425 = arith.constant 3 : index
    %c0_426 = arith.constant 0 : index
    %c0_427 = arith.constant 0 : index
    %606 = vector.load %arg35[%c3_425, %c0_426, %c0_427] : memref<4x8x32xf32, #tpu.memory_space<vmem>>, vector<1x8x32xf32>
    %607 = vector.shape_cast %606 : vector<1x8x32xf32> to vector<8x32xf32>
    %cst_428 = arith.constant dense<0.000000e+00> : vector<8x32xf32>
    %608 = tpu.matmul %605, %607, %cst_428 {dimension_numbers = #tpu.dot_dimension_numbers<[1], [0], [0], [1], [0, 0, 1, 1], [], []>} : vector<8x8xf32>, vector<8x32xf32>, vector<8x32xf32> -> vector<8x32xf32>
    %609 = arith.addf %569, %608 : vector<8x32xf32>
    %610 = vector.broadcast %450 : vector<1x32xf32> to vector<8x32xf32>
    %611 = arith.addf %609, %610 : vector<8x32xf32>
    %612 = arith.addf %448, %611 : vector<8x32xf32>
    %c0_429 = arith.constant 0 : index
    %c0_430 = arith.constant 0 : index
    %c0_431 = arith.constant 0 : index
    %613 = vector.load %arg37[%c0_429, %c0_430, %c0_431] : memref<1x1x32xf32, #tpu.memory_space<vmem>>, vector<1x1x32xf32>
    %614 = vector.shape_cast %613 : vector<1x1x32xf32> to vector<1x32xf32>
    %c0_432 = arith.constant 0 : index
    %c0_433 = arith.constant 0 : index
    %c0_434 = arith.constant 0 : index
    %615 = vector.load %arg38[%c0_432, %c0_433, %c0_434] : memref<1x1x32xf32, #tpu.memory_space<vmem>>, vector<1x1x32xf32>
    %616 = vector.shape_cast %615 : vector<1x1x32xf32> to vector<1x32xf32>
    %cst_435 = arith.constant dense<0.000000e+00> : vector<8xf32>
    %617 = vector.multi_reduction <add>, %612, %cst_435 [1] : vector<8x32xf32> to vector<8xf32>
    %618 = vector.shape_cast %617 : vector<8xf32> to vector<8x1xf32>
    %cst_436 = arith.constant 3.200000e+01 : f32
    %619 = vector.broadcast %cst_436 : f32 to vector<8x1xf32>
    %620 = arith.divf %618, %619 : vector<8x1xf32>
    %621 = vector.broadcast %620 : vector<8x1xf32> to vector<8x32xf32>
    %622 = arith.subf %612, %621 : vector<8x32xf32>
    %623 = arith.mulf %622, %622 : vector<8x32xf32>
    %cst_437 = arith.constant dense<0.000000e+00> : vector<8xf32>
    %624 = vector.multi_reduction <add>, %623, %cst_437 [1] : vector<8x32xf32> to vector<8xf32>
    %625 = vector.shape_cast %624 : vector<8xf32> to vector<8x1xf32>
    %cst_438 = arith.constant 3.200000e+01 : f32
    %626 = vector.broadcast %cst_438 : f32 to vector<8x1xf32>
    %627 = arith.divf %625, %626 : vector<8x1xf32>
    %cst_439 = arith.constant 9.99999974E-6 : f32
    %628 = vector.broadcast %cst_439 : f32 to vector<8x1xf32>
    %629 = arith.addf %627, %628 : vector<8x1xf32>
    %630 = math.rsqrt %629 : vector<8x1xf32>
    %631 = vector.broadcast %630 : vector<8x1xf32> to vector<8x32xf32>
    %632 = arith.mulf %622, %631 : vector<8x32xf32>
    %633 = vector.broadcast %614 : vector<1x32xf32> to vector<8x32xf32>
    %634 = arith.mulf %632, %633 : vector<8x32xf32>
    %635 = vector.broadcast %616 : vector<1x32xf32> to vector<8x32xf32>
    %636 = arith.addf %634, %635 : vector<8x32xf32>
    %c0_440 = arith.constant 0 : index
    %c0_441 = arith.constant 0 : index
    %c0_442 = arith.constant 0 : index
    %637 = vector.load %arg39[%c0_440, %c0_441, %c0_442] : memref<1x32x64xf32, #tpu.memory_space<vmem>>, vector<1x32x64xf32>
    %638 = vector.shape_cast %637 : vector<1x32x64xf32> to vector<32x64xf32>
    %c0_443 = arith.constant 0 : index
    %c0_444 = arith.constant 0 : index
    %c0_445 = arith.constant 0 : index
    %639 = vector.load %arg40[%c0_443, %c0_444, %c0_445] : memref<1x1x64xf32, #tpu.memory_space<vmem>>, vector<1x1x64xf32>
    %640 = vector.shape_cast %639 : vector<1x1x64xf32> to vector<1x64xf32>
    %c0_446 = arith.constant 0 : index
    %c0_447 = arith.constant 0 : index
    %c0_448 = arith.constant 0 : index
    %641 = vector.load %arg41[%c0_446, %c0_447, %c0_448] : memref<1x64x32xf32, #tpu.memory_space<vmem>>, vector<1x64x32xf32>
    %642 = vector.shape_cast %641 : vector<1x64x32xf32> to vector<64x32xf32>
    %c0_449 = arith.constant 0 : index
    %c0_450 = arith.constant 0 : index
    %c0_451 = arith.constant 0 : index
    %643 = vector.load %arg42[%c0_449, %c0_450, %c0_451] : memref<1x1x32xf32, #tpu.memory_space<vmem>>, vector<1x1x32xf32>
    %644 = vector.shape_cast %643 : vector<1x1x32xf32> to vector<1x32xf32>
    %cst_452 = arith.constant dense<0.000000e+00> : vector<8x64xf32>
    %645 = tpu.matmul %636, %638, %cst_452 {dimension_numbers = #tpu.dot_dimension_numbers<[1], [0], [0], [1], [0, 0, 1, 1], [], []>} : vector<8x32xf32>, vector<32x64xf32>, vector<8x64xf32> -> vector<8x64xf32>
    %646 = vector.broadcast %640 : vector<1x64xf32> to vector<8x64xf32>
    %647 = arith.addf %645, %646 : vector<8x64xf32>
    %cst_453 = arith.constant 0.000000e+00 : f32
    %648 = vector.broadcast %cst_453 : f32 to vector<8x64xf32>
    %649 = arith.maximumf %647, %648 : vector<8x64xf32>
    %cst_454 = arith.constant dense<0.000000e+00> : vector<8x32xf32>
    %650 = tpu.matmul %649, %642, %cst_454 {dimension_numbers = #tpu.dot_dimension_numbers<[1], [0], [0], [1], [0, 0, 1, 1], [], []>} : vector<8x64xf32>, vector<64x32xf32>, vector<8x32xf32> -> vector<8x32xf32>
    %651 = vector.broadcast %644 : vector<1x32xf32> to vector<8x32xf32>
    %652 = arith.addf %650, %651 : vector<8x32xf32>
    %653 = arith.addf %636, %652 : vector<8x32xf32>
    %c0_455 = arith.constant 0 : index
    %c0_456 = arith.constant 0 : index
    %c0_457 = arith.constant 0 : index
    %654 = vector.load %arg43[%c0_455, %c0_456, %c0_457] : memref<1x1x32xf32, #tpu.memory_space<vmem>>, vector<1x1x32xf32>
    %655 = vector.shape_cast %654 : vector<1x1x32xf32> to vector<1x32xf32>
    %c0_458 = arith.constant 0 : index
    %c0_459 = arith.constant 0 : index
    %c0_460 = arith.constant 0 : index
    %656 = vector.load %arg44[%c0_458, %c0_459, %c0_460] : memref<1x1x32xf32, #tpu.memory_space<vmem>>, vector<1x1x32xf32>
    %657 = vector.shape_cast %656 : vector<1x1x32xf32> to vector<1x32xf32>
    %cst_461 = arith.constant dense<0.000000e+00> : vector<8xf32>
    %658 = vector.multi_reduction <add>, %653, %cst_461 [1] : vector<8x32xf32> to vector<8xf32>
    %659 = vector.shape_cast %658 : vector<8xf32> to vector<8x1xf32>
    %cst_462 = arith.constant 3.200000e+01 : f32
    %660 = vector.broadcast %cst_462 : f32 to vector<8x1xf32>
    %661 = arith.divf %659, %660 : vector<8x1xf32>
    %662 = vector.broadcast %661 : vector<8x1xf32> to vector<8x32xf32>
    %663 = arith.subf %653, %662 : vector<8x32xf32>
    %664 = arith.mulf %663, %663 : vector<8x32xf32>
    %cst_463 = arith.constant dense<0.000000e+00> : vector<8xf32>
    %665 = vector.multi_reduction <add>, %664, %cst_463 [1] : vector<8x32xf32> to vector<8xf32>
    %666 = vector.shape_cast %665 : vector<8xf32> to vector<8x1xf32>
    %cst_464 = arith.constant 3.200000e+01 : f32
    %667 = vector.broadcast %cst_464 : f32 to vector<8x1xf32>
    %668 = arith.divf %666, %667 : vector<8x1xf32>
    %cst_465 = arith.constant 9.99999974E-6 : f32
    %669 = vector.broadcast %cst_465 : f32 to vector<8x1xf32>
    %670 = arith.addf %668, %669 : vector<8x1xf32>
    %671 = math.rsqrt %670 : vector<8x1xf32>
    %672 = vector.broadcast %671 : vector<8x1xf32> to vector<8x32xf32>
    %673 = arith.mulf %663, %672 : vector<8x32xf32>
    %674 = vector.broadcast %655 : vector<1x32xf32> to vector<8x32xf32>
    %675 = arith.mulf %673, %674 : vector<8x32xf32>
    %676 = vector.broadcast %657 : vector<1x32xf32> to vector<8x32xf32>
    %677 = arith.addf %675, %676 : vector<8x32xf32>
    %c0_466 = arith.constant 0 : index
    %c0_467 = arith.constant 0 : index
    %678 = vector.load %arg47[%c0_466, %c0_467] : memref<1x32xf32, #tpu.memory_space<vmem>>, vector<1x32xf32>
    %c0_468 = arith.constant 0 : index
    %c0_469 = arith.constant 0 : index
    %679 = vector.load %arg48[%c0_468, %c0_469] : memref<1x32xf32, #tpu.memory_space<vmem>>, vector<1x32xf32>
    %cst_470 = arith.constant dense<0.000000e+00> : vector<8xf32>
    %680 = vector.multi_reduction <add>, %677, %cst_470 [1] : vector<8x32xf32> to vector<8xf32>
    %681 = vector.shape_cast %680 : vector<8xf32> to vector<8x1xf32>
    %cst_471 = arith.constant 3.200000e+01 : f32
    %682 = vector.broadcast %cst_471 : f32 to vector<8x1xf32>
    %683 = arith.divf %681, %682 : vector<8x1xf32>
    %684 = vector.broadcast %683 : vector<8x1xf32> to vector<8x32xf32>
    %685 = arith.subf %677, %684 : vector<8x32xf32>
    %686 = arith.mulf %685, %685 : vector<8x32xf32>
    %cst_472 = arith.constant dense<0.000000e+00> : vector<8xf32>
    %687 = vector.multi_reduction <add>, %686, %cst_472 [1] : vector<8x32xf32> to vector<8xf32>
    %688 = vector.shape_cast %687 : vector<8xf32> to vector<8x1xf32>
    %cst_473 = arith.constant 3.200000e+01 : f32
    %689 = vector.broadcast %cst_473 : f32 to vector<8x1xf32>
    %690 = arith.divf %688, %689 : vector<8x1xf32>
    %cst_474 = arith.constant 9.99999974E-6 : f32
    %691 = vector.broadcast %cst_474 : f32 to vector<8x1xf32>
    %692 = arith.addf %690, %691 : vector<8x1xf32>
    %693 = math.rsqrt %692 : vector<8x1xf32>
    %694 = vector.broadcast %693 : vector<8x1xf32> to vector<8x32xf32>
    %695 = arith.mulf %685, %694 : vector<8x32xf32>
    %696 = vector.broadcast %678 : vector<1x32xf32> to vector<8x32xf32>
    %697 = arith.mulf %695, %696 : vector<8x32xf32>
    %698 = vector.broadcast %679 : vector<1x32xf32> to vector<8x32xf32>
    %699 = arith.addf %697, %698 : vector<8x32xf32>
    %c0_475 = arith.constant 0 : index
    %c0_476 = arith.constant 0 : index
    %700 = vector.load %arg49[%c0_475, %c0_476] : memref<32x1xf32, #tpu.memory_space<vmem>>, vector<32x1xf32>
    %cst_477 = arith.constant dense<0.000000e+00> : vector<8x1xf32>
    %701 = tpu.matmul %699, %700, %cst_477 {dimension_numbers = #tpu.dot_dimension_numbers<[1], [0], [0], [1], [0, 0, 1, 1], [], []>} : vector<8x32xf32>, vector<32x1xf32>, vector<8x1xf32> -> vector<8x1xf32>
    %c0_478 = arith.constant 0 : index
    %c0_479 = arith.constant 0 : index
    %702 = vector.load %arg50[%c0_478, %c0_479] : memref<1x1xf32, #tpu.memory_space<vmem>>, vector<1x1xf32>
    %703 = vector.broadcast %702 : vector<1x1xf32> to vector<8x1xf32>
    %704 = arith.addf %701, %703 : vector<8x1xf32>
    %705 = arith.negf %704 : vector<8x1xf32>
    %706 = math.exp %705 : vector<8x1xf32>
    %cst_480 = arith.constant 1.000000e+00 : f32
    %707 = vector.broadcast %cst_480 : f32 to vector<8x1xf32>
    %708 = arith.addf %707, %706 : vector<8x1xf32>
    %709 = arith.divf %707, %708 : vector<8x1xf32>
    %c0_481 = arith.constant 0 : index
    %c0_482 = arith.constant 0 : index
    %c0_483 = arith.constant 0 : index
    %710 = vector.load %arg51[%c0_481, %c0_482, %c0_483] : memref<1x8x1xf32, #tpu.memory_space<vmem>>, vector<1x8x1xf32>
    %711 = vector.shape_cast %710 : vector<1x8x1xf32> to vector<8x1xf32>
    %712 = vector.shape_cast %709 : vector<8x1xf32> to vector<1x8x1xf32>
    tpu.vector_store %arg51[%c0_481, %c0_482, %c0_483], %712 {strides = array<i32>} : memref<1x8x1xf32, #tpu.memory_space<vmem>>, vector<1x8x1xf32>,
    return
  }
  func.func @transform_0(%arg0: i32) -> (i32, i32, i32) {
    %c0_i32 = arith.constant 0 : i32
    %c0_i32_0 = arith.constant 0 : i32
    %c0_i32_1 = arith.constant 0 : i32
    return %arg0, %c0_i32, %c0_i32_0 : i32, i32, i32
  }
  func.func @transform_1(%arg0: i32) -> (i32, i32, i32) {
    %c0_i32 = arith.constant 0 : i32
    %c0_i32_0 = arith.constant 0 : i32
    %c0_i32_1 = arith.constant 0 : i32
    return %arg0, %c0_i32, %c0_i32_0 : i32, i32, i32
  }
  func.func @transform_2(%arg0: i32) -> (i32, i32, i32) {
    %c0_i32 = arith.constant 0 : i32
    %c0_i32_0 = arith.constant 0 : i32
    %c0_i32_1 = arith.constant 0 : i32
    %c0_i32_2 = arith.constant 0 : i32
    return %c0_i32, %c0_i32_0, %c0_i32_1 : i32, i32, i32
  }
  func.func @transform_3(%arg0: i32) -> (i32, i32, i32) {
    %c0_i32 = arith.constant 0 : i32
    %c0_i32_0 = arith.constant 0 : i32
    %c0_i32_1 = arith.constant 0 : i32
    %c0_i32_2 = arith.constant 0 : i32
    return %c0_i32, %c0_i32_0, %c0_i32_1 : i32, i32, i32
  }
  func.func @transform_4(%arg0: i32) -> (i32, i32, i32) {
    %c0_i32 = arith.constant 0 : i32
    %c0_i32_0 = arith.constant 0 : i32
    %c0_i32_1 = arith.constant 0 : i32
    %c0_i32_2 = arith.constant 0 : i32
    return %c0_i32, %c0_i32_0, %c0_i32_1 : i32, i32, i32
  }
  func.func @transform_5(%arg0: i32) -> (i32, i32, i32) {
    %c0_i32 = arith.constant 0 : i32
    %c0_i32_0 = arith.constant 0 : i32
    %c0_i32_1 = arith.constant 0 : i32
    %c0_i32_2 = arith.constant 0 : i32
    return %c0_i32, %c0_i32_0, %c0_i32_1 : i32, i32, i32
  }
  func.func @transform_6(%arg0: i32) -> (i32, i32, i32) {
    %c0_i32 = arith.constant 0 : i32
    %c0_i32_0 = arith.constant 0 : i32
    %c0_i32_1 = arith.constant 0 : i32
    %c0_i32_2 = arith.constant 0 : i32
    return %c0_i32, %c0_i32_0, %c0_i32_1 : i32, i32, i32
  }
  func.func @transform_7(%arg0: i32) -> (i32, i32, i32) {
    %c0_i32 = arith.constant 0 : i32
    %c0_i32_0 = arith.constant 0 : i32
    %c0_i32_1 = arith.constant 0 : i32
    %c0_i32_2 = arith.constant 0 : i32
    return %c0_i32, %c0_i32_0, %c0_i32_1 : i32, i32, i32
  }
  func.func @transform_8(%arg0: i32) -> (i32, i32, i32) {
    %c0_i32 = arith.constant 0 : i32
    %c0_i32_0 = arith.constant 0 : i32
    %c0_i32_1 = arith.constant 0 : i32
    %c0_i32_2 = arith.constant 0 : i32
    return %c0_i32, %c0_i32_0, %c0_i32_1 : i32, i32, i32
  }
  func.func @transform_9(%arg0: i32) -> (i32, i32, i32) {
    %c0_i32 = arith.constant 0 : i32
    %c0_i32_0 = arith.constant 0 : i32
    %c0_i32_1 = arith.constant 0 : i32
    %c0_i32_2 = arith.constant 0 : i32
    return %c0_i32, %c0_i32_0, %c0_i32_1 : i32, i32, i32
  }
  func.func @transform_10(%arg0: i32) -> (i32, i32, i32) {
    %c0_i32 = arith.constant 0 : i32
    %c0_i32_0 = arith.constant 0 : i32
    %c0_i32_1 = arith.constant 0 : i32
    %c0_i32_2 = arith.constant 0 : i32
    return %c0_i32, %c0_i32_0, %c0_i32_1 : i32, i32, i32
  }
  func.func @transform_11(%arg0: i32) -> (i32, i32, i32) {
    %c0_i32 = arith.constant 0 : i32
    %c0_i32_0 = arith.constant 0 : i32
    %c0_i32_1 = arith.constant 0 : i32
    %c0_i32_2 = arith.constant 0 : i32
    return %c0_i32, %c0_i32_0, %c0_i32_1 : i32, i32, i32
  }
  func.func @transform_12(%arg0: i32) -> (i32, i32, i32) {
    %c0_i32 = arith.constant 0 : i32
    %c0_i32_0 = arith.constant 0 : i32
    %c0_i32_1 = arith.constant 0 : i32
    %c0_i32_2 = arith.constant 0 : i32
    return %c0_i32, %c0_i32_0, %c0_i32_1 : i32, i32, i32
  }
  func.func @transform_13(%arg0: i32) -> (i32, i32, i32) {
    %c0_i32 = arith.constant 0 : i32
    %c0_i32_0 = arith.constant 0 : i32
    %c0_i32_1 = arith.constant 0 : i32
    %c0_i32_2 = arith.constant 0 : i32
    return %c0_i32, %c0_i32_0, %c0_i32_1 : i32, i32, i32
  }
  func.func @transform_14(%arg0: i32) -> (i32, i32, i32) {
    %c0_i32 = arith.constant 0 : i32
    %c0_i32_0 = arith.constant 0 : i32
    %c0_i32_1 = arith.constant 0 : i32
    %c0_i32_2 = arith.constant 0 : i32
    return %c0_i32, %c0_i32_0, %c0_i32_1 : i32, i32, i32
  }
  func.func @transform_15(%arg0: i32) -> (i32, i32, i32) {
    %c0_i32 = arith.constant 0 : i32
    %c0_i32_0 = arith.constant 0 : i32
    %c0_i32_1 = arith.constant 0 : i32
    %c0_i32_2 = arith.constant 0 : i32
    return %c0_i32, %c0_i32_0, %c0_i32_1 : i32, i32, i32
  }
  func.func @transform_16(%arg0: i32) -> (i32, i32, i32) {
    %c0_i32 = arith.constant 0 : i32
    %c0_i32_0 = arith.constant 0 : i32
    %c0_i32_1 = arith.constant 0 : i32
    %c0_i32_2 = arith.constant 0 : i32
    return %c0_i32, %c0_i32_0, %c0_i32_1 : i32, i32, i32
  }
  func.func @transform_17(%arg0: i32) -> (i32, i32, i32) {
    %c0_i32 = arith.constant 0 : i32
    %c0_i32_0 = arith.constant 0 : i32
    %c0_i32_1 = arith.constant 0 : i32
    %c0_i32_2 = arith.constant 0 : i32
    return %c0_i32, %c0_i32_0, %c0_i32_1 : i32, i32, i32
  }
  func.func @transform_18(%arg0: i32) -> (i32, i32, i32) {
    %c0_i32 = arith.constant 0 : i32
    %c0_i32_0 = arith.constant 0 : i32
    %c0_i32_1 = arith.constant 0 : i32
    %c0_i32_2 = arith.constant 0 : i32
    return %c0_i32, %c0_i32_0, %c0_i32_1 : i32, i32, i32
  }
  func.func @transform_19(%arg0: i32) -> (i32, i32, i32) {
    %c0_i32 = arith.constant 0 : i32
    %c0_i32_0 = arith.constant 0 : i32
    %c0_i32_1 = arith.constant 0 : i32
    %c0_i32_2 = arith.constant 0 : i32
    return %c0_i32, %c0_i32_0, %c0_i32_1 : i32, i32, i32
  }
  func.func @transform_20(%arg0: i32) -> (i32, i32, i32) {
    %c0_i32 = arith.constant 0 : i32
    %c0_i32_0 = arith.constant 0 : i32
    %c0_i32_1 = arith.constant 0 : i32
    %c0_i32_2 = arith.constant 0 : i32
    return %c0_i32, %c0_i32_0, %c0_i32_1 : i32, i32, i32
  }
  func.func @transform_21(%arg0: i32) -> (i32, i32, i32) {
    %c0_i32 = arith.constant 0 : i32
    %c0_i32_0 = arith.constant 0 : i32
    %c0_i32_1 = arith.constant 0 : i32
    %c0_i32_2 = arith.constant 0 : i32
    return %c0_i32, %c0_i32_0, %c0_i32_1 : i32, i32, i32
  }
  func.func @transform_22(%arg0: i32) -> (i32, i32, i32) {
    %c0_i32 = arith.constant 0 : i32
    %c0_i32_0 = arith.constant 0 : i32
    %c0_i32_1 = arith.constant 0 : i32
    %c0_i32_2 = arith.constant 0 : i32
    return %c0_i32, %c0_i32_0, %c0_i32_1 : i32, i32, i32
  }
  func.func @transform_23(%arg0: i32) -> (i32, i32, i32) {
    %c0_i32 = arith.constant 0 : i32
    %c0_i32_0 = arith.constant 0 : i32
    %c0_i32_1 = arith.constant 0 : i32
    %c0_i32_2 = arith.constant 0 : i32
    return %c0_i32, %c0_i32_0, %c0_i32_1 : i32, i32, i32
  }
  func.func @transform_24(%arg0: i32) -> (i32, i32, i32) {
    %c0_i32 = arith.constant 0 : i32
    %c0_i32_0 = arith.constant 0 : i32
    %c0_i32_1 = arith.constant 0 : i32
    %c0_i32_2 = arith.constant 0 : i32
    return %c0_i32, %c0_i32_0, %c0_i32_1 : i32, i32, i32
  }
  func.func @transform_25(%arg0: i32) -> (i32, i32, i32) {
    %c0_i32 = arith.constant 0 : i32
    %c0_i32_0 = arith.constant 0 : i32
    %c0_i32_1 = arith.constant 0 : i32
    %c0_i32_2 = arith.constant 0 : i32
    return %c0_i32, %c0_i32_0, %c0_i32_1 : i32, i32, i32
  }
  func.func @transform_26(%arg0: i32) -> (i32, i32, i32) {
    %c0_i32 = arith.constant 0 : i32
    %c0_i32_0 = arith.constant 0 : i32
    %c0_i32_1 = arith.constant 0 : i32
    %c0_i32_2 = arith.constant 0 : i32
    return %c0_i32, %c0_i32_0, %c0_i32_1 : i32, i32, i32
  }
  func.func @transform_27(%arg0: i32) -> (i32, i32, i32) {
    %c0_i32 = arith.constant 0 : i32
    %c0_i32_0 = arith.constant 0 : i32
    %c0_i32_1 = arith.constant 0 : i32
    %c0_i32_2 = arith.constant 0 : i32
    return %c0_i32, %c0_i32_0, %c0_i32_1 : i32, i32, i32
  }
  func.func @transform_28(%arg0: i32) -> (i32, i32, i32) {
    %c0_i32 = arith.constant 0 : i32
    %c0_i32_0 = arith.constant 0 : i32
    %c0_i32_1 = arith.constant 0 : i32
    %c0_i32_2 = arith.constant 0 : i32
    return %c0_i32, %c0_i32_0, %c0_i32_1 : i32, i32, i32
  }
  func.func @transform_29(%arg0: i32) -> (i32, i32, i32) {
    %c0_i32 = arith.constant 0 : i32
    %c0_i32_0 = arith.constant 0 : i32
    %c0_i32_1 = arith.constant 0 : i32
    %c0_i32_2 = arith.constant 0 : i32
    return %c0_i32, %c0_i32_0, %c0_i32_1 : i32, i32, i32
  }
  func.func @transform_30(%arg0: i32) -> (i32, i32, i32) {
    %c0_i32 = arith.constant 0 : i32
    %c0_i32_0 = arith.constant 0 : i32
    %c0_i32_1 = arith.constant 0 : i32
    %c0_i32_2 = arith.constant 0 : i32
    return %c0_i32, %c0_i32_0, %c0_i32_1 : i32, i32, i32
  }
  func.func @transform_31(%arg0: i32) -> (i32, i32, i32) {
    %c0_i32 = arith.constant 0 : i32
    %c0_i32_0 = arith.constant 0 : i32
    %c0_i32_1 = arith.constant 0 : i32
    %c0_i32_2 = arith.constant 0 : i32
    return %c0_i32, %c0_i32_0, %c0_i32_1 : i32, i32, i32
  }
  func.func @transform_32(%arg0: i32) -> (i32, i32, i32) {
    %c0_i32 = arith.constant 0 : i32
    %c0_i32_0 = arith.constant 0 : i32
    %c0_i32_1 = arith.constant 0 : i32
    %c0_i32_2 = arith.constant 0 : i32
    return %c0_i32, %c0_i32_0, %c0_i32_1 : i32, i32, i32
  }
  func.func @transform_33(%arg0: i32) -> (i32, i32, i32) {
    %c0_i32 = arith.constant 0 : i32
    %c0_i32_0 = arith.constant 0 : i32
    %c0_i32_1 = arith.constant 0 : i32
    %c0_i32_2 = arith.constant 0 : i32
    return %c0_i32, %c0_i32_0, %c0_i32_1 : i32, i32, i32
  }
  func.func @transform_34(%arg0: i32) -> (i32, i32, i32) {
    %c0_i32 = arith.constant 0 : i32
    %c0_i32_0 = arith.constant 0 : i32
    %c0_i32_1 = arith.constant 0 : i32
    %c0_i32_2 = arith.constant 0 : i32
    return %c0_i32, %c0_i32_0, %c0_i32_1 : i32, i32, i32
  }
  func.func @transform_35(%arg0: i32) -> (i32, i32, i32) {
    %c0_i32 = arith.constant 0 : i32
    %c0_i32_0 = arith.constant 0 : i32
    %c0_i32_1 = arith.constant 0 : i32
    %c0_i32_2 = arith.constant 0 : i32
    return %c0_i32, %c0_i32_0, %c0_i32_1 : i32, i32, i32
  }
  func.func @transform_36(%arg0: i32) -> (i32, i32, i32) {
    %c0_i32 = arith.constant 0 : i32
    %c0_i32_0 = arith.constant 0 : i32
    %c0_i32_1 = arith.constant 0 : i32
    %c0_i32_2 = arith.constant 0 : i32
    return %c0_i32, %c0_i32_0, %c0_i32_1 : i32, i32, i32
  }
  func.func @transform_37(%arg0: i32) -> (i32, i32, i32) {
    %c0_i32 = arith.constant 0 : i32
    %c0_i32_0 = arith.constant 0 : i32
    %c0_i32_1 = arith.constant 0 : i32
    %c0_i32_2 = arith.constant 0 : i32
    return %c0_i32, %c0_i32_0, %c0_i32_1 : i32, i32, i32
  }
  func.func @transform_38(%arg0: i32) -> (i32, i32, i32) {
    %c0_i32 = arith.constant 0 : i32
    %c0_i32_0 = arith.constant 0 : i32
    %c0_i32_1 = arith.constant 0 : i32
    %c0_i32_2 = arith.constant 0 : i32
    return %c0_i32, %c0_i32_0, %c0_i32_1 : i32, i32, i32
  }
  func.func @transform_39(%arg0: i32) -> (i32, i32, i32) {
    %c0_i32 = arith.constant 0 : i32
    %c0_i32_0 = arith.constant 0 : i32
    %c0_i32_1 = arith.constant 0 : i32
    %c0_i32_2 = arith.constant 0 : i32
    return %c0_i32, %c0_i32_0, %c0_i32_1 : i32, i32, i32
  }
  func.func @transform_40(%arg0: i32) -> (i32, i32, i32) {
    %c0_i32 = arith.constant 0 : i32
    %c0_i32_0 = arith.constant 0 : i32
    %c0_i32_1 = arith.constant 0 : i32
    %c0_i32_2 = arith.constant 0 : i32
    return %c0_i32, %c0_i32_0, %c0_i32_1 : i32, i32, i32
  }
  func.func @transform_41(%arg0: i32) -> (i32, i32, i32) {
    %c0_i32 = arith.constant 0 : i32
    %c0_i32_0 = arith.constant 0 : i32
    %c0_i32_1 = arith.constant 0 : i32
    %c0_i32_2 = arith.constant 0 : i32
    return %c0_i32, %c0_i32_0, %c0_i32_1 : i32, i32, i32
  }
  func.func @transform_42(%arg0: i32) -> (i32, i32, i32) {
    %c0_i32 = arith.constant 0 : i32
    %c0_i32_0 = arith.constant 0 : i32
    %c0_i32_1 = arith.constant 0 : i32
    %c0_i32_2 = arith.constant 0 : i32
    return %c0_i32, %c0_i32_0, %c0_i32_1 : i32, i32, i32
  }
  func.func @transform_43(%arg0: i32) -> (i32, i32, i32) {
    %c0_i32 = arith.constant 0 : i32
    %c0_i32_0 = arith.constant 0 : i32
    %c0_i32_1 = arith.constant 0 : i32
    %c0_i32_2 = arith.constant 0 : i32
    return %c0_i32, %c0_i32_0, %c0_i32_1 : i32, i32, i32
  }
  func.func @transform_44(%arg0: i32) -> (i32, i32) {
    %c0_i32 = arith.constant 0 : i32
    %c0_i32_0 = arith.constant 0 : i32
    %c0_i32_1 = arith.constant 0 : i32
    return %c0_i32, %c0_i32_0 : i32, i32
  }
  func.func @transform_45(%arg0: i32) -> (i32, i32) {
    %c0_i32 = arith.constant 0 : i32
    %c0_i32_0 = arith.constant 0 : i32
    %c0_i32_1 = arith.constant 0 : i32
    return %c0_i32, %c0_i32_0 : i32, i32
  }
  func.func @transform_46(%arg0: i32) -> (i32, i32) {
    %c0_i32 = arith.constant 0 : i32
    %c0_i32_0 = arith.constant 0 : i32
    %c0_i32_1 = arith.constant 0 : i32
    return %c0_i32, %c0_i32_0 : i32, i32
  }
  func.func @transform_47(%arg0: i32) -> (i32, i32) {
    %c0_i32 = arith.constant 0 : i32
    %c0_i32_0 = arith.constant 0 : i32
    %c0_i32_1 = arith.constant 0 : i32
    return %c0_i32, %c0_i32_0 : i32, i32
  }
  func.func @transform_48(%arg0: i32) -> (i32, i32) {
    %c0_i32 = arith.constant 0 : i32
    %c0_i32_0 = arith.constant 0 : i32
    %c0_i32_1 = arith.constant 0 : i32
    return %c0_i32, %c0_i32_0 : i32, i32
  }
  func.func @transform_49(%arg0: i32) -> (i32, i32) {
    %c0_i32 = arith.constant 0 : i32
    %c0_i32_0 = arith.constant 0 : i32
    %c0_i32_1 = arith.constant 0 : i32
    return %c0_i32, %c0_i32_0 : i32, i32
  }
  func.func @transform_50(%arg0: i32) -> (i32, i32, i32) {
    %c0_i32 = arith.constant 0 : i32
    %c0_i32_0 = arith.constant 0 : i32
    %c0_i32_1 = arith.constant 0 : i32
    return %arg0, %c0_i32, %c0_i32_0 : i32, i32, i32
  }
}

</mosaic_0001>

<bundles_post_ra>
// kernel: saint_forward.2
= control target key start
LH: loop header
LB: loop body
LE: loop exit
PB: predicated region body
PF: predicated region fallthrough
CT: control target
= control target key end

     0   :  { %s1208_s25 = smov 0   ;;  %s1705_s0 = inlined_call_operand.vmem [shape: f32[2,16,768], index: 0, kind: input, shape index: {}]   ;;  %s1706_s1 = inlined_call_operand.vmem [shape: f32[1,768], index: 1, kind: input, shape index: {}]   ;;  %s1707_s2 = inlined_call_operand.vmem [shape: f32[1,768], index: 2, kind: input, shape index: {}]   ;;  %s1708_s3 = inlined_call_operand.vmem [shape: f32[768,32], index: 3, kind: input, shape index: {}]   ;;  %s1709_s4 = inlined_call_operand.vmem [shape: f32[1,32], index: 4, kind: input, shape index: {}]   ;;  %s1710_s5 = inlined_call_operand.vmem [shape: f32[8,16], index: 5, kind: input, shape index: {}]   ;;  %s1711_s6 = inlined_call_operand.vmem [shape: f32[8,1], index: 6, kind: input, shape index: {}]   ;;  %s1712_s7 = inlined_call_operand.vmem [shape: f32[2,8,32], index: 7, kind: input, shape index: {}]   ;;  %s1713_s8 = inlined_call_operand.vmem [shape: f32[2,8,32], index: 8, kind: input, shape index: {}]   ;;  %s1714_s9 = inlined_call_operand.vmem [shape: f32[8,32], index: 9, kind: input, shape index: {}]   ;;  %s1715_s10 = inlined_call_operand.vmem [shape: f32[64,32], index: 10, kind: input, shape index: {}]   ;;  %s1716_s11 = inlined_call_operand.vmem [shape: f32[1,32], index: 11, kind: input, shape index: {}]   ;;  %s1717_s12 = inlined_call_operand.vmem [shape: f32[2,8,32], index: 12, kind: output, shape index: {0}]   ;;  %s1718_s13 = inlined_call_operand.vmem [shape: f32[2,8,32], index: 13, kind: output, shape index: {1}]  }
   0x1 LB: > { %s1092_s26 = sadd.s32 4294967295, %s1134_s25   ;;  %p1096_p0 = scmp.ge.s32.totalorder %s1134_s25, 1  ;;  %s1134_s25 = sphi %s1208_s25, %s24_s25  }
   0x2   : > { %p408_p1 = scmp.lt.s32.totalorder %s1134_s25, 3 }
   0x4   : > { %p409_p2 = pnand %p1096_p0, %p408_p1 }
   0x5   : > { %p463_p3 = scmp.lt.s32.totalorder (!%p409_p2), %s1092_s26, 1 }
   0x6   : > { %412 = sbr.rel (%p409_p2) target bundleno = 735 (0x2df), region = 68 }
   0xb   : > { %s1720_s26 = smov (!%p463_p3, %s1092_s26), 1  ;;  %v1136_v22 = vmov 768.0   ;;  %v660_v27 = vld [vmem:[%s1708_s3 + $0x78] sm:$0xff]  ;;  %v659_v29 = vld [vmem:[%s1708_s3 + $0x70] sm:$0xff]  ;;  %v658_v32 = vld [vmem:[%s1708_s3 + $0x68] sm:$0xff]  ;;  %vm890_vm7 = vcmask 130048  }
   0xc   : > { %s1107_s27 = smul.u32 96, %s1720_s26  ;;  %1122 = vrcp.f32 %v1136_v22  ;;  %v676_v28 = vld [vmem:[%s1708_s3 + $0xf8] sm:$0xff]  ;;  %745 = vmatpush.msra.mxu0 %v660_v27  ;;  %v675_v31 = vld [vmem:[%s1708_s3 + $0xf0] sm:$0xff]  ;;  %v674_v33 = vld [vmem:[%s1708_s3 + $0xe8] sm:$0xff]  ;;  %s1098_s20 = sshll.u32 %s1720_s26, 3  ;;  %vm923_vm8 = vcmask 261120  }
   0xd   : > { %768 = vmatpush.msra.mxu1 %v676_v28  ;;  %v657_v34 = vld [vmem:[%s1708_s3 + $0x60] sm:$0xff]  ;;  %v692_v37 = vld [vmem:[%s1708_s3 + $0x178] sm:$0xff]  ;;  %v691_v41 = vld [vmem:[%s1708_s3 + $0x170] sm:$0xff]  ;;  %s471_s23 = scalar_lea.vmem %s1712_s7, %s1098_s20  ;;  %s475_s29 = scalar_lea.vmem %s1713_s8, %s1098_s20 }
   0xe   : > { %s467_s30 = scalar_lea.vmem %s1705_s0, %s1107_s27  ;;  %746 = vmatpush.msra.mxu0 %v659_v29  ;;  %v673_v35 = vld [vmem:[%s1708_s3 + $0xe0] sm:$0xff]  ;;  %v708_v38 = vld [vmem:[%s1708_s3 + $0x1f8] sm:$0xff]  ;;  %791 = vmatpush.msra.mxu2 %v692_v37  ;;  %v707_v43 = vld [vmem:[%s1708_s3 + $0x1f0] sm:$0xff]  ;;  %s479_s19 = scalar_lea.vmem %s1717_s12, %s1098_s20 }
   0xf   : > { %v1222_v0 = vld [vmem:[%s467_s30] sm:$0xff]  ;;  %v1224_v1 = vld [vmem:[%s467_s30 + $0x8] sm:$0xff]  ;;  %v1226_v2 = vld [vmem:[%s467_s30 + $0x10] sm:$0xff]  ;;  %769 = vmatpush.msra.mxu1 %v675_v31  ;;  %814 = vmatpush.msra.mxu3 %v708_v38 }
  0x10   : > { %v1228_v3 = vld [vmem:[%s467_s30 + $0x18] sm:$0xff]  ;;  %v496_v4 = vadd.f32 %v1224_v1, %v1222_v0  ;;  %v1232_v5 = vld [vmem:[%s467_s30 + $0x30] sm:$0xff]  ;;  %v1236_v7 = vld [vmem:[%s467_s30 + $0x40] sm:$0xff]  ;;  %747 = vmatpush.msra.mxu0 %v658_v32  ;;  %792 = vmatpush.msra.mxu2 %v691_v41 }
  0x11   : > { %v1234_v6 = vld [vmem:[%s467_s30 + $0x38] sm:$0xff]  ;;  %v1241_v10 = vld [vmem:[%s467_s30 + $0x20] sm:$0xff]  ;;  %v1243_v11 = vld [vmem:[%s467_s30 + $0x48] sm:$0xff]  ;;  %770 = vmatpush.msra.mxu1 %v674_v33  ;;  %815 = vmatpush.msra.mxu3 %v707_v43 }
  0x12   : > { %v497_v8 = vadd.f32 %v496_v4, %v1226_v2  ;;  %v503_v9 = vadd.f32 %v1234_v6, %v1232_v5  ;;  %v1247_v14 = vld [vmem:[%s467_s30 + $0x28] sm:$0xff]  ;;  %v1251_v17 = vld [vmem:[%s467_s30 + $0x50] sm:$0xff]  ;;  %v1255_v20 = vld [vmem:[%s467_s30 + $0x58] sm:$0xff]  ;;  %v1123_v23 = vpop.eup %1122  ;;  %748 = vmatpush.msra.mxu0 %v657_v34 }
  0x13   : > { %v511_v24 = vmul.f32 768.0, %v1123_v23  ;;  %vm515_vm0 = vweird.f32 %v1123_v23  ;;  %v656_v39 = vld [vmem:[%s1708_s3 + $0x58] sm:$0xff]  ;;  %771 = vmatpush.msra.mxu1 %v673_v35  ;;  %v655_v45 = vld [vmem:[%s1708_s3 + $0x50] sm:$0xff]  ;;  %v654_v50 = vld [vmem:[%s1708_s3 + $0x48] sm:$0xff] }
  0x14   : > { %v498_v12 = vadd.f32 %v497_v8, %v1228_v3  ;;  %v504_v13 = vadd.f32 %v503_v9, %v1236_v7  ;;  %v672_v40 = vld [vmem:[%s1708_s3 + $0xd8] sm:$0xff]  ;;  %v671_v46 = vld [vmem:[%s1708_s3 + $0xd0] sm:$0xff]  ;;  %749 = vmatpush.msra.mxu0 %v656_v39  ;;  %v670_v51 = vld [vmem:[%s1708_s3 + $0xc8] sm:$0xff] }
  0x15   : > { %v512_v25 = vsub.f32 1.0, %v511_v24  ;;  %772 = vmatpush.msra.mxu1 %v672_v40  ;;  %v653_v55 = vld [vmem:[%s1708_s3 + $0x40] sm:$0xff]  ;;  %v652_v60 = vld [vmem:[%s1708_s3 + $0x38] sm:$0xff]  ;;  %v690_v27 = vld [vmem:[%s1708_s3 + $0x168] sm:$0xff] }
  0x16   : > { %v499_v15 = vadd.f32 %v498_v12, %v1241_v10  ;;  %v505_v16 = vadd.f32 %v504_v13, %v1243_v11  ;;  %750 = vmatpush.msra.mxu0 %v655_v45  ;;  %v669_v56 = vld [vmem:[%s1708_s3 + $0xc0] sm:$0xff]  ;;  %v668_v61 = vld [vmem:[%s1708_s3 + $0xb8] sm:$0xff]  ;;  %v706_v28 = vld [vmem:[%s1708_s3 + $0x1e8] sm:$0xff]  ;;  %793 = vmatpush.msra.mxu2 %v690_v27 }
  0x17   : > { %v513_v26 = vmul.f32 %v1123_v23, %v512_v25  ;;  %773 = vmatpush.msra.mxu1 %v671_v46  ;;  %816 = vmatpush.msra.mxu3 %v706_v28  ;;  %v650_v29 = vld [vmem:[%s1708_s3 + $0x28] sm:$0xff]  ;;  %v689_v31 = vld [vmem:[%s1708_s3 + $0x160] sm:$0xff]  ;;  %v688_v35 = vld [vmem:[%s1708_s3 + $0x158] sm:$0xff] }
  0x18   : > { %v500_v18 = vadd.f32 %v499_v15, %v1247_v14  ;;  %v506_v19 = vadd.f32 %v505_v16, %v1251_v17  ;;  %751 = vmatpush.msra.mxu0 %v654_v50  ;;  %v705_v32 = vld [vmem:[%s1708_s3 + $0x1e0] sm:$0xff]  ;;  %794 = vmatpush.msra.mxu2 %v689_v31  ;;  %v704_v37 = vld [vmem:[%s1708_s3 + $0x1d8] sm:$0xff]  ;;  %v687_v40 = vld [vmem:[%s1708_s3 + $0x150] sm:$0xff] }
  0x19   : > { %v514_v30 = vadd.f32 %v1123_v23, %v513_v26  ;;  %774 = vmatpush.msra.mxu1 %v670_v51  ;;  %v651_v26 = vld [vmem:[%s1708_s3 + $0x30] sm:$0xff]  ;;  %817 = vmatpush.msra.mxu3 %v705_v32  ;;  %v649_v33 = vld [vmem:[%s1708_s3 + $0x20] sm:$0xff]  ;;  %v648_v38 = vld [vmem:[%s1708_s3 + $0x18] sm:$0xff] }
  0x1a   : > { %501 = vadd.xlane.f32.xlu0 %v500_v18  ;;  %v507_v21 = vadd.f32 %v506_v19, %v1255_v20  ;;  %752 = vmatpush.msra.mxu0 %v653_v55  ;;  %v665_v34 = vld [vmem:[%s1708_s3 + $0xa0] sm:$0xff]  ;;  %v664_v39 = vld [vmem:[%s1708_s3 + $0x98] sm:$0xff]  ;;  %v703_v41 = vld [vmem:[%s1708_s3 + $0x1d0] sm:$0xff] }
  0x1b   : > { %v1282_v36 = vsel %vm515_vm0, %v1123_v23, %v514_v30  ;;  %775 = vmatpush.msra.mxu1 %v669_v56  ;;  %v666_v30 = vld [vmem:[%s1708_s3 + $0xa8] sm:$0xff]  ;;  %795 = vmatpush.msra.mxu2 %v688_v35  ;;  %v663_v43 = vld [vmem:[%s1708_s3 + $0x90] sm:$0xff]  ;;  %v685_v51 = vld [vmem:[%s1708_s3 + $0x140] sm:$0xff] }
  0x1c   : > { %753 = vmatpush.msra.mxu0 %v652_v60  ;;  %818 = vmatpush.msra.mxu3 %v704_v37  ;;  %v702_v45 = vld [vmem:[%s1708_s3 + $0x1c8] sm:$0xff]  ;;  %v661_v55 = vld [vmem:[%s1708_s3 + $0x80] sm:$0xff]  ;;  %v684_v56 = vld [vmem:[%s1708_s3 + $0x138] sm:$0xff] }
  0x1d   : > { %776 = vmatpush.msra.mxu1 %v668_v61  ;;  %796 = vmatpush.msra.mxu2 %v687_v40  ;;  %v646_v46 = vld [vmem:[%s1708_s3 + $0x8] sm:$0xff]  ;;  %v740_v60 = vld [vmem:[%s1708_s3 + $0x2f8] sm:$0xff]  ;;  %v683_v61 = vld [vmem:[%s1708_s3 + $0x130] sm:$0xff] }
  0x1e   : > { %754 = vmatpush.msra.mxu0 %v651_v26  ;;  %819 = vmatpush.msra.mxu3 %v703_v41  ;;  %v662_v50 = vld [vmem:[%s1708_s3 + $0x88] sm:$0xff]  ;;  %v677_v28 = vld [vmem:[%s1708_s3 + $0x100] sm:$0xff]  ;;  %v716_v32 = vld [vmem:[%s1708_s3 + $0x238] sm:$0xff] }
  0x1f   : > { %v694_v26 = vld [vmem:[%s1708_s3 + $0x188] sm:$0xff]  ;;  %v733_v31 = vld [vmem:[%s1708_s3 + $0x2c0] sm:$0xff]  ;;  %v731_v35 = vld [vmem:[%s1708_s3 + $0x2b0] sm:$0xff] }
  0x20   : > { %755 = vmatpush.msra.mxu0 %v650_v29  ;;  %820 = vmatpush.msra.mxu3 %v702_v45  ;;  %v734_v27 = vld [vmem:[%s1708_s3 + $0x2c8] sm:$0xff]  ;;  %v693_v29 = vld [vmem:[%s1708_s3 + $0x180] sm:$0xff]  ;;  %v728_v45 = vld [vmem:[%s1708_s3 + $0x298] sm:$0xff] }
  0x21   : > { %v730_v40 = vld [vmem:[%s1708_s3 + $0x2a8] sm:$0xff] }
  0x22   : > { %508 = vadd.xlane.f32.xlu0 %v507_v21  ;;  %756 = vmatpush.msra.mxu0 %v649_v33  ;;  %v732_v33 = vld [vmem:[%s1708_s3 + $0x2b8] sm:$0xff] }
  0x24   : > { %757 = vmatpush.msra.mxu0 %v648_v38 }
  0x8d   : > { %v502_v42 = vpop.xlane.xlu0 %501 }
  0x8e   : > { %v517_v44 = vmul.f32 %v1282_v36, %v502_v42  ;;  %v647_v42 = vld [vmem:[%s1708_s3 + $0x10] sm:$0xff] }
  0x8f   : > { %758 = vmatpush.msra.mxu0 %v647_v42  ;;  %v713_v42 = vld [vmem:[%s1708_s3 + $0x220] sm:$0xff] }
  0x90   : > { %v1310_v47 = vsub.f32 %v1222_v0, %v517_v44  ;;  %v1313_v48 = vsub.f32 %v1224_v1, %v517_v44  ;;  %v1316_v49 = vsub.f32 %v1226_v2, %v517_v44  ;;  %v1325_v52 = vsub.f32 %v1228_v3, %v517_v44 }
  0x91   : > { %v1338_v57 = vsub.f32 %v1241_v10, %v517_v44  ;;  %v1349_v63 = vsub.f32 %v1247_v14, %v517_v44  ;;  %v686_v44 = vld [vmem:[%s1708_s3 + $0x148] sm:$0xff]  ;;  %759 = vmatpush.msra.mxu0 %v646_v46  ;;  %v711_v46 = vld [vmem:[%s1708_s3 + $0x210] sm:$0xff] }
  0x92   : > { %v531_v53 = vmul.f32 %v1310_v47, %v1310_v47  ;;  %v532_v54 = vmul.f32 %v1313_v48, %v1313_v48  ;;  %v533_v58 = vmul.f32 %v1316_v49, %v1316_v49  ;;  %v534_v1 = vmul.f32 %v1325_v52, %v1325_v52  ;;  %797 = vmatpush.msra.mxu2 %v686_v44  ;;  %v712_v44 = vld [vmem:[%s1708_s3 + $0x218] sm:$0xff] }
  0x93   : > { %v535_v3 = vmul.f32 %v1338_v57, %v1338_v57  ;;  %v536_v12 = vmul.f32 %v1349_v63, %v1349_v63 }
  0x94   : > { %v543_v59 = vadd.f32 %v532_v54, %v531_v53  ;;  %v701_v53 = vld [vmem:[%s1708_s3 + $0x1c0] sm:$0xff]  ;;  %798 = vmatpush.msra.mxu2 %v685_v51 }
  0x95   : > { %v509_v62 = vpop.xlane.xlu0 %508  ;;  %821 = vmatpush.msra.mxu3 %v701_v53  ;;  %v645_v54 = vld [vmem:[%s1708_s3] sm:$0xff] }
  0x96   : > { %v518_v0 = vmul.f32 %v1282_v36, %v509_v62  ;;  %v544_v2 = vadd.f32 %v543_v59, %v533_v58  ;;  %760 = vmatpush.msra.mxu0 %v645_v54  ;;  %v700_v58 = vld [vmem:[%s1708_s3 + $0x1b8] sm:$0xff]  ;;  %799 = vmatpush.msra.mxu2 %v684_v56  ;;  %v699_v62 = vld [vmem:[%s1708_s3 + $0x1b0] sm:$0xff]  ;;  %v710_v54 = vld [vmem:[%s1708_s3 + $0x208] sm:$0xff] }
  0x97   : > { %v724_v59 = vld [vmem:[%s1708_s3 + $0x278] sm:$0xff]  ;;  %822 = vmatpush.msra.mxu3 %v700_v58 }
  0x98   : > { %v545_v4 = vadd.f32 %v544_v2, %v534_v1  ;;  %v1357_v8 = vsub.f32 %v1232_v5, %v518_v0  ;;  %v1360_v9 = vsub.f32 %v1234_v6, %v518_v0  ;;  %v1363_v10 = vsub.f32 %v1236_v7, %v518_v0  ;;  %837 = vmatpush.msrb.mxu0 %v724_v59  ;;  %v739_v1 = vld [vmem:[%s1708_s3 + $0x2f0] sm:$0xff]  ;;  %v682_v2 = vld [vmem:[%s1708_s3 + $0x128] sm:$0xff]  ;;  %v709_v59 = vld [vmem:[%s1708_s3 + $0x200] sm:$0xff] }
  0x99   : > { %v1368_v14 = vsub.f32 %v1243_v11, %v518_v0  ;;  %v1375_v6 = vsub.f32 %v1251_v17, %v518_v0  ;;  %v1380_v19 = vsub.f32 %v1255_v20, %v518_v0  ;;  %v667_v20 = vld [vmem:[%s1708_s3 + $0xb0] sm:$0xff]  ;;  %800 = vmatpush.msra.mxu2 %v683_v61  ;;  %823 = vmatpush.msra.mxu3 %v699_v62 }
  0x9a   : > { %v546_v13 = vadd.f32 %v545_v4, %v535_v3  ;;  %v537_v15 = vmul.f32 %v1357_v8, %v1357_v8  ;;  %v538_v5 = vmul.f32 %v1360_v9, %v1360_v9  ;;  %v539_v7 = vmul.f32 %v1363_v10, %v1363_v10  ;;  %777 = vmatpush.msra.mxu1 %v667_v20  ;;  %v723_v0 = vld [vmem:[%s1708_s3 + $0x270] sm:$0xff]  ;;  %v698_v3 = vld [vmem:[%s1708_s3 + $0x1a8] sm:$0xff] }
  0x9b   : > { %v540_v11 = vmul.f32 %v1368_v14, %v1368_v14  ;;  %v541_v22 = vmul.f32 %v1375_v6, %v1375_v6  ;;  %v542_v17 = vmul.f32 %v1380_v19, %v1380_v19  ;;  %838 = vmatpush.msrb.mxu0 %v723_v0  ;;  %v722_v4 = vld [vmem:[%s1708_s3 + $0x268] sm:$0xff]  ;;  %801 = vmatpush.msra.mxu2 %v682_v2  ;;  %v1615_v0 = vld [vmem:[%s1706_s1] sm:$0x3f] }
  0x9c   : > { %v547_v16 = vadd.f32 %v546_v13, %v536_v12  ;;  %v550_v18 = vadd.f32 %v538_v5, %v537_v15  ;;  %778 = vmatpush.msra.mxu1 %v666_v30  ;;  %824 = vmatpush.msra.mxu3 %v698_v3  ;;  %v738_v12 = vld [vmem:[%s1708_s3 + $0x2e8] sm:$0xff]  ;;  %v681_v13 = vld [vmem:[%s1708_s3 + $0x120] sm:$0xff] }
  0x9d   : > { %839 = vmatpush.msrb.mxu0 %v722_v4  ;;  %v697_v15 = vld [vmem:[%s1708_s3 + $0x1a0] sm:$0xff]  ;;  %802 = vmatpush.msra.mxu2 %v681_v13  ;;  %v718_v20 = vld [vmem:[%s1708_s3 + $0x248] sm:$0xff]  ;;  %v595_v4 = vperm.slane %v1615_v0, 0 }
  0x9e   : > { %548 = vadd.xlane.f32.xlu1 %v547_v16  ;;  %v551_v21 = vadd.f32 %v550_v18, %v539_v7  ;;  %779 = vmatpush.msra.mxu1 %v665_v34  ;;  %v721_v5 = vld [vmem:[%s1708_s3 + $0x260] sm:$0xff]  ;;  %v680_v7 = vld [vmem:[%s1708_s3 + $0x118] sm:$0xff]  ;;  %v715_v34 = vld [vmem:[%s1708_s3 + $0x230] sm:$0xff] }
  0x9f   : > { %825 = vmatpush.msra.mxu3 %v697_v15  ;;  %v737_v16 = vld [vmem:[%s1708_s3 + $0x2e0] sm:$0xff]  ;;  %840 = vmatpush.msrb.mxu0 %v721_v5  ;;  %v696_v18 = vld [vmem:[%s1708_s3 + $0x198] sm:$0xff]  ;;  %v596_v15 = vperm.slane %v1615_v0, 1 }
  0xa0   : > { %v552_v23 = vadd.f32 %v551_v21, %v540_v11  ;;  %780 = vmatpush.msra.mxu1 %v664_v39  ;;  %v720_v11 = vld [vmem:[%s1708_s3 + $0x258] sm:$0xff]  ;;  %803 = vmatpush.msra.mxu2 %v680_v7  ;;  %v717_v30 = vld [vmem:[%s1708_s3 + $0x240] sm:$0xff]  ;;  %v714_v39 = vld [vmem:[%s1708_s3 + $0x228] sm:$0xff]  ;;  %v597_v7 = vperm.slane %v1615_v0, 2 }
  0xa1   : > { %826 = vmatpush.msra.mxu3 %v696_v18  ;;  %v736_v21 = vld [vmem:[%s1708_s3 + $0x2d8] sm:$0xff]  ;;  %841 = vmatpush.msrb.mxu0 %v720_v11  ;;  %v1620_v2 = vld [vmem:[%s1707_s2] sm:$0x3f]  ;;  %v598_v18 = vperm.slane %v1615_v0, 3 }
  0xa2   : > { %v553_v24 = vadd.f32 %v552_v23, %v541_v22  ;;  %781 = vmatpush.msra.mxu1 %v663_v43  ;;  %v679_v22 = vld [vmem:[%s1708_s3 + $0x110] sm:$0xff]  ;;  %v729_v43 = vld [vmem:[%s1708_s3 + $0x2a0] sm:$0xff]  ;;  %v621_v5 = vperm.slane %v1620_v2, 0 }
  0xa3   : > { %v695_v23 = vld [vmem:[%s1708_s3 + $0x190] sm:$0xff]  ;;  %804 = vmatpush.msra.mxu2 %v679_v22  ;;  %v623_v22 = vperm.slane %v1620_v2, 2 }
  0xa4   : > { %v554_v25 = vadd.f32 %v553_v24, %v542_v17  ;;  %782 = vmatpush.msra.mxu1 %v662_v50  ;;  %v719_v17 = vld [vmem:[%s1708_s3 + $0x250] sm:$0xff]  ;;  %827 = vmatpush.msra.mxu3 %v695_v23  ;;  %v624_v23 = vperm.slane %v1620_v2, 3 }
  0xa5   : > { %v735_v24 = vld [vmem:[%s1708_s3 + $0x2d0] sm:$0xff]  ;;  %842 = vmatpush.msrb.mxu0 %v719_v17 }
  0xa6   : > { %555 = vadd.xlane.f32.xlu1 %v554_v25  ;;  %783 = vmatpush.msra.mxu1 %v661_v55  ;;  %v678_v25 = vld [vmem:[%s1708_s3 + $0x108] sm:$0xff]  ;;  %v727_v50 = vld [vmem:[%s1708_s3 + $0x290] sm:$0xff] }
  0xa7   : > { %805 = vmatpush.msra.mxu2 %v678_v25  ;;  %828 = vmatpush.msra.mxu3 %v694_v26  ;;  %v726_v55 = vld [vmem:[%s1708_s3 + $0x288] sm:$0xff] }
  0xa8   : > { %860 = vmatpush.msrb.mxu1 %v740_v60  ;;  %843 = vmatpush.msrb.mxu0 %v718_v20 }
  0xa9   : > { %806 = vmatpush.msra.mxu2 %v677_v28  ;;  %829 = vmatpush.msra.mxu3 %v693_v29 }
  0xaa   : > { %861 = vmatpush.msrb.mxu1 %v739_v1  ;;  %844 = vmatpush.msrb.mxu0 %v717_v30 }
  0xac   : > { %862 = vmatpush.msrb.mxu1 %v738_v12  ;;  %845 = vmatpush.msrb.mxu0 %v716_v32 }
  0xae   : > { %863 = vmatpush.msrb.mxu1 %v737_v16  ;;  %846 = vmatpush.msrb.mxu0 %v715_v34  ;;  %v622_v16 = vperm.slane %v1620_v2, 1 }
  0xb0   : > { %864 = vmatpush.msrb.mxu1 %v736_v21  ;;  %847 = vmatpush.msrb.mxu0 %v714_v39 }
  0xb2   : > { %865 = vmatpush.msrb.mxu1 %v735_v24  ;;  %848 = vmatpush.msrb.mxu0 %v713_v42 }
  0xb4   : > { %866 = vmatpush.msrb.mxu1 %v734_v27  ;;  %849 = vmatpush.msrb.mxu0 %v712_v44  ;;  %v599_v44 = vperm.slane %v1615_v0, 4 }
  0xb6   : > { %867 = vmatpush.msrb.mxu1 %v733_v31  ;;  %850 = vmatpush.msrb.mxu0 %v711_v46  ;;  %v600_v46 = vperm.slane %v1615_v0, 5  ;;  %v884_v0 = vld [vmem:[%s1711_s6] sm:$0xff] }
  0xb8   : > { %868 = vmatpush.msrb.mxu1 %v732_v33  ;;  %851 = vmatpush.msrb.mxu0 %v710_v54 }
  0xba   : > { %869 = vmatpush.msrb.mxu1 %v731_v35  ;;  %852 = vmatpush.msrb.mxu0 %v709_v59 }
  0xbc   : > { %870 = vmatpush.msrb.mxu1 %v730_v40 }
  0xbe   : > { %871 = vmatpush.msrb.mxu1 %v729_v43 }
  0xc0   : > { %872 = vmatpush.msrb.mxu1 %v728_v45 }
  0xc2   : > { %873 = vmatpush.msrb.mxu1 %v727_v50 }
  0xc4   : > { %874 = vmatpush.msrb.mxu1 %v726_v55 }
 0x111   : > { %v549_v37 = vpop.xlane.xlu1 %548 }
 0x112   : > { %v557_v38 = vmul.f32 %v549_v37, %v1282_v36 }
 0x114   : > { %v559_v41 = vadd.f32 1e-12, %v557_v38 }
 0x116   : > { %1124 = vrsqrt.f32 %v559_v41  ;;  %vm567_vm2 = vweird.f32 %v559_v41 }
 0x119   : > { %v556_v51 = vpop.xlane.xlu1 %555 }
 0x11a   : > { %v558_v53 = vmul.f32 %v556_v51, %v1282_v36  ;;  %v725_v36 = vld [vmem:[%s1708_s3 + $0x280] sm:$0xff] }
 0x11b   : > { %875 = vmatpush.msrb.mxu1 %v725_v36 }
 0x11c   : > { %v1125_v56 = vpop.eup %1124  ;;  %v560_v58 = vadd.f32 1e-12, %v558_v53 }
 0x11d   : > { %v562_v60 = vmul.f32 %v1125_v56, %v559_v41  ;;  %vm568_vm1 = vweird.f32 %v1125_v56 }
 0x11e   : > { %1126 = vrsqrt.f32 %v560_v58  ;;  %vm569_vm3 = vmor %vm567_vm2, %vm568_vm1  ;;  %vm577_vm5 = vweird.f32 %v560_v58 }
 0x11f   : > { %v563_v61 = vmul.f32 %v1125_v56, %v562_v60 }
 0x121   : > { %v564_v62 = vmul.f32 0.5, %v563_v61 }
 0x123   : > { %v565_v1 = vsub.f32 1.5, %v564_v62 }
 0x124   : > { %v1127_v3 = vpop.eup %1126 }
 0x125   : > { %v566_v12 = vmul.f32 %v1125_v56, %v565_v1  ;;  %v572_v13 = vmul.f32 %v1127_v3, %v560_v58  ;;  %vm578_vm4 = vweird.f32 %v1127_v3  ;;  %v1137_v1 = vmov 0  }
 0x126   : > { %vm579_vm6 = vmor %vm577_vm5, %vm578_vm4  ;;  %1118 = vset.pattern.permute.xlu2 %v1137_v1  ;;  %1119 = vset.pattern.permute.xlu0 %v1137_v1 }
 0x127   : > { %v570_v11 = vsel %vm569_vm3, %v1125_v56, %v566_v12  ;;  %v573_v21 = vmul.f32 %v1127_v3, %v572_v13  ;;  %887 = vperm.xlu2 %1118, %v884_v0  }
 0x128   : > { %v581_v17 = vmul.f32 %v570_v11, %v1310_v47  ;;  %v582_v24 = vmul.f32 %v570_v11, %v1313_v48  ;;  %v583_v25 = vmul.f32 %v570_v11, %v1316_v49  ;;  %v584_v26 = vmul.f32 %v570_v11, %v1325_v52 }
 0x129   : > { %v574_v20 = vmul.f32 0.5, %v573_v21  ;;  %v585_v43 = vmul.f32 %v570_v11, %v1338_v57  ;;  %v586_v45 = vmul.f32 %v570_v11, %v1349_v63  ;;  %v626_v57 = vperm.slane %v1620_v2, 5 }
 0x12a   : > { %v607_v27 = vmul.f32 %v595_v4, %v581_v17  ;;  %v608_v28 = vmul.f32 %v596_v15, %v582_v24  ;;  %v609_v29 = vmul.f32 %v597_v7, %v583_v25  ;;  %v610_v30 = vmul.f32 %v598_v18, %v584_v26 }
 0x12b   : > { %v575_v31 = vsub.f32 1.5, %v574_v20  ;;  %v612_v53 = vmul.f32 %v600_v46, %v586_v45 }
 0x12c   : > { %v633_v32 = vadd.f32 %v621_v5, %v607_v27  ;;  %v634_v33 = vadd.f32 %v622_v16, %v608_v28  ;;  %v635_v34 = vadd.f32 %v623_v22, %v609_v29  ;;  %v636_v35 = vadd.f32 %v624_v23, %v610_v30 }
 0x12d   : > { %v576_v37 = vmul.f32 %v1127_v3, %v575_v31  ;;  %v638_v55 = vadd.f32 %v626_v57, %v612_v53 }
 0x12e   : > { %761 = vmatmul.f32.vlgmr.msra.gmra.mxu0 %v633_v32  ;;  %784 = vmatmul.f32.vlgmr.msra.gmra.mxu1 %v634_v33  ;;  %v883_v33 = vld [vmem:[%s1710_s5] sm:$0xff] }
 0x12f   : > { %v580_v47 = vsel %vm579_vm6, %v1127_v3, %v576_v37  ;;  %807 = vmatmul.f32.vlgmr.msra.gmra.mxu2 %v635_v34  ;;  %830 = vmatmul.f32.vlgmr.msra.gmra.mxu3 %v636_v35  ;;  %v919_v3 = vld [vmem:[%s1715_s10 + $0x20] sm:$0xff]  ;;  %v918_v34 = vld [vmem:[%s1715_s10 + $0x18] sm:$0xff]  ;;  %v917_v35 = vld [vmem:[%s1715_s10 + $0x10] sm:$0xff] }
 0x130   : > { %v587_v48 = vmul.f32 %v580_v47, %v1357_v8  ;;  %v588_v49 = vmul.f32 %v580_v47, %v1360_v9  ;;  %v589_v52 = vmul.f32 %v580_v47, %v1363_v10  ;;  %v590_v38 = vmul.f32 %v580_v47, %v1368_v14  ;;  %v916_v37 = vld [vmem:[%s1715_s10 + $0x8] sm:$0xff] }
 0x131   : > { %v611_v10 = vmul.f32 %v599_v44, %v585_v43  ;;  %v625_v14 = vperm.slane %v1620_v2, 4  ;;  %v591_v63 = vmul.f32 %v580_v47, %v1375_v6  ;;  %v592_v56 = vmul.f32 %v580_v47, %v1380_v19  ;;  %v922_v6 = vld [vmem:[%s1715_s10 + $0x38] sm:$0xff]  ;;  %v921_v19 = vld [vmem:[%s1715_s10 + $0x30] sm:$0xff]  ;;  %v920_v2 = vld [vmem:[%s1715_s10 + $0x28] sm:$0xff] }
 0x132   : > { %v613_v39 = vmul.f32 %v595_v4, %v587_v48  ;;  %v614_v40 = vmul.f32 %v596_v15, %v588_v49  ;;  %v615_v41 = vmul.f32 %v597_v7, %v589_v52  ;;  %v616_v42 = vmul.f32 %v598_v18, %v590_v38  ;;  %939 = vmatpush.msrb.mxu3 %v922_v6  ;;  %v1120_v15 = vld [vmem:[%s1709_s4] ss:$0 sm:$0xff] }
 0x133   : > { %v637_v54 = vadd.f32 %v625_v14, %v611_v10  ;;  %v617_v58 = vmul.f32 %v599_v44, %v591_v63  ;;  %v618_v59 = vmul.f32 %v600_v46, %v592_v56  ;;  %v915_v47 = vld [vmem:[%s1715_s10] sm:$0xff] }
 0x134   : > { %v639_v50 = vadd.f32 %v621_v5, %v613_v39  ;;  %v640_v8 = vadd.f32 %v622_v16, %v614_v40  ;;  %v641_v51 = vadd.f32 %v623_v22, %v615_v41  ;;  %v642_v9 = vadd.f32 %v624_v23, %v616_v42  ;;  %940 = vmatpush.msrb.mxu3 %v921_v19  ;;  %v914_v48 = vld [vmem:[%s471_s23] sm:$0xff]  ;;  %s483_s23 = scalar_lea.vmem %s1718_s13, %s1098_s20 }
 0x135   : > { %v643_v36 = vadd.f32 %v625_v14, %v617_v58  ;;  %v644_v60 = vadd.f32 %v626_v57, %v618_v59  ;;  %v1121_v40 = vld [vmem:[%s1716_s11] ss:$0 sm:$0xff] }
 0x136   : > { %764 = vmatmul.f32.gmra.mxu0 %v639_v50  ;;  %787 = vmatmul.f32.gmra.mxu1 %v640_v8  ;;  %v976_v41 = vld [vmem:[%s1714_s9] sm:$0xff] }
 0x137   : > { %810 = vmatmul.f32.gmra.mxu2 %v641_v51  ;;  %833 = vmatmul.f32.gmra.mxu3 %v642_v9  ;;  %v980_v43 = vld [vmem:[%s475_s29] sm:$0xff]  ;;  %v977_v45 = vadd.f32 %v976_v41, %v914_v48 }
 0x138   : > { %941 = vmatpush.msrb.mxu3 %v920_v2  ;;  %v981_v50 = vadd.f32 %v980_v43, %v976_v41 }
 0x13a   : > { %942 = vmatpush.msrb.mxu3 %v919_v3 }
 0x13e   : > { %853 = vmatmul.f32.vlgmr.msrb.gmra.mxu0 %v637_v54  ;;  %876 = vmatmul.f32.vlgmr.msrb.gmra.mxu1 %v638_v55 }
 0x146   : > { %856 = vmatmul.f32.gmra.mxu0 %v643_v36  ;;  %879 = vmatmul.f32.gmra.mxu1 %v644_v60 }
 0x181   : > { %v888_v49 = vpop.permute.xlu2 %887 }
 0x1ab   : > { %v762_v61 = vpop.f32.mrf.mxu0  ;;  %v785_v62 = vpop.f32.mrf.mxu1 }
 0x1ac   : > { %v763_v16 = vadd.f32 %v1120_v15, %v762_v61 }
 0x1ae   : > { %v786_v22 = vadd.f32 %v785_v62, %v763_v16 }
 0x1b2   : > { %v808_v4 = vpop.f32.mrf.mxu2  ;;  %v831_v5 = vpop.f32.mrf.mxu3 }
 0x1b3   : > { %v765_v12 = vpop.f32.mrf.mxu0  ;;  %v788_v13 = vpop.f32.mrf.mxu1  ;;  %v809_v17 = vadd.f32 %v808_v4, %v786_v22 }
 0x1b4   : > { %v766_v7 = vadd.f32 %v1120_v15, %v765_v12 }
 0x1b5   : > { %v832_v26 = vadd.f32 %v831_v5, %v809_v17 }
 0x1b6   : > { %v789_v23 = vadd.f32 %v788_v13, %v766_v7 }
 0x1ba   : > { %v811_v18 = vpop.f32.mrf.mxu2  ;;  %v834_v25 = vpop.f32.mrf.mxu3 }
 0x1bb   : > { %v854_v11 = vpop.f32.mrf.mxu0  ;;  %v877_v21 = vpop.f32.mrf.mxu1  ;;  %v812_v24 = vadd.f32 %v811_v18, %v789_v23 }
 0x1bc   : > { %v855_v28 = vadd.f32 %v854_v11, %v832_v26 }
 0x1bd   : > { %v835_v20 = vadd.f32 %v834_v25, %v812_v24 }
 0x1be   : > { %v878_v32 = vadd.f32 %v877_v21, %v855_v28 }
 0x1c3   : > { %v857_v27 = vpop.f32.mrf.mxu0  ;;  %v880_v30 = vpop.f32.mrf.mxu1 }
 0x1c4   : > { %v858_v29 = vadd.f32 %v857_v27, %v835_v20 }
 0x1c6   : > { %v881_v31 = vadd.f32 %v880_v30, %v858_v29 }
 0x1c8   : > { %908 = vmatpush.msrb.mxu2 %v881_v31 }
 0x1ca   : > { %909 = vmatpush.msrb.mxu2 %v878_v32 }
 0x1cb   : > { %1102 = vmatmul.msk.f32.vlgmr.msrb.gmra.mxu2 %vm890_vm7, %v883_v33 }
 0x1cc   : > { %962 = vmatpush.msra.mxu2 %v918_v34 }
 0x1ce   : > { %963 = vmatpush.msra.mxu2 %v917_v35 }
 0x1d0   : > { %964 = vmatpush.msra.mxu2 %v916_v37 }
 0x1d2   : > { %965 = vmatpush.msra.mxu2 %v915_v47 }
 0x1d3   : > { %1104 = vmatmul.msk.f32.vlgmr.msra.gmra.mxu2 %vm923_vm8, %v914_v48 }
 0x24e   : > { %v911_v52 = vpop.f32.mrf.mxu2 }
 0x24f   : > { %v912_v38 = vadd.f32 %v911_v52, %v888_v49 }
 0x251   : > { %1103 = vmatmul.msk.f32.vlgmr.msrb.gmra.mxu3 %vm923_vm8, %v912_v38 }
 0x256   : > { %v967_v39 = vpop.f32.mrf.mxu2 }
 0x2d4   : > { %v944_v42 = vpop.f32.mrf.mxu3 }
 0x2d5   : > { %v968_v44 = vadd.f32 %v967_v39, %v944_v42 }
 0x2d7   : > { %v974_v46 = vadd.f32 %v1121_v40, %v968_v44 }
 0x2d9   : > { %v975_v8 = vmax.f32 %v974_v46, 0.0 }
 0x2db   : > { %v978_v51 = vadd.f32 %v977_v45, %v975_v8  ;;  %v982_v9 = vadd.f32 %v981_v50, %v975_v8 }
 0x2dd   : > { %979 = vst.msk [vmem:[%s479_s19] sm:$0xff] %vm923_vm8, %v978_v51 }
 0x2de   : > { %983 = vst.msk [vmem:[%s483_s23] sm:$0xff] %vm923_vm8, %v982_v9 }
 0x2df PF: > { %s24_s25 = sadd.s32 1, %s1134_s25  }
 0x2e0   : > { %p21_p4 = scmp.ge.s32.totalorder %s24_s25, 4  }
 0x2e2   :  { %23 = sbr.rel (!%p21_p4) target bundleno = 1 (0x1), region = 116 }

// kernel: saint_forward.3
= control target key start
LH: loop header
LB: loop body
LE: loop exit
PB: predicated region body
PF: predicated region fallthrough
CT: control target
= control target key end

     0   :  { %s4627_s6 = smov 1   ;;  %s4628_s10 = smov 2   ;;  %s5417_s0 = inlined_call_operand.smem [shape: u32[51], index: -1, kind: input, shape index: {}] }
   0x1   :  { %s4687_s5 = sld [smem:[%s5417_s0]]   ;;  %s4629_s14 = smov 3  }
   0x2   :  { %s4692_s9 = sld [smem:[%s5417_s0 + %s4627_s6]]   ;;  %s4630_s18 = smov 4  }
   0x3   :  { %s4697_s13 = sld [smem:[%s5417_s0 + %s4628_s10]]   ;;  %s4631_s22 = smov 5  }
   0x4   :  { %s4702_s17 = sld [smem:[%s5417_s0 + %s4629_s14]]   ;;  %s4632_s26 = smov 6  }
   0x5   :  { %s4707_s21 = sld [smem:[%s5417_s0 + %s4630_s18]]   ;;  %s4633_s30 = smov 7  }
   0x6   :  { %s4712_s25 = sld [smem:[%s5417_s0 + %s4631_s22]]   ;;  %s4634_s4 = smov 8  }
   0x7   :  { %s4717_s29 = sld [smem:[%s5417_s0 + %s4632_s26]]   ;;  %s4635_s10 = smov 9  }
   0x8   :  { %s4722_s3 = sld [smem:[%s5417_s0 + %s4633_s30]]   ;;  %s4636_s15 = smov 10  }
   0x9   :  { %s4727_s8 = sld [smem:[%s5417_s0 + %s4634_s4]]   ;;  %s4637_s20 = smov 11  }
   0xa   :  { %s4732_s14 = sld [smem:[%s5417_s0 + %s4635_s10]]   ;;  %s4638_s26 = smov 12  }
   0xb   :  { %s4737_s19 = sld [smem:[%s5417_s0 + %s4636_s15]]   ;;  %s4639_s1 = smov 13  }
   0xc   :  { %s4742_s24 = sld [smem:[%s5417_s0 + %s4637_s20]]   ;;  %s4640_s7 = smov 14  }
   0xd   :  { %s4747_s30 = sld [smem:[%s5417_s0 + %s4638_s26]]   ;;  %s4641_s15 = smov 15  }
   0xe   :  { %5438 = sst [smem:[#allocation3_spill]] %s4722_s3  ;;  %s4642_s22 = smov 16  }
   0xf   :  { %s4752_s6 = sld [smem:[%s5417_s0 + %s4639_s1]]   ;;  %s4643_s28 = smov 17  }
  0x10   :  { %s4757_s12 = sld [smem:[%s5417_s0 + %s4640_s7]]   ;;  %s4644_s7 = smov 18  }
  0x11   :  { %5439 = sst [smem:[#allocation4_spill]] %s4737_s19  ;;  %s4676_s10 = smov 50  }
  0x12   :  { %5440 = sst [smem:[#allocation5_spill]] %s4742_s24 }
  0x13   :  { %5441 = sst [smem:[#allocation6_spill]] %s4747_s30 }
  0x14   :  { %s4762_s20 = sld [smem:[%s5417_s0 + %s4641_s15]]   ;;  %s4645_s15 = smov 19  }
  0x15   :  { %5442 = sst [smem:[#allocation7_spill]] %s4752_s6 }
  0x16   :  { %5443 = sst [smem:[#allocation8_spill]] %s4757_s12 }
  0x17   :  { %s4767_s27 = sld [smem:[%s5417_s0 + %s4642_s22]]   ;;  %s4646_s22 = smov 20  }
  0x18   :  { %s4772_s4 = sld [smem:[%s5417_s0 + %s4643_s28]]   ;;  %s4647_s28 = smov 21  }
  0x19   :  { %s4777_s6 = sld [smem:[%s5417_s0 + %s4644_s7]]   ;;  %s4648_s7 = smov 22  }
  0x1a   :  { %5444 = sst [smem:[#allocation9_spill]] %s4762_s20 }
  0x1b   :  { %s4782_s20 = sld [smem:[%s5417_s0 + %s4645_s15]]   ;;  %s4649_s15 = smov 23  }
  0x1c   :  { %s4797_s12 = sld [smem:[%s5417_s0 + %s4648_s7]]   ;;  %s4652_s7 = smov 26  }
  0x1d   :  { %5445 = sst [smem:[#allocation10_spill]] %s4767_s27 }
  0x1e   :  { %5446 = sst [smem:[#allocation11_spill]] %s4772_s4 }
  0x1f   :  { %s4787_s27 = sld [smem:[%s5417_s0 + %s4646_s22]]   ;;  %s4650_s22 = smov 24  }
  0x20   :  { %s4792_s4 = sld [smem:[%s5417_s0 + %s4647_s28]]   ;;  %s4651_s28 = smov 25  }
  0x21   :  { %s4802_s24 = sld [smem:[%s5417_s0 + %s4649_s15]]   ;;  %s4653_s15 = smov 27  }
  0x22   :  { %5448 = sst [smem:[#allocation13_spill]] %s4797_s12 }
  0x23   :  { %s4807_s19 = sld [smem:[%s5417_s0 + %s4650_s22]]   ;;  %s4654_s22 = smov 28  }
  0x24   :  { %s4812_s30 = sld [smem:[%s5417_s0 + %s4651_s28]]   ;;  %s4655_s28 = smov 29  }
  0x25   :  { %s4817_s12 = sld [smem:[%s5417_s0 + %s4652_s7]]   ;;  %s4656_s7 = smov 30  }
  0x26   :  { %5447 = sst [smem:[#allocation12_spill]] %s4792_s4 }
  0x27   :  { %5449 = sst [smem:[#allocation14_spill]] %s4802_s24 }
  0x28   :  { %s4822_s24 = sld [smem:[%s5417_s0 + %s4653_s15]]   ;;  %s4657_s15 = smov 31  }
  0x29   :  { %5450 = sst [smem:[#allocation15_spill]] %s4807_s19 }
  0x2a   :  { %5451 = sst [smem:[#allocation16_spill]] %s4812_s30 }
  0x2b   :  { %5452 = sst [smem:[#allocation17_spill]] %s4817_s12 }
  0x2c   :  { %s4827_s19 = sld [smem:[%s5417_s0 + %s4654_s22]]   ;;  %s4658_s22 = smov 32  }
  0x2d   :  { %s4832_s30 = sld [smem:[%s5417_s0 + %s4655_s28]]   ;;  %s4659_s28 = smov 33  }
  0x2e   :  { %5453 = sst [smem:[#allocation18_spill]] %s4822_s24 }
  0x2f   :  { %s4837_s12 = sld [smem:[%s5417_s0 + %s4656_s7]]   ;;  %s4660_s7 = smov 34  }
  0x30   :  { %s4842_s24 = sld [smem:[%s5417_s0 + %s4657_s15]]   ;;  %s4661_s15 = smov 35  }
  0x32   :  { %5454 = sst [smem:[#allocation19_spill]] %s4827_s19 }
  0x33   :  { %5455 = sst [smem:[#allocation20_spill]] %s4832_s30 }
  0x34   :  { %s4847_s19 = sld [smem:[%s5417_s0 + %s4658_s22]]   ;;  %s4662_s22 = smov 36  }
  0x35   :  { %5456 = sst [smem:[#allocation21_spill]] %s4837_s12 }
  0x36   :  { %5457 = sst [smem:[#allocation22_spill]] %s4842_s24 }
  0x37   :  { %s4852_s30 = sld [smem:[%s5417_s0 + %s4659_s28]]   ;;  %s4663_s28 = smov 37  }
  0x38   :  { %s4857_s12 = sld [smem:[%s5417_s0 + %s4660_s7]]   ;;  %s4664_s7 = smov 38  }
  0x39   :  { %s4862_s24 = sld [smem:[%s5417_s0 + %s4661_s15]]   ;;  %s4665_s15 = smov 39  }
  0x3a   :  { %5458 = sst [smem:[#allocation23_spill]] %s4847_s19 }
  0x3b   :  { %s4867_s19 = sld [smem:[%s5417_s0 + %s4662_s22]]   ;;  %s4666_s22 = smov 40  }
  0x3d   :  { %5459 = sst [smem:[#allocation24_spill]] %s4852_s30 }
  0x3e   :  { %5460 = sst [smem:[#allocation25_spill]] %s4857_s12 }
  0x3f   :  { %5461 = sst [smem:[#allocation26_spill]] %s4862_s24 }
  0x40   :  { %s4872_s30 = sld [smem:[%s5417_s0 + %s4663_s28]]   ;;  %s4667_s28 = smov 41  }
  0x41   :  { %5462 = sst [smem:[#allocation27_spill]] %s4867_s19 }
  0x42   :  { %s4877_s12 = sld [smem:[%s5417_s0 + %s4664_s7]]   ;;  %s4668_s7 = smov 42  }
  0x43   :  { %s4882_s24 = sld [smem:[%s5417_s0 + %s4665_s15]]   ;;  %s4669_s15 = smov 43  }
  0x44   :  { %s4887_s19 = sld [smem:[%s5417_s0 + %s4666_s22]]   ;;  %s4670_s22 = smov 44  }
  0x46   :  { %5463 = sst [smem:[#allocation28_spill]] %s4872_s30 }
  0x47   :  { %s4892_s30 = sld [smem:[%s5417_s0 + %s4667_s28]]   ;;  %s4671_s28 = smov 45  }
  0x48   :  { %5464 = sst [smem:[#allocation29_spill]] %s4877_s12 }
  0x49   :  { %5465 = sst [smem:[#allocation30_spill]] %s4882_s24 }
  0x4a   :  { %5466 = sst [smem:[#allocation31_spill]] %s4887_s19 }
  0x4b   :  { %s4897_s12 = sld [smem:[%s5417_s0 + %s4668_s7]]   ;;  %s4672_s7 = smov 46  }
  0x4c   :  { %s4902_s24 = sld [smem:[%s5417_s0 + %s4669_s15]]   ;;  %s4673_s15 = smov 47  }
  0x4d   :  { %5467 = sst [smem:[#allocation32_spill]] %s4892_s30 }
  0x4e   :  { %s4907_s19 = sld [smem:[%s5417_s0 + %s4670_s22]]   ;;  %s4674_s22 = smov 48  }
  0x4f   :  { %s4912_s30 = sld [smem:[%s5417_s0 + %s4671_s28]]   ;;  %s4675_s28 = smov 49  }
  0x51   :  { %5468 = sst [smem:[#allocation33_spill]] %s4897_s12 }
  0x52   :  { %5469 = sst [smem:[#allocation34_spill]] %s4902_s24 }
  0x53   :  { %s4917_s12 = sld [smem:[%s5417_s0 + %s4672_s7]]  }
  0x54   :  { %5470 = sst [smem:[#allocation35_spill]] %s4907_s19 }
  0x55   :  { %5471 = sst [smem:[#allocation36_spill]] %s4912_s30 }
  0x56   :  { %s4922_s24 = sld [smem:[%s5417_s0 + %s4673_s15]]   ;;  %s4937_s15 = smov 0  }
  0x57   :  { %s4927_s19 = sld [smem:[%s5417_s0 + %s4674_s22]]  }
  0x58   :  { %s4187_s30 = sld [smem:[%s5417_s0 + %s4675_s28]]  }
  0x59   :  { %5472 = sst [smem:[#allocation37_spill]] %s4917_s12 }
  0x5a   :  { %s4935_s12 = sld [smem:[%s5417_s0 + %s4676_s10]]  }
  0x5e   :  { %v106_v0 = vstv %s4187_s30 }
  0x5f   :  { %107 = vst [vmem:[#allocation2] sm:$0x1] %v106_v0 }
  0x60 LB: > { %s5473_s4 = sld [smem:[#allocation12_spill]]  ;;  %s4189_s16 = sadd.s32 4294967295, %s4625_s15   ;;  %s4625_s15 = sphi %s4937_s15, %s113_s15  }
  0x61   : > { %s5474_s3 = sld [smem:[#allocation3_spill]]  ;;  %p4193_p0 = scmp.ge.s32.totalorder %s4625_s15, 1 }
  0x62   : > { %p1373_p1 = scmp.lt.s32.totalorder %s4625_s15, 3 }
  0x64   : > { %p1374_p2 = pnand %p4193_p0, %p1373_p1 }
  0x65   : > { %p1493_p3 = scmp.lt.s32.totalorder (!%p1374_p2), %s4189_s16, 1  ;;  %s5475_s22 = sld [smem:[#allocation6_spill]] (!%p1374_p2) }
  0x66   : > { %1377 = sbr.rel (%p1374_p2) target bundleno = 8329 (0x2089), region = 220  ;;  %s5476_s23 = sld [smem:[#allocation13_spill]] (!%p1374_p2) }
  0x67   : > { %s5477_s26 = sld [smem:[#allocation4_spill]] (!%p1374_p2) }
  0x68   : > { %s5478_s28 = sld [smem:[#allocation5_spill]] (!%p1374_p2) }
  0x69   : > { %s5479_s1 = sld [smem:[#allocation8_spill]] (!%p1374_p2) }
  0x6a   : > { %s5480_s2 = sld [smem:[#allocation7_spill]] (!%p1374_p2) }
  0x6b   : > { %v1548_v1 = vld [vmem:[%s4707_s21 + $0x18] sm:$0xff]  ;;  %v1547_v2 = vld [vmem:[%s4707_s21 + $0x10] sm:$0xff]  ;;  %v1546_v5 = vld [vmem:[%s4707_s21 + $0x8] sm:$0xff]  ;;  %s5509_s16 = smov (!%p1493_p3, %s4189_s16), 1  ;;  %vm1521_vm0 = vcmask 261120   ;;  %vm1601_vm1 = vcmask 64512   ;;  %v1505_v19 = vlaneseq }
  0x6c   : > { %v1516_v3 = vld [vmem:[%s4697_s13 + $0x18] sm:$0xff]  ;;  %1565 = vmatpush.msra.mxu1 %v1548_v1  ;;  %v1515_v4 = vld [vmem:[%s4697_s13 + $0x10] sm:$0xff]  ;;  %v1514_v6 = vld [vmem:[%s4697_s13 + $0x8] sm:$0xff]  ;;  %s4952_s0 = sshll.u32 %s5509_s16, 3  ;;  %v4677_v23 = vmov -1e+09  }
  0x6d   : > { %1537 = vmatpush.msra.mxu0 %v1516_v3  ;;  %v1545_v7 = vld [vmem:[%s4707_s21] sm:$0xff]  ;;  %s1496_s30 = scalar_lea.vmem %s4687_s5, %s4952_s0  ;;  %v1576_v16 = vld [vmem:[%s4717_s29 + $0x18] sm:$0xff]  ;;  %v1575_v17 = vld [vmem:[%s4717_s29 + $0x10] sm:$0xff]  ;;  %v1506_v20 = vshrl.u32 %v1505_v19, 7  ;;  %v1508_v21 = vand.u32 127, %v1505_v19  ;;  %s1500_s18 = scalar_lea.vmem %s4692_s9, %s4952_s0  ;;  %vm2309_vm7 = vcmask 523264  }
  0x6e   : > { %1566 = vmatpush.msra.mxu1 %v1547_v2  ;;  %v1513_v8 = vld [vmem:[%s4697_s13] sm:$0xff]  ;;  %1593 = vmatpush.msra.mxu2 %v1576_v16  ;;  %v1574_v18 = vld [vmem:[%s4717_s29 + $0x8] sm:$0xff]  ;;  %v4212_v29 = vld [vmem:[%s4707_s21 + $0x38] sm:$0xff]  ;;  %s5481_s10 = sld [smem:[#allocation14_spill]] }
  0x6f   : > { %1538 = vmatpush.msra.mxu0 %v1515_v4  ;;  %v4957_v9 = vld [vmem:[%s1496_s30] sm:$0xff]  ;;  %vm1509_vm2 = vcmp.ge.s32.totalorder %v1506_v20, %v1508_v21  ;;  %v4211_v30 = vld [vmem:[%s4707_s21 + $0x30] sm:$0xff]  ;;  %v4206_v31 = vld [vmem:[%s4697_s13 + $0x38] sm:$0xff]  ;;  %s5482_s7 = sld [smem:[#allocation15_spill]] }
  0x70   : > { %1567 = vmatpush.msra.mxu1 %v1546_v5  ;;  %v4493_v10 = vld [vmem:[%s4712_s25] ss:$0 sm:$0xff]  ;;  %1594 = vmatpush.msra.mxu2 %v1575_v17  ;;  %v4970_v24 = vsel %vm1509_vm2, 0.0, %v4677_v23  ;;  %v4205_v32 = vld [vmem:[%s4697_s13 + $0x30] sm:$0xff]  ;;  %v4210_v33 = vld [vmem:[%s4707_s21 + $0x28] sm:$0xff]  ;;  %s5483_s11 = sld [smem:[#allocation9_spill]] }
  0x71   : > { %1539 = vmatpush.msra.mxu0 %v1514_v6  ;;  %v4494_v11 = vld [vmem:[%s4702_s17] ss:$0 sm:$0xff]  ;;  %v4204_v35 = vld [vmem:[%s4697_s13 + $0x28] sm:$0xff]  ;;  %v4496_v45 = vld [vmem:[%s4712_s25 + $0x1] ss:$0 sm:$0xff]  ;;  %s5484_s16 = sld [smem:[#allocation10_spill]] }
  0x72   : > { %1568 = vmatpush.msra.mxu1 %v1545_v7  ;;  %1595 = vmatpush.msra.mxu2 %v1574_v18  ;;  %v1573_v28 = vld [vmem:[%s4717_s29] sm:$0xff]  ;;  %v4218_v48 = vld [vmem:[%s4717_s29 + $0x38] sm:$0xff]  ;;  %v4217_v49 = vld [vmem:[%s4717_s29 + $0x30] sm:$0xff]  ;;  %s5485_s30 = sld [smem:[#allocation11_spill]] }
  0x73   : > { %1540 = vmatpush.msra.mxu0 %v1513_v8  ;;  %4198 = vmatmul.msk.f32.vlgmr.msra.gmra.mxu1 %vm1521_vm0, %v4957_v9  ;;  %v4209_v34 = vld [vmem:[%s4707_s21 + $0x20] sm:$0xff]  ;;  %v4216_v50 = vld [vmem:[%s4717_s29 + $0x28] sm:$0xff]  ;;  %v4230_v8 = vld [vmem:[%s4697_s13 + $0x58] sm:$0xff] }
  0x74   : > { %4197 = vmatmul.msk.f32.vlgmr.msra.gmra.mxu0 %vm1521_vm0, %v4957_v9  ;;  %1596 = vmatpush.msra.mxu2 %v1573_v28  ;;  %v4203_v36 = vld [vmem:[%s4697_s13 + $0x20] sm:$0xff]  ;;  %v4224_v20 = vld [vmem:[%s4727_s8 + $0x8] sm:$0xff] }
  0x75   : > { %4199 = vmatmul.msk.f32.vlgmr.msra.gmra.mxu2 %vm1521_vm0, %v4957_v9  ;;  %1687 = vmatpush.msrb.mxu0 %v4206_v31  ;;  %v4495_v42 = vld [vmem:[%s5474_s3] ss:$0 sm:$0xff]  ;;  %v4497_v55 = vld [vmem:[%s4702_s17 + $0x1] ss:$0 sm:$0xff]  ;;  %v4500_v23 = vld [vmem:[%s4702_s17 + $0x2] ss:$0 sm:$0xff] }
  0x76   : > { %1747 = vmatpush.msrb.mxu2 %v4218_v48  ;;  %v4215_v51 = vld [vmem:[%s4717_s29 + $0x20] sm:$0xff]  ;;  %v4258_v48 = vld [vmem:[%s4707_s21 + $0x70] sm:$0xff] }
  0x77   : > { %1688 = vmatpush.msrb.mxu0 %v4205_v32  ;;  %v1664_v58 = vld [vmem:[%s4727_s8] sm:$0xff] }
  0x78   : > { %1748 = vmatpush.msrb.mxu2 %v4217_v49  ;;  %v4498_v59 = vld [vmem:[%s5474_s3 + $0x1] ss:$0 sm:$0xff]  ;;  %v4257_v49 = vld [vmem:[%s4707_s21 + $0x68] sm:$0xff] }
  0x79   : > { %1689 = vmatpush.msrb.mxu0 %v4204_v35  ;;  %v4233_v16 = vld [vmem:[%s4707_s21 + $0x40] sm:$0xff]  ;;  %v4241_v35 = vld [vmem:[%s4717_s29 + $0x50] sm:$0xff] }
  0x7a   : > { %1749 = vmatpush.msrb.mxu2 %v4216_v50  ;;  %v4256_v50 = vld [vmem:[%s4707_s21 + $0x60] sm:$0xff] }
  0x7b   : > { %1690 = vmatpush.msrb.mxu0 %v4203_v36  ;;  %v4240_v36 = vld [vmem:[%s4717_s29 + $0x48] sm:$0xff] }
  0x7c   : > { %4208 = vmatmul.msk.f32.vlgmr.msrb.gmra.mxu0 %vm1521_vm0, %v4957_v9  ;;  %1750 = vmatpush.msrb.mxu2 %v4215_v51  ;;  %v4253_v51 = vld [vmem:[%s4697_s13 + $0x78] sm:$0xff] }
  0x7d   : > { %4220 = vmatmul.msk.f32.vlgmr.msrb.gmra.mxu2 %vm1521_vm0, %v4957_v9 }
  0x7e   : > { %1860 = vmatpush.msra.mxu2 %v1664_v58 }
  0xf0   : > { %v1570_v12 = vpop.f32.mrf.mxu1 }
  0xf1   : > { %v1542_v13 = vpop.f32.mrf.mxu0  ;;  %v1571_v14 = vadd.f32 %v4493_v10, %v1570_v12  ;;  %v4229_v10 = vld [vmem:[%s4697_s13 + $0x50] sm:$0xff]  ;;  %v4228_v12 = vld [vmem:[%s4697_s13 + $0x48] sm:$0xff] }
  0xf2   : > { %v1543_v15 = vadd.f32 %v4494_v11, %v1542_v13  ;;  %v4236_v11 = vld [vmem:[%s4707_s21 + $0x58] sm:$0xff]  ;;  %v4235_v13 = vld [vmem:[%s4707_s21 + $0x50] sm:$0xff] }
  0xf3   : > { %4200 = vmatpush.xpose.msk.msrb.mxu1 %vm1601_vm1, %v1571_v14  ;;  %v4227_v14 = vld [vmem:[%s4697_s13 + $0x40] sm:$0xff] }
  0xf6   : > { %4201 = vmatmul.msk.f32.vlgmr.msrb.gmra.mxu1 %vm1601_vm1, %v1543_v15  ;;  %v4234_v15 = vld [vmem:[%s4707_s21 + $0x48] sm:$0xff] }
  0xf7   : > { %1717 = vmatpush.msra.mxu1 %v4212_v29  ;;  %v4242_v29 = vld [vmem:[%s4717_s29 + $0x58] sm:$0xff] }
  0xf8   : > { %v1598_v43 = vpop.f32.mrf.mxu2 }
  0xf9   : > { %1718 = vmatpush.msra.mxu1 %v4211_v30  ;;  %v1599_v44 = vadd.f32 %v4495_v42, %v1598_v43  ;;  %v1692_v56 = vpop.f32.mrf.mxu0 }
  0xfa   : > { %v1693_v57 = vadd.f32 %v4497_v55, %v1692_v56  ;;  %v4250_v55 = vld [vmem:[%s4697_s13 + $0x60] sm:$0xff] }
  0xfb   : > { %1719 = vmatpush.msra.mxu1 %v4210_v33  ;;  %1659 = vmatpush.msra.mxu3 %v1599_v44  ;;  %v4501_v44 = vld [vmem:[%s5474_s3 + $0x2] ss:$0 sm:$0xff] }
  0xfd   : > { %1720 = vmatpush.msra.mxu1 %v4209_v34 }
  0xfe   : > { %4214 = vmatmul.msk.f32.vlgmr.msra.gmra.mxu1 %vm1521_vm0, %v4957_v9 }
  0xff   : > { %1837 = vmatpush.msrb.mxu1 %v4224_v20 }
 0x100   : > { %v1752_v60 = vpop.f32.mrf.mxu2 }
 0x101   : > { %v1753_v61 = vadd.f32 %v4498_v59, %v1752_v60  ;;  %1947 = vmatpush.msra.mxu1 %v4242_v29  ;;  %v4502_v59 = vld [vmem:[%s4712_s25 + $0x3] ss:$0 sm:$0xff]  ;;  %v2432_v29 = vld [vmem:[%s4787_s27 + $0x8] sm:$0xff] }
 0x103   : > { %1812 = vmatpush.msra.mxu0 %v1753_v61  ;;  %1948 = vmatpush.msra.mxu1 %v4241_v35  ;;  %v5081_v35 = vld [vmem:[%s1500_s18] sm:$0xff]  ;;  %s5486_s18 = sld [smem:[#allocation21_spill]] }
 0x105   : > { %1917 = vmatpush.msrb.mxu0 %v4236_v11  ;;  %1949 = vmatpush.msra.mxu1 %v4240_v36 }
 0x107   : > { %1918 = vmatpush.msrb.mxu0 %v4235_v13 }
 0x109   : > { %1919 = vmatpush.msrb.mxu0 %v4234_v15 }
 0x10b   : > { %1920 = vmatpush.msrb.mxu0 %v4233_v16 }
 0x173   : > { %v1625_v22 = vpop.f32.mrf.mxu1 }
 0x174   : > { %v1628_v25 = vmul.f32 0.35355338, %v1625_v22  ;;  %v4499_v22 = vld [vmem:[%s4712_s25 + $0x2] ss:$0 sm:$0xff] }
 0x176   : > { %v1629_v26 = vadd.f32 %v1628_v25, %v4970_v24 }
 0x178   : > { %v1630_v27 = vsel %vm1601_vm1, %v1629_v26, -inf }
 0x179   : > { %1631 = vmax.xlane.f32.xlu0 %v1630_v27 }
 0x17b   : > { %v1722_v46 = vpop.f32.mrf.mxu1 }
 0x17c   : > { %v1723_v47 = vadd.f32 %v4496_v45, %v1722_v46  ;;  %v4259_v45 = vld [vmem:[%s4707_s21 + $0x78] sm:$0xff] }
 0x17e   : > { %4221 = vmatpush.xpose.msk.msrb.mxu3 %vm1601_vm1, %v1723_v47 }
 0x1ec   : > { %v1632_v37 = vpop.xlane.xlu0 %1631 }
 0x1ed   : > { %v1633_v38 = vsub.f32 %v1629_v26, %v1632_v37  ;;  %v4239_v37 = vld [vmem:[%s4717_s29 + $0x40] sm:$0xff] }
 0x1ee   : > { %1950 = vmatpush.msra.mxu1 %v4239_v37  ;;  %v4505_v37 = vld [vmem:[%s4732_s14] ss:$0 sm:$0xff] }
 0x1ef   : > { %v1634_v39 = vmul.f32 1.442695, %v1633_v38 }
 0x1f1   : > { %4551 = vpow2.f32 %v1634_v39 }
 0x1f7   : > { %v4552_v40 = vpop.eup %4551 }
 0x1f8   : > { %v1636_v41 = vsel %vm1601_vm1, %v4552_v40, 0.0 }
 0x1f9   : > { %1637 = vadd.xlane.f32.xlu0 %v1636_v41 }
 0x26c   : > { %v1638_v52 = vpop.xlane.xlu0 %1637 }
 0x26d   : > { %4553 = vrcp.f32 %v1638_v52  ;;  %v4252_v52 = vld [vmem:[%s4697_s13 + $0x70] sm:$0xff] }
 0x273   : > { %v4554_v53 = vpop.eup %4553 }
 0x274   : > { %v1640_v54 = vmul.f32 %v4554_v53, %v4552_v40  ;;  %v4248_v53 = vld [vmem:[%s4727_s8 + $0x10] sm:$0xff] }
 0x276   : > { %4202 = vmatmul.msk.f32.vlgmr.msra.gmra.mxu3 %vm1601_vm1, %v1640_v54  ;;  %v4251_v54 = vld [vmem:[%s4697_s13 + $0x68] sm:$0xff] }
 0x277   : > { %1887 = vmatpush.msra.mxu3 %v4230_v8 }
 0x279   : > { %1888 = vmatpush.msra.mxu3 %v4229_v10 }
 0x27b   : > { %1889 = vmatpush.msra.mxu3 %v4228_v12 }
 0x27d   : > { %1890 = vmatpush.msra.mxu3 %v4227_v14 }
 0x27e   : > { %4222 = vmatmul.msk.f32.vlgmr.msrb.gmra.mxu3 %vm1601_vm1, %v1693_v57 }
 0x286   : > { %4232 = vmatmul.msk.f32.vlgmr.msra.gmra.mxu3 %vm1521_vm0, %v4957_v9 }
 0x2f9   : > { %v1661_v62 = vpop.f32.mrf.mxu3 }
 0x2fa   : > { %4226 = vmatmul.msk.f32.vlgmr.msra.gmra.mxu2 %vm1601_vm1, %v1661_v62 }
 0x301   : > { %v1778_v63 = vpop.f32.mrf.mxu3 }
 0x302   : > { %v1781_v0 = vmul.f32 0.35355338, %v1778_v63  ;;  %v4503_v63 = vld [vmem:[%s4702_s17 + $0x3] ss:$0 sm:$0xff] }
 0x304   : > { %v1782_v1 = vadd.f32 %v1781_v0, %v4970_v24 }
 0x306   : > { %v1783_v2 = vsel %vm1601_vm1, %v1782_v1, -inf }
 0x307   : > { %1784 = vmax.xlane.f32.xlu1 %v1783_v2  ;;  %v4265_v2 = vld [vmem:[%s4717_s29 + $0x78] sm:$0xff] }
 0x309   : > { %v1892_v25 = vpop.f32.mrf.mxu3 }
 0x30a   : > { %v1893_v28 = vadd.f32 %v4500_v23, %v1892_v25 }
 0x37a   : > { %v1785_v3 = vpop.xlane.xlu1 %1784 }
 0x37b   : > { %v1786_v4 = vsub.f32 %v1782_v1, %v1785_v3  ;;  %v4264_v3 = vld [vmem:[%s4717_s29 + $0x70] sm:$0xff] }
 0x37d   : > { %v1787_v5 = vmul.f32 1.442695, %v1786_v4  ;;  %v5028_v30 = vpop.f32.mrf.mxu2  ;;  %v4263_v4 = vld [vmem:[%s4717_s29 + $0x68] sm:$0xff] }
 0x37f   : > { %4555 = vpow2.f32 %v1787_v5  ;;  %v4262_v5 = vld [vmem:[%s4717_s29 + $0x60] sm:$0xff] }
 0x385   : > { %v4556_v6 = vpop.eup %4555 }
 0x386   : > { %v1789_v7 = vsel %vm1601_vm1, %v4556_v6, 0.0 }
 0x387   : > { %1790 = vadd.xlane.f32.xlu1 %v1789_v7 }
 0x3fa   : > { %v1791_v17 = vpop.xlane.xlu1 %1790 }
 0x3fb   : > { %4557 = vrcp.f32 %v1791_v17 }
 0x401   : > { %v4558_v18 = vpop.eup %4557 }
 0x402   : > { %v1793_v19 = vmul.f32 %v4558_v18, %v4556_v6 }
 0x404   : > { %4223 = vmatmul.msk.f32.vlgmr.msra.gmra.mxu0 %vm1601_vm1, %v1793_v19  ;;  %v4504_v19 = vld [vmem:[%s5474_s3 + $0x3] ss:$0 sm:$0xff]  ;;  %s5502_s3 = sld [smem:[#allocation28_spill]] }
 0x405   : > { %2037 = vmatpush.msra.mxu0 %v4248_v53 }
 0x40c   : > { %4238 = vmatmul.msk.f32.vlgmr.msrb.gmra.mxu0 %vm1521_vm0, %v4957_v9 }
 0x481   : > { %v1814_v21 = vpop.f32.mrf.mxu0 }
 0x482   : > { %4225 = vmatmul.msk.f32.vlgmr.msrb.gmra.mxu1 %vm1601_vm1, %v1814_v21 }
 0x483   : > { %2065 = vmatpush.msrb.mxu1 %v4253_v51 }
 0x485   : > { %2066 = vmatpush.msrb.mxu1 %v4252_v52 }
 0x487   : > { %2067 = vmatpush.msrb.mxu1 %v4251_v54 }
 0x489   : > { %v1922_v26 = vpop.f32.mrf.mxu0  ;;  %2068 = vmatpush.msrb.mxu1 %v4250_v55 }
 0x48a   : > { %v1923_v27 = vadd.f32 %v4499_v22, %v1922_v26  ;;  %4244 = vmatmul.msk.f32.vlgmr.msra.gmra.mxu1 %vm1521_vm0, %v4957_v9  ;;  %v4271_v22 = vld [vmem:[%s4727_s8 + $0x18] sm:$0xff] }
 0x48c   : > { %4245 = vmatpush.xpose.msk.msrb.mxu2 %vm1601_vm1, %v1923_v27  ;;  %v2434_v27 = vld [vmem:[%s4787_s27 + $0x18] sm:$0xff] }
 0x48f   : > { %4246 = vmatmul.msk.f32.vlgmr.msrb.gmra.mxu2 %vm1601_vm1, %v1893_v28  ;;  %v2433_v28 = vld [vmem:[%s4787_s27 + $0x10] sm:$0xff] }
 0x490   : > { %2095 = vmatpush.msra.mxu2 %v4259_v45 }
 0x492   : > { %2096 = vmatpush.msra.mxu2 %v4258_v48  ;;  %4255 = vmatmul.msk.f32.vlgmr.msrb.gmra.mxu1 %vm1521_vm0, %v4957_v9 }
 0x494   : > { %2097 = vmatpush.msra.mxu2 %v4257_v49  ;;  %v4678_v49 = vmov 32.0  }
 0x496   : > { %2098 = vmatpush.msra.mxu2 %v4256_v50 }
 0x497   : > { %4261 = vmatmul.msk.f32.vlgmr.msra.gmra.mxu2 %vm1521_vm0, %v4957_v9 }
 0x498   : > { %2215 = vmatpush.msrb.mxu2 %v4271_v22 }
 0x49a   : > { %2451 = vmatpush.msra.mxu2 %v2434_v27 }
 0x49c   : > { %2452 = vmatpush.msra.mxu2 %v2433_v28 }
 0x49e   : > { %2453 = vmatpush.msra.mxu2 %v2432_v29 }
 0x4ff   : > { %v1839_v43 = vpop.f32.mrf.mxu1 }
 0x500   : > { %v1863_v6 = vadd.f32 %v5028_v30, %v1839_v43  ;;  %v2431_v30 = vld [vmem:[%s4787_s27] sm:$0xff] }
 0x501   : > { %2454 = vmatpush.msra.mxu2 %v2431_v30  ;;  %v4507_v43 = vld [vmem:[%s4782_s20] ss:$0 sm:$0xff]  ;;  %v2277_v30 = vld [vmem:[%s5479_s1 + $0x38] sm:$0xff] }
 0x507   : > { %v1952_v46 = vpop.f32.mrf.mxu1 }
 0x508   : > { %v1953_v47 = vadd.f32 %v4501_v44, %v1952_v46 }
 0x50a   : > { %2012 = vmatpush.msrb.mxu3 %v1953_v47 }
 0x50c   : > { %2125 = vmatpush.msra.mxu3 %v4265_v2  ;;  %v2266_v2 = vld [vmem:[%s5475_s22 + $0x8] sm:$0xff] }
 0x50e   : > { %2126 = vmatpush.msra.mxu3 %v4264_v3  ;;  %v2265_v3 = vld [vmem:[%s5475_s22] sm:$0xff] }
 0x50f   : > { %v2070_v0 = vpop.f32.mrf.mxu1 }
 0x510   : > { %v2071_v1 = vadd.f32 %v4503_v63, %v2070_v0  ;;  %2127 = vmatpush.msra.mxu3 %v4263_v4  ;;  %v2268_v0 = vld [vmem:[%s5475_s22 + $0x18] sm:$0xff] }
 0x511   : > { %v2462_v4 = vld [vmem:[%s5476_s23 + $0x18] sm:$0xff] }
 0x512   : > { %v1978_v31 = vpop.f32.mrf.mxu2  ;;  %2128 = vmatpush.msra.mxu3 %v4262_v5  ;;  %v2461_v5 = vld [vmem:[%s5476_s23 + $0x10] sm:$0xff] }
 0x513   : > { %v1981_v32 = vmul.f32 0.35355338, %v1978_v31  ;;  %v2403_v31 = vld [vmem:[%s4777_s6 + $0x18] sm:$0xff] }
 0x515   : > { %v1982_v33 = vadd.f32 %v1981_v32, %v4970_v24  ;;  %v2402_v32 = vld [vmem:[%s4777_s6 + $0x10] sm:$0xff] }
 0x517   : > { %v1983_v34 = vsel %vm1601_vm1, %v1982_v33, -inf }
 0x518   : > { %1984 = vmax.xlane.f32.xlu2 %v1983_v34  ;;  %v2400_v34 = vld [vmem:[%s4777_s6] sm:$0xff] }
 0x51a   : > { %v2100_v60 = vpop.f32.mrf.mxu2 }
 0x51b   : > { %v2101_v61 = vadd.f32 %v4502_v59, %v2100_v60 }
 0x51d   : > { %4268 = vmatpush.xpose.msk.msrb.mxu0 %vm1601_vm1, %v2101_v61 }
 0x58b   : > { %v1985_v38 = vpop.xlane.xlu2 %1984 }
 0x58c   : > { %v1986_v39 = vsub.f32 %v1982_v33, %v1985_v38  ;;  %v2401_v33 = vld [vmem:[%s4777_s6 + $0x8] sm:$0xff] }
 0x58e   : > { %v1987_v40 = vmul.f32 1.442695, %v1986_v39 }
 0x590   : > { %4559 = vpow2.f32 %v1987_v40 }
 0x596   : > { %v4560_v41 = vpop.eup %4559 }
 0x597   : > { %v1989_v42 = vsel %vm1601_vm1, %v4560_v41, 0.0 }
 0x598   : > { %1990 = vadd.xlane.f32.xlu2 %v1989_v42 }
 0x60b   : > { %v1991_v56 = vpop.xlane.xlu2 %1990 }
 0x60c   : > { %4561 = vrcp.f32 %v1991_v56 }
 0x612   : > { %v4562_v57 = vpop.eup %4561 }
 0x613   : > { %v1993_v58 = vmul.f32 %v4562_v57, %v4560_v41  ;;  %v4506_v41 = vld [vmem:[%s5473_s4] ss:$0 sm:$0xff] }
 0x615   : > { %4247 = vmatmul.msk.f32.vlgmr.msrb.gmra.mxu3 %vm1601_vm1, %v1993_v58 }
 0x616   : > { %2297 = vmatpush.msrb.mxu3 %v2268_v0  ;;  %v4514_v0 = vld [vmem:[%s4782_s20 + $0x1] ss:$0 sm:$0xff] }
 0x61d   : > { %4267 = vmatmul.msk.f32.vlgmr.msra.gmra.mxu3 %vm1521_vm0, %v4957_v9 }
 0x698   : > { %v2014_v62 = vpop.f32.mrf.mxu3 }
 0x699   : > { %4249 = vmatmul.msk.f32.vlgmr.msra.gmra.mxu0 %vm1601_vm1, %v2014_v62 }
 0x69a   : > { %2321 = vmatpush.msra.mxu0 %v2277_v30 }
 0x6a0   : > { %v2130_v20 = vpop.f32.mrf.mxu3 }
 0x6a1   : > { %4269 = vmatmul.msk.f32.vlgmr.msrb.gmra.mxu0 %vm1601_vm1, %v2071_v1  ;;  %v2131_v21 = vadd.f32 %v4504_v19, %v2130_v20  ;;  %v2267_v1 = vld [vmem:[%s5475_s22 + $0x10] sm:$0xff] }
 0x6a2   : > { %2298 = vmatpush.msrb.mxu3 %v2267_v1 }
 0x6a3   : > { %2190 = vmatpush.msra.mxu1 %v2131_v21  ;;  %v4508_v21 = vld [vmem:[%s5477_s26] ss:$0 sm:$0xff]  ;;  %s5487_s26 = sld [smem:[#allocation23_spill]] }
 0x6a4   : > { %2299 = vmatpush.msrb.mxu3 %v2266_v2 }
 0x6a5   : > { %2423 = vmatpush.msrb.mxu1 %v2403_v31  ;;  %v2276_v31 = vld [vmem:[%s5479_s1 + $0x30] sm:$0xff] }
 0x6a6   : > { %2300 = vmatpush.msrb.mxu3 %v2265_v3  ;;  %2322 = vmatpush.msra.mxu0 %v2276_v31 }
 0x6a7   : > { %2424 = vmatpush.msrb.mxu1 %v2402_v32  ;;  %v2275_v32 = vld [vmem:[%s5479_s1 + $0x28] sm:$0xff] }
 0x6a8   : > { %2479 = vmatpush.msra.mxu3 %v2462_v4  ;;  %2323 = vmatpush.msra.mxu0 %v2275_v32  ;;  %v4302_v32 = vld [vmem:[%s5482_s7 + $0x8] sm:$0xff] }
 0x6a9   : > { %2425 = vmatpush.msrb.mxu1 %v2401_v33  ;;  %v2274_v33 = vld [vmem:[%s5479_s1 + $0x20] sm:$0xff] }
 0x6aa   : > { %2480 = vmatpush.msra.mxu3 %v2461_v5  ;;  %2324 = vmatpush.msra.mxu0 %v2274_v33 }
 0x6ab   : > { %2426 = vmatpush.msrb.mxu1 %v2400_v34  ;;  %v2273_v34 = vld [vmem:[%s5479_s1 + $0x18] sm:$0xff] }
 0x6ac   : > { %2325 = vmatpush.msra.mxu0 %v2273_v34  ;;  %v4516_v34 = vld [vmem:[%s5473_s4 + $0x2] ss:$0 sm:$0xff] }
 0x716   : > { %v2039_v7 = vpop.f32.mrf.mxu0 }
 0x717   : > { %v2042_v8 = vadd.f32 %v2039_v7, %v1863_v6  ;;  %v2460_v6 = vld [vmem:[%s5476_s23 + $0x8] sm:$0xff] }
 0x718   : > { %2481 = vmatpush.msra.mxu3 %v2460_v6  ;;  %v4515_v6 = vld [vmem:[%s5481_s10 + $0x1] ss:$0 sm:$0xff] }
 0x71e   : > { %v2156_v10 = vpop.f32.mrf.mxu0 }
 0x71f   : > { %v2159_v11 = vmul.f32 0.35355338, %v2156_v10  ;;  %v2459_v10 = vld [vmem:[%s5476_s23] sm:$0xff] }
 0x720   : > { %2482 = vmatpush.msra.mxu3 %v2459_v10 }
 0x721   : > { %v2160_v12 = vadd.f32 %v2159_v11, %v4970_v24 }
 0x723   : > { %v2161_v13 = vsel %vm1601_vm1, %v2160_v12, -inf }
 0x724   : > { %2162 = vmax.xlane.f32.xlu0 %v2161_v13 }
 0x797   : > { %v2163_v14 = vpop.xlane.xlu0 %2162 }
 0x798   : > { %v2164_v15 = vsub.f32 %v2160_v12, %v2163_v14 }
 0x79a   : > { %v2165_v16 = vmul.f32 1.442695, %v2164_v15 }
 0x79c   : > { %4563 = vpow2.f32 %v2165_v16 }
 0x7a2   : > { %v4564_v17 = vpop.eup %4563 }
 0x7a3   : > { %v2167_v18 = vsel %vm1601_vm1, %v4564_v17, 0.0 }
 0x7a4   : > { %2168 = vadd.xlane.f32.xlu1 %v2167_v18 }
 0x817   : > { %v2169_v23 = vpop.xlane.xlu1 %2168 }
 0x818   : > { %4565 = vrcp.f32 %v2169_v23 }
 0x819   : > { %4567 = vrcp.f32 %v4678_v49 }
 0x81e   : > { %v4566_v25 = vpop.eup %4565 }
 0x81f   : > { %v2171_v26 = vmul.f32 %v4566_v25, %v4564_v17  ;;  %v4568_v50 = vpop.eup %4567  ;;  %v4509_v25 = vld [vmem:[%s5478_s28] ss:$0 sm:$0xff]  ;;  %s5488_s28 = sld [smem:[#allocation35_spill]] }
 0x820   : > { %v2232_v51 = vmul.f32 32.0, %v4568_v50  ;;  %vm2236_vm3 = vweird.f32 %v4568_v50 }
 0x821   : > { %4270 = vmatmul.msk.f32.vlgmr.msra.gmra.mxu1 %vm1601_vm1, %v2171_v26 }
 0x822   : > { %v2233_v52 = vsub.f32 1.0, %v2232_v51 }
 0x824   : > { %v2234_v53 = vmul.f32 %v4568_v50, %v2233_v52 }
 0x829   : > { %4275 = vmatmul.msk.f32.vlgmr.msrb.gmra.mxu1 %vm1521_vm0, %v5081_v35 }
 0x89e   : > { %v2192_v36 = vpop.f32.mrf.mxu1 }
 0x89f   : > { %4272 = vmatmul.msk.f32.vlgmr.msrb.gmra.mxu2 %vm1601_vm1, %v2192_v36  ;;  %v2272_v36 = vld [vmem:[%s5479_s1 + $0x10] sm:$0xff] }
 0x8a0   : > { %2326 = vmatpush.msra.mxu0 %v2272_v36  ;;  %v4517_v36 = vld [vmem:[%s4782_s20 + $0x2] ss:$0 sm:$0xff] }
 0x8a6   : > { %v2428_v45 = vpop.f32.mrf.mxu1 }
 0x8a7   : > { %4276 = vmatmul.msk.f32.vlgmr.msra.gmra.mxu2 %vm1521_vm0, %v5081_v35  ;;  %v2429_v48 = vadd.f32 %v4507_v43, %v2428_v45  ;;  %v4289_v43 = vld [vmem:[%s4787_s27 + $0x30] sm:$0xff]  ;;  %v4288_v45 = vld [vmem:[%s4787_s27 + $0x28] sm:$0xff] }
 0x922   : > { %v2217_v38 = vpop.f32.mrf.mxu2 }
 0x923   : > { %v2220_v39 = vadd.f32 %v2217_v38, %v2042_v8  ;;  %v4284_v38 = vld [vmem:[%s4777_s6 + $0x38] sm:$0xff] }
 0x925   : > { %v2224_v40 = vadd.f32 %v4505_v37, %v2220_v39  ;;  %v2271_v37 = vld [vmem:[%s5479_s1 + $0x8] sm:$0xff]  ;;  %v2270_v39 = vld [vmem:[%s5479_s1] sm:$0xff]  ;;  %s5496_s1 = sld [smem:[#allocation20_spill]] }
 0x926   : > { %2327 = vmatpush.msra.mxu0 %v2271_v37 }
 0x927   : > { %v2225_v42 = vadd.f32 %v2224_v40, %v4957_v9  ;;  %v2235_v9 = vadd.f32 %v4568_v50, %v2234_v53  ;;  %v4283_v40 = vld [vmem:[%s4777_s6 + $0x30] sm:$0xff]  ;;  %v4511_v53 = vld [vmem:[%s5481_s10] ss:$0 sm:$0xff] }
 0x928   : > { %2328 = vmatpush.msra.mxu0 %v2270_v39 }
 0x929   : > { %v2228_v44 = vsel %vm1521_vm0, %v2225_v42, 0.0  ;;  %v5095_v54 = vsel %vm2236_vm3, %v4568_v50, %v2235_v9 }
 0x92a   : > { %v2456_v46 = vpop.f32.mrf.mxu2  ;;  %2229 = vadd.xlane.f32.xlu2 %v2228_v44  ;;  %v4281_v44 = vld [vmem:[%s4777_s6 + $0x20] sm:$0xff] }
 0x92b   : > { %v2457_v47 = vadd.f32 %v4506_v41, %v2456_v46  ;;  %v4290_v41 = vld [vmem:[%s4787_s27 + $0x38] sm:$0xff]  ;;  %v4287_v46 = vld [vmem:[%s4787_s27 + $0x20] sm:$0xff] }
 0x92c   : > { %2602 = vmatpush.msrb.mxu0 %v4290_v41  ;;  %v4320_v41 = vld [vmem:[%s5476_s23 + $0x58] sm:$0xff] }
 0x92d   : > { %4278 = vmatpush.xpose.msk.msra.mxu1 %vm1601_vm1, %v2457_v47  ;;  %v4296_v47 = vld [vmem:[%s5476_s23 + $0x38] sm:$0xff] }
 0x92e   : > { %2603 = vmatpush.msrb.mxu0 %v4289_v43 }
 0x930   : > { %4279 = vmatmul.msk.f32.vlgmr.msra.gmra.mxu1 %vm1601_vm1, %v2429_v48  ;;  %2604 = vmatpush.msrb.mxu0 %v4288_v45  ;;  %v4510_v48 = vld [vmem:[%s5480_s2] ss:$0 sm:$0xff]  ;;  %s5489_s2 = sld [smem:[#allocation36_spill]] }
 0x931   : > { %2632 = vmatpush.msrb.mxu1 %v4296_v47  ;;  %v4319_v47 = vld [vmem:[%s5476_s23 + $0x50] sm:$0xff] }
 0x932   : > { %2605 = vmatpush.msrb.mxu0 %v4287_v46 }
 0x99d   : > { %v2230_v55 = vpop.xlane.xlu2 %2229 }
 0x99e   : > { %v2238_v56 = vmul.f32 %v5095_v54, %v2230_v55 }
 0x9a0   : > { %v2239_v57 = vsub.f32 %v2225_v42, %v2238_v56  ;;  %v4282_v42 = vld [vmem:[%s4777_s6 + $0x28] sm:$0xff] }
 0x9a2   : > { %v2240_v58 = vmul.f32 %v2239_v57, %v2239_v57 }
 0x9a4   : > { %v2241_v59 = vsel %vm1521_vm0, %v2240_v58, 0.0  ;;  %v4295_v58 = vld [vmem:[%s5476_s23 + $0x30] sm:$0xff] }
 0x9a5   : > { %2242 = vadd.xlane.f32.xlu0 %v2241_v59  ;;  %2633 = vmatpush.msrb.mxu1 %v4295_v58  ;;  %v4294_v59 = vld [vmem:[%s5476_s23 + $0x28] sm:$0xff] }
 0x9a7   : > { %2634 = vmatpush.msrb.mxu1 %v4294_v59 }
 0x9ad   : > { %v2510_v60 = vpop.f32.mrf.mxu1 }
 0x9ae   : > { %v2513_v61 = vmul.f32 0.35355338, %v2510_v60  ;;  %v4293_v60 = vld [vmem:[%s5476_s23 + $0x20] sm:$0xff] }
 0x9af   : > { %2635 = vmatpush.msrb.mxu1 %v4293_v60  ;;  %v4518_v60 = vld [vmem:[%s5481_s10 + $0x2] ss:$0 sm:$0xff] }
 0x9b0   : > { %v2514_v62 = vadd.f32 %v2513_v61, %v4970_v24  ;;  %4298 = vmatmul.msk.f32.vlgmr.msrb.gmra.mxu1 %vm1521_vm0, %v5081_v35  ;;  %v2549_v61 = vld [vmem:[%s5482_s7] sm:$0xff] }
 0x9b1   : > { %2745 = vmatpush.msra.mxu1 %v2549_v61 }
 0x9b2   : > { %v2515_v63 = vsel %vm1601_vm1, %v2514_v62, -inf }
 0x9b3   : > { %2516 = vmax.xlane.f32.xlu1 %v2515_v63  ;;  %v4513_v63 = vld [vmem:[%s5473_s4 + $0x1] ss:$0 sm:$0xff] }
 0xa18   : > { %v2243_v7 = vpop.xlane.xlu0 %2242 }
 0xa19   : > { %v2244_v8 = vmul.f32 %v2243_v7, %v5095_v54 }
 0xa1b   : > { %v2245_v11 = vadd.f32 1e-05, %v2244_v8 }
 0xa1d   : > { %4569 = vrsqrt.f32 %v2245_v11  ;;  %vm2252_vm5 = vweird.f32 %v2245_v11 }
 0xa23   : > { %v4570_v12 = vpop.eup %4569 }
 0xa24   : > { %v2247_v13 = vmul.f32 %v4570_v12, %v2245_v11  ;;  %vm2253_vm4 = vweird.f32 %v4570_v12 }
 0xa25   : > { %vm2254_vm6 = vmor %vm2252_vm5, %vm2253_vm4 }
 0xa26   : > { %v2248_v14 = vmul.f32 %v4570_v12, %v2247_v13  ;;  %v2517_v15 = vpop.xlane.xlu1 %2516 }
 0xa27   : > { %v2518_v16 = vsub.f32 %v2514_v62, %v2517_v15 }
 0xa28   : > { %v2249_v17 = vmul.f32 0.5, %v2248_v14 }
 0xa29   : > { %v2519_v18 = vmul.f32 1.442695, %v2518_v16 }
 0xa2a   : > { %v2250_v19 = vsub.f32 1.5, %v2249_v17 }
 0xa2b   : > { %4571 = vpow2.f32 %v2519_v18 }
 0xa2c   : > { %v2251_v20 = vmul.f32 %v4570_v12, %v2250_v19  ;;  %v4314_v19 = vld [vmem:[%s4787_s27 + $0x58] sm:$0xff] }
 0xa2d   : > { %v2637_v7 = vpop.f32.mrf.mxu1 }
 0xa2e   : > { %v2255_v22 = vsel %vm2254_vm6, %v4570_v12, %v2251_v20  ;;  %v2638_v8 = vadd.f32 %v4515_v6, %v2637_v7  ;;  %v4313_v20 = vld [vmem:[%s4787_s27 + $0x50] sm:$0xff]  ;;  %v4328_v6 = vld [vmem:[%s4777_s6 + $0x60] sm:$0xff] }
 0xa2f   : > { %v2256_v23 = vmul.f32 %v2255_v22, %v2239_v57  ;;  %v4307_v22 = vld [vmem:[%s4777_s6 + $0x50] sm:$0xff] }
 0xa31   : > { %v4572_v26 = vpop.eup %4571  ;;  %v2260_v27 = vmul.f32 %v4508_v21, %v2256_v23  ;;  %v4308_v21 = vld [vmem:[%s4777_s6 + $0x58] sm:$0xff]  ;;  %v4312_v23 = vld [vmem:[%s4787_s27 + $0x48] sm:$0xff] }
 0xa32   : > { %v2521_v28 = vsel %vm1601_vm1, %v4572_v26, 0.0 }
 0xa33   : > { %2522 = vadd.xlane.f32.xlu2 %v2521_v28  ;;  %v5113_v29 = vadd.f32 %v4509_v25, %v2260_v27  ;;  %v4306_v25 = vld [vmem:[%s4777_s6 + $0x48] sm:$0xff]  ;;  %v4305_v27 = vld [vmem:[%s4777_s6 + $0x40] sm:$0xff] }
 0xa35   : > { %4273 = vmatmul.msk.f32.vlgmr.msrb.gmra.mxu3 %vm1521_vm0, %v5113_v29 }
 0xa36   : > { %2572 = vmatpush.msrb.mxu3 %v4284_v38 }
 0xa38   : > { %2573 = vmatpush.msrb.mxu3 %v4283_v40 }
 0xa3a   : > { %2574 = vmatpush.msrb.mxu3 %v4282_v42 }
 0xa3c   : > { %2575 = vmatpush.msrb.mxu3 %v4281_v44 }
 0xa3d   : > { %4277 = vmatmul.msk.f32.vlgmr.msra.gmra.mxu3 %vm1521_vm0, %v5081_v35 }
 0xa3e   : > { %2697 = vmatpush.msra.mxu3 %v2638_v8 }
 0xa45   : > { %4286 = vmatmul.msk.f32.vlgmr.msrb.gmra.mxu3 %vm1521_vm0, %v5081_v35 }
 0xa46   : > { %2802 = vmatpush.msrb.mxu3 %v4314_v19  ;;  %v4342_v19 = vld [vmem:[%s5476_s23 + $0x70] sm:$0xff] }
 0xa48   : > { %2803 = vmatpush.msrb.mxu3 %v4313_v20  ;;  %v4341_v20 = vld [vmem:[%s5476_s23 + $0x68] sm:$0xff] }
 0xa4a   : > { %2804 = vmatpush.msrb.mxu3 %v4312_v23 }
 0xaa6   : > { %v2523_v49 = vpop.xlane.xlu2 %2522 }
 0xaa7   : > { %4573 = vrcp.f32 %v2523_v49  ;;  %v4317_v49 = vld [vmem:[%s5476_s23 + $0x40] sm:$0xff] }
 0xaad   : > { %v4574_v9 = vpop.eup %4573 }
 0xaae   : > { %v2525_v57 = vmul.f32 %v4574_v9, %v4572_v26  ;;  %v4311_v26 = vld [vmem:[%s4787_s27 + $0x40] sm:$0xff] }
 0xaaf   : > { %2805 = vmatpush.msrb.mxu3 %v4311_v26 }
 0xab8   : > { %v2302_v50 = vpop.f32.mrf.mxu3 }
 0xab9   : > { %v2303_v51 = vadd.f32 %v4510_v48, %v2302_v50  ;;  %v4318_v48 = vld [vmem:[%s5476_s23 + $0x48] sm:$0xff] }
 0xabb   : > { %v2305_v52 = vmax.f32 %v2303_v51, 0.0 }
 0xabd   : > { %4274 = vmatmul.msk.f32.vlgmr.msra.gmra.mxu0 %vm2309_vm7, %v2305_v52 }
 0xabe   : > { %2722 = vmatpush.msra.mxu0 %v4302_v32 }
 0xac0   : > { %v2484_v55 = vpop.f32.mrf.mxu3 }
 0xac1   : > { %v2485_v56 = vadd.f32 %v4511_v53, %v2484_v55  ;;  %v4512_v53 = vld [vmem:[%s5483_s11] ss:$0 sm:$0xff]  ;;  %s5490_s11 = sld [smem:[#allocation19_spill]] }
 0xac3   : > { %2544 = vmatpush.msrb.mxu2 %v2485_v56 }
 0xac4   : > { %4280 = vmatmul.msk.f32.vlgmr.msrb.gmra.mxu2 %vm1601_vm1, %v2525_v57 }
 0xac5   : > { %4292 = vmatmul.msk.f32.vlgmr.msrb.gmra.mxu0 %vm1521_vm0, %v5081_v35 }
 0xac6   : > { %2832 = vmatpush.msrb.mxu0 %v4320_v41 }
 0xac8   : > { %v2577_v1 = vpop.f32.mrf.mxu3  ;;  %2833 = vmatpush.msrb.mxu0 %v4319_v47 }
 0xac9   : > { %v2578_v4 = vadd.f32 %v4514_v0, %v2577_v1  ;;  %v4336_v0 = vld [vmem:[%s4787_s27 + $0x70] sm:$0xff]  ;;  %v4331_v1 = vld [vmem:[%s4777_s6 + $0x78] sm:$0xff] }
 0xaca   : > { %2834 = vmatpush.msrb.mxu0 %v4318_v48 }
 0xacc   : > { %2835 = vmatpush.msrb.mxu0 %v4317_v49 }
 0xb3a   : > { %v5150_v62 = vpop.f32.mrf.mxu0 }
 0xb3b   : > { %v2331_v55 = vadd.f32 %v4512_v53, %v5150_v62  ;;  %v4337_v62 = vld [vmem:[%s4787_s27 + $0x78] sm:$0xff] }
 0xb3d   : > { %v2333_v57 = vadd.f32 %v2331_v55, %v5113_v29  ;;  %v4326_v29 = vld [vmem:[%s5482_s7 + $0x10] sm:$0xff] }
 0xb3f   : > { %v2336_v58 = vsel %vm1521_vm0, %v2333_v57, 0.0 }
 0xb42   : > { %v2607_v2 = vpop.f32.mrf.mxu0 }
 0xb43   : > { %v2608_v3 = vadd.f32 %v4513_v63, %v2607_v2  ;;  %v4330_v2 = vld [vmem:[%s4777_s6 + $0x70] sm:$0xff] }
 0xb45   : > { %4299 = vmatpush.xpose.msk.msra.mxu2 %vm1601_vm1, %v2608_v3  ;;  %v4335_v3 = vld [vmem:[%s4787_s27 + $0x68] sm:$0xff] }
 0xb47   : > { %v2546_v5 = vpop.f32.mrf.mxu2 }
 0xb48   : > { %4300 = vmatmul.msk.f32.vlgmr.msra.gmra.mxu2 %vm1601_vm1, %v2578_v4  ;;  %4304 = vmatmul.msk.f32.vlgmr.msra.gmra.mxu1 %vm1601_vm1, %v2546_v5  ;;  %v4329_v4 = vld [vmem:[%s4777_s6 + $0x68] sm:$0xff]  ;;  %v4334_v5 = vld [vmem:[%s4787_s27 + $0x60] sm:$0xff] }
 0xb49   : > { %2772 = vmatpush.msrb.mxu2 %v4308_v21  ;;  %v4340_v21 = vld [vmem:[%s5476_s23 + $0x60] sm:$0xff] }
 0xb4b   : > { %2773 = vmatpush.msrb.mxu2 %v4307_v22 }
 0xb4d   : > { %2774 = vmatpush.msrb.mxu2 %v4306_v25 }
 0xb4f   : > { %2775 = vmatpush.msrb.mxu2 %v4305_v27 }
 0xb50   : > { %4310 = vmatmul.msk.f32.vlgmr.msrb.gmra.mxu2 %vm1521_vm0, %v5081_v35 }
 0xbc5   : > { %v5181_v42 = vpop.f32.mrf.mxu1 }
 0xbcb   : > { %v2663_v10 = vpop.f32.mrf.mxu2 }
 0xbcc   : > { %v2666_v11 = vmul.f32 0.35355338, %v2663_v10 }
 0xbce   : > { %v2667_v12 = vadd.f32 %v2666_v11, %v4970_v24  ;;  %v4519_v11 = vld [vmem:[%s5473_s4 + $0x3] ss:$0 sm:$0xff]  ;;  %s5504_s4 = sld [smem:[#allocation32_spill]] }
 0xbd0   : > { %v2668_v13 = vsel %vm1601_vm1, %v2667_v12, -inf }
 0xbd1   : > { %2669 = vmax.xlane.f32.xlu0 %v2668_v13 }
 0xbd3   : > { %v2777_v37 = vpop.f32.mrf.mxu2 }
 0xbd4   : > { %v2778_v40 = vadd.f32 %v4517_v36, %v2777_v37 }
 0xc44   : > { %v2670_v14 = vpop.xlane.xlu0 %2669 }
 0xc45   : > { %v2671_v15 = vsub.f32 %v2667_v12, %v2670_v14 }
 0xc47   : > { %v2672_v16 = vmul.f32 1.442695, %v2671_v15  ;;  %v4520_v15 = vld [vmem:[%s4782_s20 + $0x3] ss:$0 sm:$0xff] }
 0xc49   : > { %4575 = vpow2.f32 %v2672_v16 }
 0xc4f   : > { %v4576_v17 = vpop.eup %4575 }
 0xc50   : > { %v2674_v18 = vsel %vm1601_vm1, %v4576_v17, 0.0 }
 0xc51   : > { %2675 = vadd.xlane.f32.xlu1 %v2674_v18  ;;  %v4343_v18 = vld [vmem:[%s5476_s23 + $0x78] sm:$0xff] }
 0xcc4   : > { %v2676_v28 = vpop.xlane.xlu1 %2675 }
 0xcc5   : > { %4577 = vrcp.f32 %v2676_v28 }
 0xccb   : > { %v4578_v30 = vpop.eup %4577 }
 0xccc   : > { %v2678_v31 = vmul.f32 %v4578_v30, %v4576_v17 }
 0xcce   : > { %4301 = vmatmul.msk.f32.vlgmr.msra.gmra.mxu3 %vm1601_vm1, %v2678_v31 }
 0xccf   : > { %2922 = vmatpush.msra.mxu3 %v4326_v29 }
 0xcd6   : > { %4316 = vmatmul.msk.f32.vlgmr.msrb.gmra.mxu3 %vm1521_vm0, %v5081_v35 }
 0xd51   : > { %v2699_v33 = vpop.f32.mrf.mxu3 }
 0xd52   : > { %4303 = vmatmul.msk.f32.vlgmr.msra.gmra.mxu0 %vm1601_vm1, %v2699_v33 }
 0xd53   : > { %2950 = vmatpush.msra.mxu0 %v4331_v1 }
 0xd55   : > { %2951 = vmatpush.msra.mxu0 %v4330_v2 }
 0xd57   : > { %2952 = vmatpush.msra.mxu0 %v4329_v4 }
 0xd59   : > { %v2807_v38 = vpop.f32.mrf.mxu3  ;;  %2953 = vmatpush.msra.mxu0 %v4328_v6  ;;  %v3178_v6 = vld [vmem:[%s5486_s18 + $0x18] sm:$0xff] }
 0xd5a   : > { %v2808_v39 = vadd.f32 %v4516_v34, %v2807_v38  ;;  %4322 = vmatmul.msk.f32.vlgmr.msrb.gmra.mxu0 %vm1521_vm0, %v5081_v35 }
 0xd5c   : > { %4323 = vmatpush.xpose.msk.msrb.mxu1 %vm1601_vm1, %v2808_v39 }
 0xd5f   : > { %4324 = vmatmul.msk.f32.vlgmr.msrb.gmra.mxu1 %vm1601_vm1, %v2778_v40 }
 0xd60   : > { %2980 = vmatpush.msra.mxu1 %v4337_v62 }
 0xd62   : > { %2981 = vmatpush.msra.mxu1 %v4336_v0  ;;  %4333 = vmatmul.msk.f32.vlgmr.msra.gmra.mxu0 %vm1521_vm0, %v5081_v35 }
 0xd64   : > { %2982 = vmatpush.msra.mxu1 %v4335_v3 }
 0xd66   : > { %2983 = vmatpush.msra.mxu1 %v4334_v5 }
 0xd67   : > { %4339 = vmatmul.msk.f32.vlgmr.msra.gmra.mxu1 %vm1521_vm0, %v5081_v35 }
 0xdcf   : > { %v2724_v59 = vpop.f32.mrf.mxu0 }
 0xdd0   : > { %v2748_v22 = vadd.f32 %v5181_v42, %v2724_v59 }
 0xdd7   : > { %v2837_v61 = vpop.f32.mrf.mxu0 }
 0xdd8   : > { %v2838_v63 = vadd.f32 %v4518_v60, %v2837_v61 }
 0xdda   : > { %2897 = vmatpush.msra.mxu2 %v2838_v63  ;;  %v4349_v63 = vld [vmem:[%s5482_s7 + $0x18] sm:$0xff] }
 0xddb   : > { %3100 = vmatpush.msrb.mxu1 %v4349_v63 }
 0xddc   : > { %v2863_v43 = vpop.f32.mrf.mxu1  ;;  %3010 = vmatpush.msrb.mxu2 %v4343_v18 }
 0xddd   : > { %v2866_v44 = vmul.f32 0.35355338, %v2863_v43 }
 0xdde   : > { %3011 = vmatpush.msrb.mxu2 %v4342_v19 }
 0xddf   : > { %v2867_v45 = vadd.f32 %v2866_v44, %v4970_v24  ;;  %v2955_v16 = vpop.f32.mrf.mxu0 }
 0xde0   : > { %v2956_v17 = vadd.f32 %v4520_v15, %v2955_v16  ;;  %3012 = vmatpush.msrb.mxu2 %v4341_v20  ;;  %v4366_v15 = vld [vmem:[%s5486_s18 + $0x38] sm:$0xff]  ;;  %v4365_v16 = vld [vmem:[%s5486_s18 + $0x30] sm:$0xff]  ;;  %v4363_v20 = vld [vmem:[%s5486_s18 + $0x20] sm:$0xff] }
 0xde1   : > { %v2868_v46 = vsel %vm1601_vm1, %v2867_v45, -inf }
 0xde2   : > { %2869 = vmax.xlane.f32.xlu2 %v2868_v46  ;;  %3013 = vmatpush.msrb.mxu2 %v4340_v21 }
 0xde4   : > { %v2985_v12 = vpop.f32.mrf.mxu1 }
 0xde5   : > { %v2986_v13 = vadd.f32 %v4519_v11, %v2985_v12  ;;  %v3176_v11 = vld [vmem:[%s5486_s18 + $0x8] sm:$0xff] }
 0xde6   : > { %v3207_v12 = vld [vmem:[%s5487_s26 + $0x8] sm:$0xff] }
 0xde7   : > { %4346 = vmatpush.xpose.msk.msrb.mxu3 %vm1601_vm1, %v2986_v13  ;;  %v3175_v13 = vld [vmem:[%s5486_s18] sm:$0xff] }
 0xe55   : > { %v2870_v50 = vpop.xlane.xlu2 %2869 }
 0xe56   : > { %v2871_v51 = vsub.f32 %v2867_v45, %v2870_v50 }
 0xe58   : > { %v2872_v52 = vmul.f32 1.442695, %v2871_v51  ;;  %v4521_v51 = vld [vmem:[%s5484_s16] ss:$0 sm:$0xff]  ;;  %s5491_s16 = sld [smem:[#allocation16_spill]] }
 0xe5a   : > { %4579 = vpow2.f32 %v2872_v52 }
 0xe60   : > { %v4580_v9 = vpop.eup %4579 }
 0xe61   : > { %v2874_v56 = vsel %vm1601_vm1, %v4580_v9, 0.0 }
 0xe62   : > { %2875 = vadd.xlane.f32.xlu0 %v2874_v56 }
 0xe6a   : > { %2337 = vadd.xlane.f32.xlu0 %v2336_v58  ;;  %v4523_v58 = vld [vmem:[%s5481_s10 + $0x3] ss:$0 sm:$0xff] }
 0xed5   : > { %v2876_v7 = vpop.xlane.xlu0 %2875 }
 0xed6   : > { %4581 = vrcp.f32 %v2876_v7  ;;  %v3209_v7 = vld [vmem:[%s5487_s26 + $0x18] sm:$0xff] }
 0xedc   : > { %v4582_v8 = vpop.eup %4581 }
 0xedd   : > { %v2878_v10 = vmul.f32 %v4582_v8, %v4580_v9  ;;  %v2338_v26 = vpop.xlane.xlu0 %2337  ;;  %v4522_v9 = vld [vmem:[%s5485_s30] ss:$0 sm:$0xff]  ;;  %v3177_v8 = vld [vmem:[%s5486_s18 + $0x10] sm:$0xff]  ;;  %s5492_s30 = sld [smem:[#allocation24_spill]] }
 0xede   : > { %v2339_v28 = vmul.f32 %v2338_v26, %v5095_v54 }
 0xedf   : > { %4325 = vmatmul.msk.f32.vlgmr.msra.gmra.mxu2 %vm1601_vm1, %v2878_v10  ;;  %v3208_v10 = vld [vmem:[%s5487_s26 + $0x10] sm:$0xff] }
 0xee0   : > { %v2340_v32 = vsub.f32 %v2333_v57, %v2339_v28 }
 0xee2   : > { %v2341_v34 = vmul.f32 %v2340_v32, %v2340_v32 }
 0xee4   : > { %v2342_v36 = vsel %vm1521_vm0, %v2341_v34, 0.0 }
 0xee7   : > { %4345 = vmatmul.msk.f32.vlgmr.msrb.gmra.mxu2 %vm1521_vm0, %v5081_v35 }
 0xf62   : > { %v2899_v14 = vpop.f32.mrf.mxu2 }
 0xf63   : > { %4327 = vmatmul.msk.f32.vlgmr.msra.gmra.mxu3 %vm1601_vm1, %v2899_v14  ;;  %v3206_v14 = vld [vmem:[%s5487_s26] sm:$0xff] }
 0xf64   : > { %3198 = vmatpush.msra.mxu3 %v3178_v6 }
 0xf66   : > { %3199 = vmatpush.msra.mxu3 %v3177_v8 }
 0xf68   : > { %3200 = vmatpush.msra.mxu3 %v3176_v11 }
 0xf6a   : > { %v3015_v59 = vpop.f32.mrf.mxu2  ;;  %3201 = vmatpush.msra.mxu3 %v3175_v13 }
 0xf6b   : > { %4347 = vmatmul.msk.f32.vlgmr.msrb.gmra.mxu3 %vm1601_vm1, %v2956_v17  ;;  %v3016_v60 = vadd.f32 %v4523_v58, %v3015_v59  ;;  %v4364_v17 = vld [vmem:[%s5486_s18 + $0x28] sm:$0xff]  ;;  %v4359_v58 = vld [vmem:[%s5490_s11 + $0x30] sm:$0xff] }
 0xf6c   : > { %v4358_v59 = vld [vmem:[%s5490_s11 + $0x28] sm:$0xff] }
 0xf6d   : > { %3075 = vmatpush.msrb.mxu0 %v3016_v60  ;;  %v4357_v60 = vld [vmem:[%s5490_s11 + $0x20] sm:$0xff] }
 0xf6f   : > { %3226 = vmatpush.msra.mxu0 %v3209_v7 }
 0xf71   : > { %3227 = vmatpush.msra.mxu0 %v3208_v10 }
 0xf73   : > { %3228 = vmatpush.msra.mxu0 %v3207_v12 }
 0xf75   : > { %3229 = vmatpush.msra.mxu0 %v3206_v14 }
 0xfe6   : > { %v2924_v23 = vpop.f32.mrf.mxu3 }
 0xfe7   : > { %v5222_v25 = vadd.f32 %v2924_v23, %v2748_v22 }
 0xfee   : > { %v3041_v27 = vpop.f32.mrf.mxu3 }
 0xfef   : > { %v3044_v30 = vmul.f32 0.35355338, %v3041_v27 }
 0xff1   : > { %v3045_v31 = vadd.f32 %v3044_v30, %v4970_v24 }
 0xff3   : > { %v3046_v33 = vsel %vm1601_vm1, %v3045_v31, -inf }
 0xff4   : > { %3047 = vmax.xlane.f32.xlu1 %v3046_v33  ;;  %v4525_v33 = vld [vmem:[%s5489_s2] ss:$0 sm:$0xff]  ;;  %s5494_s2 = sld [smem:[#allocation17_spill]] }
 0xffc   : > { %2343 = vadd.xlane.f32.xlu1 %v2342_v36 }
0x1067   : > { %v3048_v37 = vpop.xlane.xlu1 %3047 }
0x1068   : > { %v3049_v38 = vsub.f32 %v3045_v31, %v3048_v37  ;;  %v4524_v31 = vld [vmem:[%s5488_s28] ss:$0 sm:$0xff]  ;;  %s5493_s28 = sld [smem:[#allocation22_spill]] }
0x106a   : > { %v3050_v39 = vmul.f32 1.442695, %v3049_v38  ;;  %v3147_v38 = vld [vmem:[%s5490_s11 + $0x18] sm:$0xff] }
0x106b   : > { %3167 = vmatpush.msra.mxu2 %v3147_v38 }
0x106c   : > { %4583 = vpow2.f32 %v3050_v39  ;;  %v3146_v39 = vld [vmem:[%s5490_s11 + $0x10] sm:$0xff] }
0x106d   : > { %3168 = vmatpush.msra.mxu2 %v3146_v39 }
0x106e   : > { %v4529_v10 = vld [vmem:[%s5493_s28 + $0x1] ss:$0 sm:$0xff] }
0x106f   : > { %v2344_v40 = vpop.xlane.xlu1 %2343 }
0x1070   : > { %v2345_v41 = vmul.f32 %v2344_v40, %v5095_v54  ;;  %v3145_v40 = vld [vmem:[%s5490_s11 + $0x8] sm:$0xff] }
0x1071   : > { %3169 = vmatpush.msra.mxu2 %v3145_v40 }
0x1072   : > { %v4584_v42 = vpop.eup %4583  ;;  %v2346_v43 = vadd.f32 1e-05, %v2345_v41  ;;  %v4526_v41 = vld [vmem:[%s5491_s16] ss:$0 sm:$0xff]  ;;  %s5495_s16 = sld [smem:[#allocation18_spill]] }
0x1073   : > { %v3052_v44 = vsel %vm1601_vm1, %v4584_v42, 0.0 }
0x1074   : > { %4585 = vrsqrt.f32 %v2346_v43  ;;  %3053 = vadd.xlane.f32.xlu2 %v3052_v44  ;;  %vm2353_vm9 = vweird.f32 %v2346_v43 }
0x1078   : > { %v4531_v8 = vld [vmem:[%s5495_s16] ss:$0 sm:$0xff]  ;;  %s5498_s16 = sld [smem:[#allocation26_spill]] }
0x107a   : > { %v4586_v45 = vpop.eup %4585 }
0x107b   : > { %v2348_v46 = vmul.f32 %v4586_v45, %v2346_v43  ;;  %vm2354_vm8 = vweird.f32 %v4586_v45 }
0x107c   : > { %vm2355_vm10 = vmor %vm2353_vm9, %vm2354_vm8 }
0x107d   : > { %v2349_v47 = vmul.f32 %v4586_v45, %v2348_v46 }
0x107f   : > { %v2350_v48 = vmul.f32 0.5, %v2349_v47  ;;  %v3144_v47 = vld [vmem:[%s5490_s11] sm:$0xff] }
0x1080   : > { %3170 = vmatpush.msra.mxu2 %v3144_v47  ;;  %v4381_v47 = vld [vmem:[%s5490_s11 + $0x40] sm:$0xff] }
0x1081   : > { %v2351_v49 = vsub.f32 1.5, %v2350_v48  ;;  %v4527_v48 = vld [vmem:[%s5492_s30] ss:$0 sm:$0xff] }
0x1083   : > { %v2352_v50 = vmul.f32 %v4586_v45, %v2351_v49 }
0x1085   : > { %v2356_v52 = vsel %vm2355_vm10, %v4586_v45, %v2352_v50 }
0x1086   : > { %v2357_v53 = vmul.f32 %v2356_v52, %v2340_v32 }
0x1088   : > { %v2361_v55 = vmul.f32 %v4521_v51, %v2357_v53  ;;  %v4528_v51 = vld [vmem:[%s5493_s28] ss:$0 sm:$0xff] }
0x108a   : > { %v2365_v56 = vadd.f32 %v4522_v9, %v2361_v55 }
0x108c   : > { %v2368_v57 = vsel %vm1521_vm0, %v2365_v56, 0.0 }
0x108d   : > { %2369 = vadd.xlane.f32.xlu2 %v2368_v57  ;;  %v4360_v57 = vld [vmem:[%s5490_s11 + $0x38] sm:$0xff] }
0x108e   : > { %3319 = vmatpush.msrb.mxu3 %v4360_v57 }
0x1090   : > { %3320 = vmatpush.msrb.mxu3 %v4359_v58  ;;  %v4390_v58 = vld [vmem:[%s5486_s18 + $0x58] sm:$0xff] }
0x1092   : > { %3321 = vmatpush.msrb.mxu3 %v4358_v59  ;;  %v4389_v59 = vld [vmem:[%s5486_s18 + $0x50] sm:$0xff] }
0x1094   : > { %3322 = vmatpush.msrb.mxu3 %v4357_v60  ;;  %v4388_v60 = vld [vmem:[%s5486_s18 + $0x48] sm:$0xff] }
0x10e7   : > { %v3054_v61 = vpop.xlane.xlu2 %3053 }
0x10e8   : > { %4587 = vrcp.f32 %v3054_v61 }
0x10ee   : > { %v4588_v62 = vpop.eup %4587 }
0x10ef   : > { %v3056_v0 = vmul.f32 %v4588_v62, %v4584_v42 }
0x10f1   : > { %4348 = vmatmul.msk.f32.vlgmr.msrb.gmra.mxu0 %vm1601_vm1, %v3056_v0 }
0x10f2   : > { %3349 = vmatpush.msrb.mxu0 %v4366_v15  ;;  %v4372_v15 = vld [vmem:[%s5487_s26 + $0x38] sm:$0xff] }
0x10f4   : > { %3350 = vmatpush.msrb.mxu0 %v4365_v16  ;;  %v4371_v16 = vld [vmem:[%s5487_s26 + $0x30] sm:$0xff] }
0x10f6   : > { %3351 = vmatpush.msrb.mxu0 %v4364_v17  ;;  %v4370_v17 = vld [vmem:[%s5487_s26 + $0x28] sm:$0xff] }
0x10f8   : > { %3352 = vmatpush.msrb.mxu0 %v4363_v20 }
0x1100   : > { %v2370_v1 = vpop.xlane.xlu2 %2369 }
0x1101   : > { %v2371_v2 = vmul.f32 %v2370_v1, %v5095_v54 }
0x1103   : > { %v2372_v3 = vsub.f32 %v2365_v56, %v2371_v2 }
0x1105   : > { %v2373_v4 = vmul.f32 %v2372_v3, %v2372_v3 }
0x1107   : > { %v2374_v29 = vsel %vm1521_vm0, %v2373_v4, 0.0 }
0x1108   : > { %2375 = vadd.xlane.f32.xlu1 %v2374_v29 }
0x116e   : > { %v3077_v5 = vpop.f32.mrf.mxu0 }
0x116f   : > { %4350 = vmatmul.msk.f32.vlgmr.msrb.gmra.mxu1 %vm1601_vm1, %v3077_v5  ;;  %v4530_v5 = vld [vmem:[%s5494_s2] ss:$0 sm:$0xff]  ;;  %s5497_s2 = sld [smem:[#allocation25_spill]] }
0x117b   : > { %v2376_v18 = vpop.xlane.xlu1 %2375 }
0x117c   : > { %v2377_v19 = vmul.f32 %v2376_v18, %v5095_v54  ;;  %v4369_v18 = vld [vmem:[%s5487_s26 + $0x20] sm:$0xff] }
0x117e   : > { %v2378_v21 = vadd.f32 1e-05, %v2377_v19  ;;  %v4532_v19 = vld [vmem:[%s5496_s1] ss:$0 sm:$0xff] }
0x1180   : > { %4589 = vrsqrt.f32 %v2378_v21  ;;  %vm2385_vm12 = vweird.f32 %v2378_v21 }
0x1186   : > { %v4590_v22 = vpop.eup %4589 }
0x1187   : > { %v2380_v23 = vmul.f32 %v4590_v22, %v2378_v21  ;;  %vm2386_vm11 = vweird.f32 %v4590_v22 }
0x1188   : > { %vm2387_vm13 = vmor %vm2385_vm12, %vm2386_vm11 }
0x1189   : > { %v2381_v26 = vmul.f32 %v4590_v22, %v2380_v23 }
0x118b   : > { %v2382_v27 = vmul.f32 0.5, %v2381_v26 }
0x118d   : > { %v2383_v28 = vsub.f32 1.5, %v2382_v27 }
0x118f   : > { %v2384_v30 = vmul.f32 %v4590_v22, %v2383_v28  ;;  %v4534_v28 = vld [vmem:[%s5492_s30 + $0x1] ss:$0 sm:$0xff] }
0x1191   : > { %v2388_v32 = vsel %vm2387_vm13, %v4590_v22, %v2384_v30  ;;  %vm4072_vm13 = vcmask 7168  }
0x1192   : > { %v2389_v34 = vmul.f32 %v2388_v32, %v2372_v3 }
0x1194   : > { %v2393_v36 = vmul.f32 %v4524_v31, %v2389_v34 }
0x1196   : > { %v5254_v37 = vadd.f32 %v4525_v33, %v2393_v36 }
0x1198   : > { %4352 = vmatmul.msk.f32.vlgmr.msra.gmra.mxu3 %vm1521_vm0, %v5254_v37  ;;  %4353 = vmatmul.msk.f32.vlgmr.msra.gmra.mxu0 %vm1521_vm0, %v5254_v37 }
0x11a0   : > { %4368 = vmatmul.msk.f32.vlgmr.msrb.gmra.mxu0 %vm1521_vm0, %v5254_v37 }
0x11ec   : > { %v3102_v42 = vpop.f32.mrf.mxu1 }
0x11ed   : > { %v3105_v43 = vadd.f32 %v3102_v42, %v5222_v25  ;;  %v4384_v42 = vld [vmem:[%s5490_s11 + $0x58] sm:$0xff] }
0x11ef   : > { %v3109_v44 = vadd.f32 %v4526_v41, %v3105_v43  ;;  %v4383_v43 = vld [vmem:[%s5490_s11 + $0x50] sm:$0xff] }
0x11f1   : > { %v3110_v45 = vadd.f32 %v3109_v44, %v5081_v35  ;;  %v4533_v44 = vld [vmem:[%s5496_s1 + $0x1] ss:$0 sm:$0xff] }
0x11f3   : > { %v3113_v46 = vsel %vm1521_vm0, %v3110_v45, 0.0 }
0x11f4   : > { %3114 = vadd.xlane.f32.xlu0 %v3113_v46 }
0x1215   : > { %v3231_v49 = vpop.f32.mrf.mxu0 }
0x1216   : > { %v3232_v50 = vadd.f32 %v4527_v48, %v3231_v49  ;;  %v3296_v49 = vld [vmem:[%s5497_s2] sm:$0xff] }
0x1218   : > { %3291 = vmatpush.msrb.mxu2 %v3232_v50 }
0x121b   : > { %v3203_v52 = vpop.f32.mrf.mxu3 }
0x121c   : > { %v3204_v53 = vadd.f32 %v4528_v51, %v3203_v52 }
0x121d   : > { %v3354_v11 = vpop.f32.mrf.mxu0 }
0x121e   : > { %4354 = vmatpush.xpose.msk.msra.mxu1 %vm1601_vm1, %v3204_v53  ;;  %v3355_v14 = vadd.f32 %v4529_v10, %v3354_v11  ;;  %v4536_v10 = vld [vmem:[%s5493_s28 + $0x2] ss:$0 sm:$0xff] }
0x121f   : > { %v4404_v11 = vld [vmem:[%s5490_s11 + $0x60] sm:$0xff] }
0x1222   : > { %3379 = vmatpush.msrb.mxu1 %v4372_v15 }
0x1224   : > { %3380 = vmatpush.msrb.mxu1 %v4371_v16 }
0x1226   : > { %3381 = vmatpush.msrb.mxu1 %v4370_v17  ;;  %v4413_v17 = vld [vmem:[%s5486_s18 + $0x78] sm:$0xff] }
0x1228   : > { %3382 = vmatpush.msrb.mxu1 %v4369_v18 }
0x1267   : > { %v3115_v25 = vpop.xlane.xlu0 %3114 }
0x1268   : > { %v3116_v35 = vmul.f32 %v3115_v25, %v5095_v54 }
0x126a   : > { %v3117_v9 = vsub.f32 %v3110_v45, %v3116_v35  ;;  %v4382_v45 = vld [vmem:[%s5490_s11 + $0x48] sm:$0xff] }
0x126c   : > { %v3118_v55 = vmul.f32 %v3117_v9, %v3117_v9 }
0x126e   : > { %v3119_v56 = vsel %vm1521_vm0, %v3118_v55, 0.0 }
0x126f   : > { %3120 = vadd.xlane.f32.xlu2 %v3119_v56 }
0x12e2   : > { %v3121_v61 = vpop.xlane.xlu2 %3120 }
0x12e3   : > { %v3122_v63 = vmul.f32 %v3121_v61, %v5095_v54  ;;  %v4387_v61 = vld [vmem:[%s5486_s18 + $0x40] sm:$0xff] }
0x12e5   : > { %v3123_v62 = vadd.f32 1e-05, %v3122_v63 }
0x12e7   : > { %4591 = vrsqrt.f32 %v3123_v62  ;;  %vm3130_vm15 = vweird.f32 %v3123_v62 }
0x12ed   : > { %v4592_v0 = vpop.eup %4591 }
0x12ee   : > { %v3125_v1 = vmul.f32 %v4592_v0, %v3123_v62  ;;  %vm3131_vm14 = vweird.f32 %v4592_v0 }
0x12ef   : > { %vm3132_vm2 = vmor %vm3130_vm15, %vm3131_vm14 }
0x12f0   : > { %v3126_v2 = vmul.f32 %v4592_v0, %v3125_v1  ;;  %v4378_v1 = vld [vmem:[%s5497_s2 + $0x8] sm:$0xff] }
0x12f1   : > { %3469 = vmatpush.msra.mxu0 %v4378_v1 }
0x12f2   : > { %v3127_v3 = vmul.f32 0.5, %v3126_v2  ;;  %v4396_v2 = vld [vmem:[%s5487_s26 + $0x58] sm:$0xff] }
0x12f3   : > { %3579 = vmatpush.msrb.mxu0 %v4396_v2 }
0x12f4   : > { %v3128_v4 = vsub.f32 1.5, %v3127_v3  ;;  %v4395_v3 = vld [vmem:[%s5487_s26 + $0x50] sm:$0xff] }
0x12f5   : > { %3580 = vmatpush.msrb.mxu0 %v4395_v3 }
0x12f6   : > { %v3129_v29 = vmul.f32 %v4592_v0, %v3128_v4  ;;  %v4394_v4 = vld [vmem:[%s5487_s26 + $0x48] sm:$0xff] }
0x12f7   : > { %3581 = vmatpush.msrb.mxu0 %v4394_v4  ;;  %v4425_v4 = vld [vmem:[%s5497_s2 + $0x18] sm:$0xff] }
0x12f8   : > { %v3133_v6 = vsel %vm3132_vm2, %v4592_v0, %v3129_v29  ;;  %v4393_v29 = vld [vmem:[%s5487_s26 + $0x40] sm:$0xff] }
0x12f9   : > { %v3134_v7 = vmul.f32 %v3133_v6, %v3117_v9  ;;  %3582 = vmatpush.msrb.mxu0 %v4393_v29 }
0x12fb   : > { %v3138_v12 = vmul.f32 %v4530_v5, %v3134_v7  ;;  %v4407_v5 = vld [vmem:[%s5490_s11 + $0x78] sm:$0xff]  ;;  %v4406_v7 = vld [vmem:[%s5490_s11 + $0x70] sm:$0xff] }
0x12fd   : > { %v5283_v13 = vadd.f32 %v4531_v8, %v3138_v12  ;;  %v4405_v8 = vld [vmem:[%s5490_s11 + $0x68] sm:$0xff]  ;;  %v4535_v12 = vld [vmem:[%s5496_s1 + $0x2] ss:$0 sm:$0xff] }
0x12ff   : > { %4351 = vmatmul.msk.f32.vlgmr.msra.gmra.mxu2 %vm1521_vm0, %v5283_v13  ;;  %4362 = vmatmul.msk.f32.vlgmr.msrb.gmra.mxu3 %vm1521_vm0, %v5283_v13 }
0x1300   : > { %4375 = vmatpush.xpose.msk.msra.mxu2 %vm1601_vm1, %v3355_v14 }
0x1382   : > { %v3172_v20 = vpop.f32.mrf.mxu2  ;;  %v3324_v46 = vpop.f32.mrf.mxu3 }
0x1383   : > { %v3173_v21 = vadd.f32 %v4532_v19, %v3172_v20  ;;  %v3325_v48 = vadd.f32 %v4533_v44, %v3324_v46  ;;  %v4412_v19 = vld [vmem:[%s5486_s18 + $0x70] sm:$0xff]  ;;  %v4411_v20 = vld [vmem:[%s5486_s18 + $0x68] sm:$0xff]  ;;  %v4419_v46 = vld [vmem:[%s5487_s26 + $0x78] sm:$0xff] }
0x1385   : > { %4355 = vmatmul.msk.f32.vlgmr.msra.gmra.mxu1 %vm1601_vm1, %v3173_v21  ;;  %v4410_v21 = vld [vmem:[%s5486_s18 + $0x60] sm:$0xff] }
0x1386   : > { %3492 = vmatpush.msra.mxu1 %v3296_v49  ;;  %v4416_v49 = vld [vmem:[%s5487_s26 + $0x60] sm:$0xff] }
0x138d   : > { %4374 = vmatmul.msk.f32.vlgmr.msrb.gmra.mxu1 %vm1521_vm0, %v5254_v37 }
0x1402   : > { %v3257_v22 = vpop.f32.mrf.mxu1 }
0x1403   : > { %v3260_v23 = vmul.f32 0.35355338, %v3257_v22  ;;  %v4402_v22 = vld [vmem:[%s5497_s2 + $0x10] sm:$0xff]  ;;  %s5500_s2 = sld [smem:[#allocation31_spill]] }
0x1405   : > { %v3261_v26 = vadd.f32 %v3260_v23, %v4970_v24 }
0x1407   : > { %v3262_v27 = vsel %vm1601_vm1, %v3261_v26, -inf }
0x1408   : > { %3263 = vmax.xlane.f32.xlu0 %v3262_v27 }
0x140a   : > { %v3384_v30 = vpop.f32.mrf.mxu1 }
0x140b   : > { %v3385_v31 = vadd.f32 %v4534_v28, %v3384_v30  ;;  %v4537_v28 = vld [vmem:[%s5492_s30 + $0x2] ss:$0 sm:$0xff] }
0x140d   : > { %3444 = vmatpush.msra.mxu3 %v3385_v31 }
0x140f   : > { %3549 = vmatpush.msrb.mxu3 %v4390_v58 }
0x1411   : > { %3550 = vmatpush.msrb.mxu3 %v4389_v59 }
0x1413   : > { %3551 = vmatpush.msrb.mxu3 %v4388_v60 }
0x1415   : > { %3552 = vmatpush.msrb.mxu3 %v4387_v61 }
0x147b   : > { %v3264_v32 = vpop.xlane.xlu0 %3263 }
0x147c   : > { %v3265_v33 = vsub.f32 %v3261_v26, %v3264_v32 }
0x147e   : > { %v3266_v34 = vmul.f32 1.442695, %v3265_v33 }
0x1480   : > { %4593 = vpow2.f32 %v3266_v34 }
0x1486   : > { %v4594_v36 = vpop.eup %4593 }
0x1487   : > { %v3268_v38 = vsel %vm1601_vm1, %v4594_v36, 0.0 }
0x1488   : > { %3269 = vadd.xlane.f32.xlu1 %v3268_v38  ;;  %v4539_v38 = vld [vmem:[%s5493_s28 + $0x3] ss:$0 sm:$0xff] }
0x14fb   : > { %v3270_v39 = vpop.xlane.xlu1 %3269 }
0x14fc   : > { %4595 = vrcp.f32 %v3270_v39 }
0x1502   : > { %v4596_v40 = vpop.eup %4595 }
0x1503   : > { %v3272_v41 = vmul.f32 %v4596_v40, %v4594_v36 }
0x1505   : > { %4356 = vmatmul.msk.f32.vlgmr.msrb.gmra.mxu2 %vm1601_vm1, %v3272_v41 }
0x1506   : > { %3519 = vmatpush.msrb.mxu2 %v4384_v42 }
0x1508   : > { %3520 = vmatpush.msrb.mxu2 %v4383_v43 }
0x150a   : > { %3521 = vmatpush.msrb.mxu2 %v4382_v45 }
0x150c   : > { %3522 = vmatpush.msrb.mxu2 %v4381_v47  ;;  %v4418_v47 = vld [vmem:[%s5487_s26 + $0x70] sm:$0xff] }
0x150d   : > { %4376 = vmatmul.msk.f32.vlgmr.msra.gmra.mxu2 %vm1601_vm1, %v3325_v48  ;;  %v4417_v48 = vld [vmem:[%s5487_s26 + $0x68] sm:$0xff] }
0x1515   : > { %4386 = vmatmul.msk.f32.vlgmr.msrb.gmra.mxu2 %vm1521_vm0, %v5283_v13 }
0x1588   : > { %v3293_v50 = vpop.f32.mrf.mxu2 }
0x1589   : > { %4380 = vmatmul.msk.f32.vlgmr.msra.gmra.mxu1 %vm1601_vm1, %v3293_v50 }
0x1590   : > { %v3410_v51 = vpop.f32.mrf.mxu2 }
0x1591   : > { %v3413_v52 = vmul.f32 0.35355338, %v3410_v51 }
0x1593   : > { %v3414_v53 = vadd.f32 %v3413_v52, %v4970_v24 }
0x1595   : > { %v3415_v25 = vsel %vm1601_vm1, %v3414_v53, -inf }
0x1596   : > { %3416 = vmax.xlane.f32.xlu2 %v3415_v25  ;;  %v4538_v25 = vld [vmem:[%s5496_s1 + $0x3] ss:$0 sm:$0xff]  ;;  %s5499_s1 = sld [smem:[#allocation29_spill]] }
0x1598   : > { %v3524_v15 = vpop.f32.mrf.mxu2 }
0x1599   : > { %v3525_v18 = vadd.f32 %v4535_v12, %v3524_v15 }
0x1606   : > { %v3494_v23 = vpop.f32.mrf.mxu1 }
0x1609   : > { %v3417_v35 = vpop.xlane.xlu2 %3416 }
0x160a   : > { %v3418_v9 = vsub.f32 %v3414_v53, %v3417_v35 }
0x160c   : > { %v3419_v55 = vmul.f32 1.442695, %v3418_v9  ;;  %v4540_v9 = vld [vmem:[%s5492_s30 + $0x3] ss:$0 sm:$0xff] }
0x160e   : > { %4597 = vpow2.f32 %v3419_v55 }
0x1614   : > { %v4598_v56 = vpop.eup %4597 }
0x1615   : > { %v3421_v57 = vsel %vm1601_vm1, %v4598_v56, 0.0 }
0x1616   : > { %3422 = vadd.xlane.f32.xlu0 %v3421_v57 }
0x1689   : > { %v3423_v63 = vpop.xlane.xlu0 %3422 }
0x168a   : > { %4599 = vrcp.f32 %v3423_v63 }
0x1690   : > { %v4600_v62 = vpop.eup %4599 }
0x1691   : > { %v3425_v0 = vmul.f32 %v4600_v62, %v4598_v56 }
0x1693   : > { %4377 = vmatmul.msk.f32.vlgmr.msra.gmra.mxu3 %vm1601_vm1, %v3425_v0 }
0x1694   : > { %3669 = vmatpush.msra.mxu3 %v4402_v22  ;;  %v3890_v22 = vld [vmem:[%s5499_s1] sm:$0xff] }
0x169b   : > { %4392 = vmatmul.msk.f32.vlgmr.msrb.gmra.mxu3 %vm1521_vm0, %v5254_v37 }
0x1716   : > { %v3446_v6 = vpop.f32.mrf.mxu3 }
0x1717   : > { %4379 = vmatmul.msk.f32.vlgmr.msra.gmra.mxu0 %vm1601_vm1, %v3446_v6 }
0x1718   : > { %3697 = vmatpush.msra.mxu0 %v4407_v5 }
0x171a   : > { %3698 = vmatpush.msra.mxu0 %v4406_v7  ;;  %v4541_v7 = vld [vmem:[%s5498_s16] ss:$0 sm:$0xff]  ;;  %s5501_s16 = sld [smem:[#allocation27_spill]] }
0x171c   : > { %3699 = vmatpush.msra.mxu0 %v4405_v8 }
0x171e   : > { %v3554_v14 = vpop.f32.mrf.mxu3  ;;  %3700 = vmatpush.msra.mxu0 %v4404_v11 }
0x171f   : > { %v3555_v16 = vadd.f32 %v4536_v10, %v3554_v14  ;;  %4398 = vmatmul.msk.f32.vlgmr.msrb.gmra.mxu0 %vm1521_vm0, %v5254_v37 }
0x1721   : > { %4399 = vmatpush.xpose.msk.msrb.mxu1 %vm1601_vm1, %v3555_v16 }
0x1724   : > { %4400 = vmatmul.msk.f32.vlgmr.msrb.gmra.mxu1 %vm1601_vm1, %v3525_v18 }
0x1725   : > { %3727 = vmatpush.msra.mxu1 %v4413_v17 }
0x1727   : > { %3728 = vmatpush.msra.mxu1 %v4412_v19  ;;  %4409 = vmatmul.msk.f32.vlgmr.msra.gmra.mxu0 %vm1521_vm0, %v5283_v13 }
0x1729   : > { %3729 = vmatpush.msra.mxu1 %v4411_v20  ;;  %v3893_v20 = vld [vmem:[%s5499_s1 + $0x18] sm:$0xff] }
0x172b   : > { %3730 = vmatpush.msra.mxu1 %v4410_v21  ;;  %v3892_v21 = vld [vmem:[%s5499_s1 + $0x10] sm:$0xff] }
0x172c   : > { %4415 = vmatmul.msk.f32.vlgmr.msra.gmra.mxu1 %vm1521_vm0, %v5254_v37 }
0x172d   : > { %3847 = vmatpush.msrb.mxu1 %v4425_v4 }
0x1794   : > { %v3471_v26 = vpop.f32.mrf.mxu0 }
0x1795   : > { %v3495_v27 = vadd.f32 %v3494_v23, %v3471_v26  ;;  %v3902_v23 = vld [vmem:[%s5500_s2 + $0x38] sm:$0xff]  ;;  %v3901_v26 = vld [vmem:[%s5500_s2 + $0x30] sm:$0xff] }
0x179c   : > { %v3584_v30 = vpop.f32.mrf.mxu0 }
0x179d   : > { %v3585_v31 = vadd.f32 %v4537_v28, %v3584_v30 }
0x179f   : > { %3644 = vmatpush.msra.mxu2 %v3585_v31  ;;  %v3899_v31 = vld [vmem:[%s5500_s2 + $0x20] sm:$0xff] }
0x17a1   : > { %v3610_v32 = vpop.f32.mrf.mxu1  ;;  %3757 = vmatpush.msrb.mxu2 %v4419_v46 }
0x17a2   : > { %v3613_v33 = vmul.f32 0.35355338, %v3610_v32 }
0x17a3   : > { %3758 = vmatpush.msrb.mxu2 %v4418_v47 }
0x17a4   : > { %v3614_v34 = vadd.f32 %v3613_v33, %v4970_v24  ;;  %v3702_v35 = vpop.f32.mrf.mxu0  ;;  %v3898_v33 = vld [vmem:[%s5500_s2 + $0x18] sm:$0xff] }
0x17a5   : > { %3759 = vmatpush.msrb.mxu2 %v4417_v48  ;;  %v3703_v55 = vadd.f32 %v4538_v25, %v3702_v35  ;;  %v3897_v48 = vld [vmem:[%s5500_s2 + $0x10] sm:$0xff]  ;;  %v4545_v35 = vld [vmem:[%s5504_s4] ss:$0 sm:$0xff]  ;;  %s5507_s4 = sld [smem:[#allocation37_spill]] }
0x17a6   : > { %v3615_v36 = vsel %vm1601_vm1, %v3614_v34, -inf }
0x17a7   : > { %3616 = vmax.xlane.f32.xlu1 %v3615_v36  ;;  %3760 = vmatpush.msrb.mxu2 %v4416_v49  ;;  %v3896_v49 = vld [vmem:[%s5500_s2 + $0x8] sm:$0xff] }
0x17a9   : > { %v3732_v39 = vpop.f32.mrf.mxu1 }
0x17aa   : > { %v3733_v40 = vadd.f32 %v4539_v38, %v3732_v39 }
0x17ac   : > { %4422 = vmatpush.xpose.msk.msrb.mxu3 %vm1601_vm1, %v3733_v40 }
0x181a   : > { %v3617_v41 = vpop.xlane.xlu1 %3616 }
0x181b   : > { %v3618_v42 = vsub.f32 %v3614_v34, %v3617_v41 }
0x181d   : > { %v3619_v43 = vmul.f32 1.442695, %v3618_v42  ;;  %v4542_v42 = vld [vmem:[%s5501_s16] ss:$0 sm:$0xff]  ;;  %s1504_s16 = scalar_lea.vmem %s4935_s12, %s4952_s0 }
0x181f   : > { %4601 = vpow2.f32 %v3619_v43 }
0x1825   : > { %v4602_v44 = vpop.eup %4601 }
0x1826   : > { %v3621_v45 = vsel %vm1601_vm1, %v4602_v44, 0.0 }
0x1827   : > { %3622 = vadd.xlane.f32.xlu2 %v3621_v45  ;;  %v4543_v45 = vld [vmem:[%s5502_s3] ss:$0 sm:$0xff]  ;;  %s5505_s3 = sld [smem:[#allocation33_spill]] }
0x189a   : > { %v3623_v50 = vpop.xlane.xlu2 %3622 }
0x189b   : > { %4603 = vrcp.f32 %v3623_v50  ;;  %v3895_v50 = vld [vmem:[%s5500_s2] sm:$0xff] }
0x18a1   : > { %v4604_v51 = vpop.eup %4603 }
0x18a2   : > { %v3625_v52 = vmul.f32 %v4604_v51, %v4602_v44 }
0x18a4   : > { %4401 = vmatmul.msk.f32.vlgmr.msra.gmra.mxu2 %vm1601_vm1, %v3625_v52 }
0x18a5   : > { %3922 = vmatpush.msra.mxu2 %v3893_v20  ;;  %v4024_v20 = vld [vmem:[%s4927_s19 + $0x10] sm:$0xff] }
0x18a7   : > { %3923 = vmatpush.msra.mxu2 %v3892_v21  ;;  %v4023_v21 = vld [vmem:[%s4927_s19 + $0x8] sm:$0xff] }
0x18ac   : > { %4421 = vmatmul.msk.f32.vlgmr.msrb.gmra.mxu2 %vm1521_vm0, %v5254_v37 }
0x1927   : > { %v3646_v53 = vpop.f32.mrf.mxu2 }
0x1928   : > { %4403 = vmatmul.msk.f32.vlgmr.msra.gmra.mxu3 %vm1601_vm1, %v3646_v53 }
0x1929   : > { %3945 = vmatpush.msra.mxu3 %v3902_v23 }
0x192b   : > { %3946 = vmatpush.msra.mxu3 %v3901_v26 }
0x192f   : > { %v3762_v56 = vpop.f32.mrf.mxu2 }
0x1930   : > { %v3763_v57 = vadd.f32 %v4540_v9, %v3762_v56  ;;  %4423 = vmatmul.msk.f32.vlgmr.msrb.gmra.mxu3 %vm1601_vm1, %v3703_v55 }
0x1932   : > { %3822 = vmatpush.msrb.mxu0 %v3763_v57 }
0x19ab   : > { %v3671_v58 = vpop.f32.mrf.mxu3 }
0x19ac   : > { %v3674_v59 = vadd.f32 %v3671_v58, %v3495_v27  ;;  %v3900_v27 = vld [vmem:[%s5500_s2 + $0x28] sm:$0xff] }
0x19ad   : > { %3947 = vmatpush.msra.mxu3 %v3900_v27 }
0x19af   : > { %3948 = vmatpush.msra.mxu3 %v3899_v31 }
0x19b1   : > { %3949 = vmatpush.msra.mxu3 %v3898_v33 }
0x19b3   : > { %v3788_v60 = vpop.f32.mrf.mxu3  ;;  %3950 = vmatpush.msra.mxu3 %v3897_v48 }
0x19b4   : > { %v3791_v61 = vmul.f32 0.35355338, %v3788_v60 }
0x19b5   : > { %3951 = vmatpush.msra.mxu3 %v3896_v49 }
0x19b6   : > { %v3792_v63 = vadd.f32 %v3791_v61, %v4970_v24 }
0x19b7   : > { %3952 = vmatpush.msra.mxu3 %v3895_v50 }
0x19b8   : > { %v3793_v37 = vsel %vm1601_vm1, %v3792_v63, -inf }
0x19b9   : > { %3794 = vmax.xlane.f32.xlu0 %v3793_v37 }
0x1a2c   : > { %v3795_v62 = vpop.xlane.xlu0 %3794 }
0x1a2d   : > { %v3796_v0 = vsub.f32 %v3792_v63, %v3795_v62 }
0x1a2f   : > { %v3797_v1 = vmul.f32 1.442695, %v3796_v0 }
0x1a31   : > { %4605 = vpow2.f32 %v3797_v1 }
0x1a37   : > { %v4606_v2 = vpop.eup %4605 }
0x1a38   : > { %v3799_v3 = vsel %vm1601_vm1, %v4606_v2, 0.0 }
0x1a39   : > { %3800 = vadd.xlane.f32.xlu1 %v3799_v3 }
0x1aac   : > { %v3801_v29 = vpop.xlane.xlu1 %3800 }
0x1aad   : > { %4607 = vrcp.f32 %v3801_v29 }
0x1ab3   : > { %v4608_v5 = vpop.eup %4607 }
0x1ab4   : > { %v3803_v6 = vmul.f32 %v4608_v5, %v4606_v2 }
0x1ab6   : > { %4424 = vmatmul.msk.f32.vlgmr.msrb.gmra.mxu0 %vm1601_vm1, %v3803_v6  ;;  %v4546_v6 = vld [vmem:[%s5505_s3] ss:$0 sm:$0xff] }
0x1b33   : > { %v3824_v24 = vpop.f32.mrf.mxu0 }
0x1b34   : > { %4426 = vmatmul.msk.f32.vlgmr.msrb.gmra.mxu1 %vm1601_vm1, %v3824_v24 }
0x1bb1   : > { %v3849_v8 = vpop.f32.mrf.mxu1 }
0x1bb2   : > { %v3852_v10 = vadd.f32 %v3849_v8, %v3674_v59 }
0x1bb4   : > { %v3856_v11 = vadd.f32 %v4541_v7, %v3852_v10 }
0x1bb6   : > { %v3857_v12 = vadd.f32 %v3856_v11, %v5283_v13  ;;  %v3891_v13 = vld [vmem:[%s5499_s1 + $0x8] sm:$0xff]  ;;  %s5503_s1 = sld [smem:[#allocation30_spill]] }
0x1bb7   : > { %3924 = vmatpush.msra.mxu2 %v3891_v13  ;;  %v4022_v13 = vld [vmem:[%s4927_s19] sm:$0xff] }
0x1bb8   : > { %v3860_v14 = vsel %vm1521_vm0, %v3857_v12, 0.0 }
0x1bb9   : > { %3861 = vadd.xlane.f32.xlu2 %v3860_v14  ;;  %3925 = vmatpush.msra.mxu2 %v3890_v22 }
0x1bbc   : > { %v4544_v51 = vld [vmem:[%s5503_s1] ss:$0 sm:$0xff]  ;;  %s5506_s1 = sld [smem:[#allocation34_spill]] }
0x1bc2   : > { %v4547_v8 = vld [vmem:[%s5506_s1] ss:$0 sm:$0xff] }
0x1c2c   : > { %v3862_v15 = vpop.xlane.xlu2 %3861 }
0x1c2d   : > { %v3863_v16 = vmul.f32 %v3862_v15, %v5095_v54 }
0x1c2f   : > { %v3864_v17 = vsub.f32 %v3857_v12, %v3863_v16 }
0x1c31   : > { %v3865_v18 = vmul.f32 %v3864_v17, %v3864_v17 }
0x1c33   : > { %v3866_v19 = vsel %vm1521_vm0, %v3865_v18, 0.0 }
0x1c34   : > { %3867 = vadd.xlane.f32.xlu0 %v3866_v19  ;;  %v4025_v19 = vld [vmem:[%s4927_s19 + $0x18] sm:$0xff] }
0x1c35   : > { %4045 = vmatpush.msra.mxu0 %v4025_v19 }
0x1c37   : > { %4046 = vmatpush.msra.mxu0 %v4024_v20 }
0x1c39   : > { %4047 = vmatpush.msra.mxu0 %v4023_v21 }
0x1c3b   : > { %4048 = vmatpush.msra.mxu0 %v4022_v13 }
0x1ca7   : > { %v3868_v28 = vpop.xlane.xlu0 %3867 }
0x1ca8   : > { %v3869_v30 = vmul.f32 %v3868_v28, %v5095_v54 }
0x1caa   : > { %v3870_v32 = vadd.f32 1e-05, %v3869_v30 }
0x1cac   : > { %4609 = vrsqrt.f32 %v3870_v32  ;;  %vm3877_vm3 = vweird.f32 %v3870_v32 }
0x1cb2   : > { %v4610_v34 = vpop.eup %4609 }
0x1cb3   : > { %v3872_v36 = vmul.f32 %v4610_v34, %v3870_v32  ;;  %vm3878_vm1 = vweird.f32 %v4610_v34 }
0x1cb4   : > { %vm3879_vm4 = vmor %vm3877_vm3, %vm3878_vm1 }
0x1cb5   : > { %v3873_v38 = vmul.f32 %v4610_v34, %v3872_v36 }
0x1cb7   : > { %v3874_v39 = vmul.f32 0.5, %v3873_v38 }
0x1cb9   : > { %v3875_v40 = vsub.f32 1.5, %v3874_v39  ;;  %v4549_v39 = vld [vmem:[%s4922_s24] ss:$0 sm:$0xff] }
0x1cbb   : > { %v3876_v41 = vmul.f32 %v4610_v34, %v3875_v40 }
0x1cbd   : > { %v3880_v43 = vsel %vm3879_vm4, %v4610_v34, %v3876_v41  ;;  %v4548_v34 = vld [vmem:[%s5507_s4] ss:$0 sm:$0xff] }
0x1cbe   : > { %v3881_v44 = vmul.f32 %v3880_v43, %v3864_v17 }
0x1cc0   : > { %v3885_v46 = vmul.f32 %v4542_v42, %v3881_v44 }
0x1cc2   : > { %v3889_v47 = vadd.f32 %v4543_v45, %v3885_v46 }
0x1cc4   : > { %4427 = vmatmul.msk.f32.vlgmr.msra.gmra.mxu2 %vm1521_vm0, %v3889_v47 }
0x1d47   : > { %v3927_v52 = vpop.f32.mrf.mxu2 }
0x1d48   : > { %v3928_v53 = vadd.f32 %v4544_v51, %v3927_v52 }
0x1d4a   : > { %v3930_v25 = vmax.f32 %v3928_v53, 0.0 }
0x1d4c   : > { %4428 = vmatmul.msk.f32.vlgmr.msra.gmra.mxu3 %vm2309_vm7, %v3930_v25 }
0x1dcf   : > { %v3954_v9 = vpop.f32.mrf.mxu3 }
0x1dd0   : > { %v3955_v55 = vadd.f32 %v4545_v35, %v3954_v9 }
0x1dd2   : > { %v3957_v56 = vadd.f32 %v3955_v55, %v3889_v47 }
0x1dd4   : > { %v3960_v57 = vsel %vm1521_vm0, %v3957_v56, 0.0 }
0x1dd5   : > { %3961 = vadd.xlane.f32.xlu1 %v3960_v57 }
0x1e48   : > { %v3962_v58 = vpop.xlane.xlu1 %3961 }
0x1e49   : > { %v3963_v59 = vmul.f32 %v3962_v58, %v5095_v54 }
0x1e4b   : > { %v3964_v60 = vsub.f32 %v3957_v56, %v3963_v59 }
0x1e4d   : > { %v3965_v61 = vmul.f32 %v3964_v60, %v3964_v60 }
0x1e4f   : > { %v3966_v63 = vsel %vm1521_vm0, %v3965_v61, 0.0 }
0x1e50   : > { %3967 = vadd.xlane.f32.xlu2 %v3966_v63 }
0x1ec3   : > { %v3968_v37 = vpop.xlane.xlu2 %3967 }
0x1ec4   : > { %v3969_v62 = vmul.f32 %v3968_v37, %v5095_v54 }
0x1ec6   : > { %v3970_v0 = vadd.f32 1e-05, %v3969_v62 }
0x1ec8   : > { %4611 = vrsqrt.f32 %v3970_v0  ;;  %vm3977_vm6 = vweird.f32 %v3970_v0 }
0x1ece   : > { %v4612_v1 = vpop.eup %4611 }
0x1ecf   : > { %v3972_v2 = vmul.f32 %v4612_v1, %v3970_v0  ;;  %vm3978_vm5 = vweird.f32 %v4612_v1 }
0x1ed0   : > { %vm3979_vm7 = vmor %vm3977_vm6, %vm3978_vm5 }
0x1ed1   : > { %v3973_v3 = vmul.f32 %v4612_v1, %v3972_v2 }
0x1ed3   : > { %v3974_v4 = vmul.f32 0.5, %v3973_v3 }
0x1ed5   : > { %v3975_v29 = vsub.f32 1.5, %v3974_v4 }
0x1ed7   : > { %v3976_v5 = vmul.f32 %v4612_v1, %v3975_v29 }
0x1ed9   : > { %v3980_v24 = vsel %vm3979_vm7, %v4612_v1, %v3976_v5 }
0x1eda   : > { %v3981_v7 = vmul.f32 %v3980_v24, %v3964_v60 }
0x1edc   : > { %v3985_v10 = vmul.f32 %v4546_v6, %v3981_v7 }
0x1ede   : > { %v3989_v11 = vadd.f32 %v4547_v8, %v3985_v10 }
0x1ee0   : > { %v3992_v12 = vsel %vm1521_vm0, %v3989_v11, 0.0 }
0x1ee1   : > { %3993 = vadd.xlane.f32.xlu0 %v3992_v12 }
0x1f54   : > { %v3994_v14 = vpop.xlane.xlu0 %3993 }
0x1f55   : > { %v3995_v15 = vmul.f32 %v3994_v14, %v5095_v54 }
0x1f57   : > { %v3996_v16 = vsub.f32 %v3989_v11, %v3995_v15 }
0x1f59   : > { %v3997_v17 = vmul.f32 %v3996_v16, %v3996_v16 }
0x1f5b   : > { %v3998_v18 = vsel %vm1521_vm0, %v3997_v17, 0.0 }
0x1f5c   : > { %3999 = vadd.xlane.f32.xlu1 %v3998_v18 }
0x1fcf   : > { %v4000_v22 = vpop.xlane.xlu1 %3999 }
0x1fd0   : > { %v4001_v23 = vmul.f32 %v4000_v22, %v5095_v54  ;;  %v4550_v54 = vld [vmem:[#allocation2] ss:$0 sm:$0xff] }
0x1fd2   : > { %v4002_v26 = vadd.f32 1e-05, %v4001_v23 }
0x1fd4   : > { %4613 = vrsqrt.f32 %v4002_v26  ;;  %vm4009_vm9 = vweird.f32 %v4002_v26 }
0x1fda   : > { %v4614_v27 = vpop.eup %4613 }
0x1fdb   : > { %v4004_v28 = vmul.f32 %v4614_v27, %v4002_v26  ;;  %vm4010_vm8 = vweird.f32 %v4614_v27 }
0x1fdc   : > { %vm4011_vm10 = vmor %vm4009_vm9, %vm4010_vm8 }
0x1fdd   : > { %v4005_v30 = vmul.f32 %v4614_v27, %v4004_v28 }
0x1fdf   : > { %v4006_v31 = vmul.f32 0.5, %v4005_v30 }
0x1fe1   : > { %v4007_v32 = vsub.f32 1.5, %v4006_v31 }
0x1fe3   : > { %v4008_v33 = vmul.f32 %v4614_v27, %v4007_v32 }
0x1fe5   : > { %v4012_v36 = vsel %vm4011_vm10, %v4614_v27, %v4008_v33 }
0x1fe6   : > { %v4013_v38 = vmul.f32 %v4012_v36, %v3996_v16 }
0x1fe8   : > { %v4017_v40 = vmul.f32 %v4548_v34, %v4013_v38 }
0x1fea   : > { %v4021_v41 = vadd.f32 %v4549_v39, %v4017_v40 }
0x1fec   : > { %4429 = vmatmul.msk.f32.vlgmr.msra.gmra.mxu0 %vm1521_vm0, %v4021_v41 }
0x2069   : > { %v4050_v42 = vpop.f32.mrf.mxu0 }
0x206a   : > { %v4051_v43 = vadd.f32 %v4550_v54, %v4050_v42 }
0x206c   : > { %v4430_v44 = vmul.f32 -1.442695, %v4051_v43 }
0x206e   : > { %4615 = vpow2.f32 %v4430_v44 }
0x2074   : > { %v4616_v45 = vpop.eup %4615 }
0x2075   : > { %v4056_v46 = vadd.f32 1.0, %v4616_v45 }
0x2077   : > { %4617 = vrcp.f32 %v4056_v46  ;;  %v4068_v50 = vand.u32 2147483648, %v4056_v46  ;;  %v4066_v52 = vand.u32 2147483647, %v4056_v46  ;;  %vm4062_vm12 = vweird.f32 %v4056_v46 }
0x2079   : > { %v4069_v25 = vor.u32 1.1754944e-38, %v4068_v50  ;;  %vm4067_vm14 = vcmp.eq.f32.partialorder %v4066_v52, 8.507059e+37 }
0x207d   : > { %v4618_v47 = vpop.eup %4617 }
0x207e   : > { %v4058_v48 = vmul.f32 %v4618_v47, %v4056_v46  ;;  %vm4063_vm11 = vweird.f32 %v4618_v47 }
0x207f   : > { %vm4064_vm0 = vmor %vm4062_vm12, %vm4063_vm11 }
0x2080   : > { %v4059_v49 = vsub.f32 1.0, %v4058_v48 }
0x2082   : > { %v4060_v51 = vmul.f32 %v4618_v47, %v4059_v49 }
0x2084   : > { %v4061_v53 = vadd.f32 %v4618_v47, %v4060_v51 }
0x2086   : > { %v4065_v35 = vsel %vm4064_vm0, %v4618_v47, %v4061_v53 }
0x2087   : > { %v4070_v9 = vsel %vm4067_vm14, %v4069_v25, %v4065_v35 }
0x2088   : > { %4073 = vst.msk [vmem:[%s1504_s16] sm:$0xff] %vm4072_vm13, %v4070_v9 }
0x2089 PF: > { %s113_s15 = sadd.s32 1, %s4625_s15  }
0x208a   : > { %p110_p4 = scmp.ge.s32.totalorder %s113_s15, 4  }
0x208c   :  { %112 = sbr.rel (!%p110_p4) target bundleno = 96 (0x60), region = 366 }

</bundles_post_ra>
